<compile_context>
chip_gen: v7x
topology: tpu7x:2x2x1
jax: 0.10.0
libtpu: 0.0.40
codegen_flags: <defaults>
</compile_context>

<pallas_src>
import functools

import jax
import jax.numpy as jnp
from jax.experimental import pallas as pl
from jax.experimental.pallas import tpu as pltpu

KS = 3        # kernel size (stride=1, padding=1: module defaults)
LANES = 128


def _round_up(x, m):
    return ((x + m - 1) // m) * m


def _cdiv(a, b):
    return -(-a // b)


def _vmem_capacity_bytes():
    try:
        return int(pltpu.get_tpu_info().vmem_capacity_bytes)
    except Exception:
        return 64 << 20   # conservative fallback (v7x per-core VMEM)


def _estimate_vmem_bytes(TH, W, W2, Cin, Cp, Cop):
    """Rough per-step VMEM footprint for a tile height TH (double-buffered pipeline)."""
    bf16, f32 = 2, 4
    cin_l = _round_up(max(Cin, 1), LANES)        # lane padding inside VMEM
    wband = _round_up(W2 + 2, 8)
    wp8 = _round_up(W, 8)
    band = 2 * (TH + 4) * wband * cin_l * bf16               # double-buffered input band
    mid = (TH + 2) * W2 * Cp * bf16                          # persistent VMEM scratch
    outb = 2 * TH * wp8 * Cop * bf16                         # double-buffered output blk
    wts = 2 * KS * KS * (Cin * Cp + Cp * Cop) * bf16         # (double-buffered) weights
    m1, m2 = (TH + 2) * W2, TH * wp8
    tmps = (m1 * KS * KS * cin_l + m2 * KS * KS * Cp) * bf16  # im2col patch concats
    tmps += (m1 * Cp + m2 * Cop) * f32 * 2                    # f32 accumulators / temps
    return band + mid + outb + wts + tmps


def _pick_tiling(N, H, W, W2, Cin, Cp, Cop):
    """Choose (TH, nb, vmem_limit) from the generation's VMEM capacity."""
    cap = _vmem_capacity_bytes()
    budget = int(cap * 0.55)          # headroom for compiler scratch / spills
    max_pixels = 8192                 # bound matmul M and im2col temporaries
    th = 1
    for cand in range(1, H + 1):      # estimate is monotone in cand -> keep the largest fit
        if cand > 1 and cand * W > max_pixels:
            break
        if _estimate_vmem_bytes(cand, W, W2, Cin, Cp, Cop) <= budget:
            th = cand
    nb = _cdiv(H, th)
    if N * nb < 2 and H > 1:          # >= 2 parallel steps so megacore has work
        nb = 2
    if (N * nb) % 2 == 1 and nb < H:  # even total step count balances the 2 TCs (v7x)
        nb += 1
    th = max(1, _cdiv(H, nb))
    est = _estimate_vmem_bytes(th, W, W2, Cin, Cp, Cop)
    vmem_limit = int(min(cap - (4 << 20), max(2 * est, 32 << 20)))
    vmem_limit = max(vmem_limit, 16 << 20)
    return th, nb, vmem_limit


def _conv3x3_bn_relu(src, w_flat, scale, bias, *, out_h, out_w, ci, co):
    """3x3/s1 conv (single im2col MXU matmul, f32 acc) + folded-BN affine + ReLU.

    src:    (>= out_h+2, >= out_w+2, ci) zero-padded activations (bf16)
    w_flat: (9*ci, co) bf16 weights, rows ordered (kh, kw, ci)
    scale, bias: (1, co) f32
    returns (out_h, out_w, co) f32
    """
    m = out_h * out_w
    patches = [src[kh:kh + out_h, kw:kw + out_w, :].reshape(m, ci)
               for kh in range(KS) for kw in range(KS)]
    acc = jnp.dot(jnp.concatenate(patches, axis=-1), w_flat,
                  preferred_element_type=jnp.float32)        # K = 9*ci on the MXU
    y = jnp.maximum(acc * scale + bias, 0.0)                 # folded BN + ReLU in f32
    return y.reshape(out_h, out_w, co)


def _fused_double_conv_kernel(x_ref, w1_ref, s1_ref, b1_ref,
                              w2_ref, s2_ref, b2_ref, o_ref, mid_ref,
                              *, TH, NB, H, W, W2, Cin, Cp, Cop):
    t = pl.program_id(0) % NB                    # row-band index within the image
    x = x_ref[0]                                 # (TH+4, W2+2, Cin) bf16 halo band

    # ---- layer 1: conv+BN+ReLU over a (TH+2, W2) window (1-row/col halo for layer 2)
    y1 = _conv3x3_bn_relu(x, w1_ref[...], s1_ref[...], b1_ref[...],
                          out_h=TH + 2, out_w=W2, ci=Cin, co=Cp)
    mid_ref[...] = y1.astype(mid_ref.dtype)      # fused intermediate stays in VMEM

    # ---- layer-2 zero padding: explicit boundary stores (replaces iota/where mask)
    zrow = jnp.zeros((1, W2, Cp), mid_ref.dtype)
    mid_ref[:, 0:1, :] = jnp.zeros((TH + 2, 1, Cp), mid_ref.dtype)              # col -1
    mid_ref[:, W + 1:, :] = jnp.zeros((TH + 2, W2 - W - 1, Cp), mid_ref.dtype)  # cols >= W

    @pl.when(t == 0)
    def _():
        mid_ref[0:1, :, :] = zrow                # row -1 (top image border)

    # rows at/below the image bottom: only the last band has a non-empty range
    zero_start = jnp.maximum(H + 1 - t * TH, 0)

    def _zero_row(i, carry):
        mid_ref[pl.ds(i, 1), :, :] = zrow
        return carry

    jax.lax.fori_loop(zero_start, TH + 2, _zero_row, 0)

    # ---- layer 2: conv+BN+ReLU over the (TH, W) output tile
    y2 = _conv3x3_bn_relu(mid_ref[...], w2_ref[...], s2_ref[...], b2_ref[...],
                          out_h=TH, out_w=W, ci=Cp, co=Cop)
    o_ref[...] = y2.reshape(1, TH, W, Cop).astype(o_ref.dtype)


def _pack_layer(w_hwio, scale, bias, ci_pad, co_pad):
    """Pad output channels to lane-dense size and flatten weights to (9*ci_pad, co_pad)."""
    kh, kw, ci, co = w_hwio.shape
    wp = jnp.zeros((kh, kw, ci_pad, co_pad), jnp.float32)
    wp = wp.at[:, :, :ci, :co].set(w_hwio)
    w_flat = wp.reshape(kh * kw * ci_pad, co_pad).astype(jnp.bfloat16)
    sp = jnp.zeros((1, co_pad), jnp.float32).at[0, :co].set(scale)
    bp = jnp.zeros((1, co_pad), jnp.float32).at[0, :co].set(bias)
    return w_flat, sp, bp


def unet_conv2_forward(x_nchw, layer_params, *, keep_nhwc=False):
    """Forward of unetConv2 (n=2, is_batchnorm=True, eval-mode BN). x: (N,C,H,W) f32."""
    assert len(layer_params) == 2, "fused kernel implements the default n=2 block"
    # TODO(synk): generalize the in-VMEM fusion to n != 2 conv layers.
    (w1, s1, b1), (w2, s2, b2) = layer_params
    N, Cin, H, W = x_nchw.shape
    Cmid, Cout = w1.shape[-1], w2.shape[-1]
    # TODO(synk): lane-padding Cmid/Cout to 128 doubles MXU work for 64-channel blocks;
    # evaluate Cp = Cmid (half-lane-dense mid) there per the v7x review note.
    Cp = _round_up(Cmid, LANES)      # lane-dense intermediate channels
    Cop = _round_up(Cout, LANES)     # lane-dense output channels
    W2 = _round_up(W + 2, 8)         # conv-1 output width (keeps reshapes tile-aligned)

    TH, nb, vmem_limit = _pick_tiling(N, H, W, W2, Cin, Cp, Cop)
    H_pad = nb * TH
    G = N * nb                       # fused (batch x row-band) parallel grid

    # NCHW -> NHWC once, bf16 activations; pad rows/cols with the conv halos, then
    # pre-extract overlapping row bands so BlockSpec auto-pipelining double-buffers
    # the halo DMA (no exposed manual copy inside the kernel).
    x = jnp.transpose(x_nchw, (0, 2, 3, 1)).astype(jnp.bfloat16)
    xp = jnp.pad(x, ((0, 0), (2, 2 + H_pad - H), (2, W2 - W), (0, 0)))
    if nb == 1:
        xb = xp[:, None]                                        # pure reshape, no copy pass
    else:
        row_idx = jnp.arange(nb)[:, None] * TH + jnp.arange(TH + 4)[None, :]
        xb = jnp.take(xp, row_idx, axis=1)                      # (N, nb, TH+4, W2+2, Cin)
    xb = xb.reshape(G, TH + 4, W2 + 2, Cin)

    w1f, s1p, b1p = _pack_layer(w1, s1, b1, Cin, Cp)
    w2f, s2p, b2p = _pack_layer(w2, s2, b2, Cp, Cop)

    kern = functools.partial(_fused_double_conv_kernel,
                             TH=TH, NB=nb, H=H, W=W, W2=W2, Cin=Cin, Cp=Cp, Cop=Cop)

    flops = int(2 * G * ((TH + 2) * W2 * KS * KS * Cin * Cp
                         + TH * W * KS * KS * Cp * Cop))
    bytes_accessed = int(xb.size * 2 + (w1f.size + w2f.size) * 2 + G * TH * W * Cop * 2)

    out = pl.pallas_call(
        kern,
        out_shape=jax.ShapeDtypeStruct((G, TH, W, Cop), jnp.bfloat16),
        grid_spec=pltpu.PrefetchScalarGridSpec(
            num_scalar_prefetch=0,
            grid=(G,),
            in_specs=[
                pl.BlockSpec((1, TH + 4, W2 + 2, Cin), lambda g: (g, 0, 0, 0)),  # halo band
                pl.BlockSpec((KS * KS * Cin, Cp), lambda g: (0, 0)),   # w1 (resident)
                pl.BlockSpec((1, Cp), lambda g: (0, 0)),               # scale1
                pl.BlockSpec((1, Cp), lambda g: (0, 0)),               # bias1
                pl.BlockSpec((KS * KS * Cp, Cop), lambda g: (0, 0)),   # w2 (resident)
                pl.BlockSpec((1, Cop), lambda g: (0, 0)),              # scale2
                pl.BlockSpec((1, Cop), lambda g: (0, 0)),              # bias2
            ],
            out_specs=pl.BlockSpec((1, TH, W, Cop), lambda g: (g, 0, 0, 0)),
            scratch_shapes=[pltpu.VMEM((TH + 2, W2, Cp), jnp.bfloat16)],  # fused mid
        ),
        compiler_params=pltpu.CompilerParams(
            dimension_semantics=("parallel",),
            vmem_limit_bytes=vmem_limit,
        ),
        cost_estimate=pl.CostEstimate(flops=flops, transcendentals=0,
                                      bytes_accessed=bytes_accessed),
    )(xb, w1f, s1p, b1p, w2f, s2p, b2p)

    out = out.reshape(N, H_pad, W, Cop)[:, :H, :, :Cout]   # drop row / lane padding
    if keep_nhwc:
        return out                                         # NHWC bf16, no extra HBM pass
    # TODO(synk): skip this transpose/cast pass when the consumer accepts NHWC/bf16.
    return jnp.transpose(out, (0, 3, 1, 2)).astype(x_nchw.dtype)


def init_unet_conv2_params(key, in_size, out_size, n=2, eps=1e-5):
    """Synthetic per-layer (conv weight HWIO, folded BN scale, folded BN bias)."""
    layers = []
    cin = in_size
    for _ in range(n):
        key, kw_, kb, kg, kbeta, km, kv = jax.random.split(key, 7)
        w = jax.random.normal(kw_, (KS, KS, cin, out_size), jnp.float32) * 0.1
        conv_b = jax.random.normal(kb, (out_size,), jnp.float32) * 0.1
        gamma = 1.0 + 0.1 * jax.random.normal(kg, (out_size,), jnp.float32)
        beta = 0.1 * jax.random.normal(kbeta, (out_size,), jnp.float32)
        running_mean = 0.1 * jax.random.normal(km, (out_size,), jnp.float32)
        running_var = 0.5 + jnp.abs(jax.random.normal(kv, (out_size,), jnp.float32))
        # eval-mode BN folded into a post-conv affine:
        #   bn(conv(x)+b) = conv(x)*s + ((b-mean)*s + beta),  s = gamma/sqrt(var+eps)
        s = gamma / jnp.sqrt(running_var + eps)
        bias_eff = (conv_b - running_mean) * s + beta
        layers.append((w, s, bias_eff))
        cin = out_size
    return layers


def _reference_forward(x_nchw, layer_params):
    """Pure-JAX f32 reference for correctness checking."""
    y = x_nchw
    for (w, s, b) in layer_params:
        y = jax.lax.conv_general_dilated(
            y, w, window_strides=(1, 1), padding=((1, 1), (1, 1)),
            dimension_numbers=("NCHW", "HWIO", "NCHW"))
        y = y * s[None, :, None, None] + b[None, :, None, None]
        y = jnp.maximum(y, 0.0)
    return y


if __name__ == "__main__":
    key = jax.random.PRNGKey(0)
    k_x, k_p = jax.random.split(key)

    N, Cin, H, W = 2, 4, 16, 16
    Cout = 8

    x = jax.random.normal(k_x, (N, Cin, H, W), jnp.float32)
    params = init_unet_conv2_params(k_p, in_size=Cin, out_size=Cout, n=2)

    out = jax.jit(unet_conv2_forward)(x, params)
    jax.block_until_ready(out)

    assert out.shape == (N, Cout, H, W), out.shape
    assert out.dtype == jnp.float32

    # kernel feeds the MXU bf16 activations/weights (f32 accumulate) and stores bf16
    ref = _reference_forward(x, params)
    err = float(jnp.max(jnp.abs(out - ref)))
    tol = 5e-2 * (1.0 + float(jnp.max(jnp.abs(ref))))
    assert err < tol, f"max abs err {err} (tol {tol})"

    print("KERNEL_OK")
</pallas_src>

<mosaic_0001>
module attributes {stable_mosaic.version = 11 : i64} {
  func.func @_fused_double_conv_kernel(%arg0: i32, %arg1: memref<1x20x26x4xbf16, #tpu.memory_space<vmem>>, %arg2: memref<36x128xbf16, #tpu.memory_space<vmem>>, %arg3: memref<1x128xf32, #tpu.memory_space<vmem>>, %arg4: memref<1x128xf32, #tpu.memory_space<vmem>>, %arg5: memref<1152x128xbf16, #tpu.memory_space<vmem>>, %arg6: memref<1x128xf32, #tpu.memory_space<vmem>>, %arg7: memref<1x128xf32, #tpu.memory_space<vmem>>, %arg8: memref<1x16x16x128xbf16, #tpu.memory_space<vmem>>, %arg9: memref<18x24x128xbf16, #tpu.memory_space<vmem>>) attributes {dimension_semantics = [#tpu.dimension_semantics<parallel>], iteration_bounds = array<i64: 2>, scalar_prefetch = 0 : i64, scratch_operands = 1 : i64, tpu.core_type = #tpu.core_type<tc>, window_params = [{transform_indices = @transform_0, window_bounds = array<i64: 1, 20, 26, 4>}, {pipeline_mode = #tpu.pipeline_mode<synchronous>, transform_indices = @transform_1, window_bounds = array<i64: 36, 128>}, {pipeline_mode = #tpu.pipeline_mode<synchronous>, transform_indices = @transform_2, window_bounds = array<i64: 1, 128>}, {pipeline_mode = #tpu.pipeline_mode<synchronous>, transform_indices = @transform_3, window_bounds = array<i64: 1, 128>}, {pipeline_mode = #tpu.pipeline_mode<synchronous>, transform_indices = @transform_4, window_bounds = array<i64: 1152, 128>}, {pipeline_mode = #tpu.pipeline_mode<synchronous>, transform_indices = @transform_5, window_bounds = array<i64: 1, 128>}, {pipeline_mode = #tpu.pipeline_mode<synchronous>, transform_indices = @transform_6, window_bounds = array<i64: 1, 128>}, {transform_indices = @transform_7, window_bounds = array<i64: 1, 16, 16, 128>}]} {
    %c1_i32 = arith.constant 1 : i32
    %c0_i32 = arith.constant 0 : i32
    %0 = arith.cmpi eq, %c1_i32, %c0_i32 : i32
    %c1_i32_0 = arith.constant 1 : i32
    %1 = arith.select %0, %c1_i32_0, %c1_i32 : i32
    %2 = arith.remsi %arg0, %1 : i32
    %c0_i32_1 = arith.constant 0 : i32
    %3 = arith.cmpi ne, %2, %c0_i32_1 : i32
    %c0_i32_2 = arith.constant 0 : i32
    %4 = arith.cmpi slt, %2, %c0_i32_2 : i32
    %c0_i32_3 = arith.constant 0 : i32
    %5 = arith.cmpi slt, %1, %c0_i32_3 : i32
    %6 = arith.xori %4, %5 : i1
    %7 = arith.andi %6, %3 : i1
    %8 = arith.addi %2, %1 : i32
    %9 = arith.select %7, %8, %2 : i32
    %c0 = arith.constant 0 : index
    %c0_4 = arith.constant 0 : index
    %c0_5 = arith.constant 0 : index
    %c0_6 = arith.constant 0 : index
    %10 = vector.load %arg1[%c0, %c0_4, %c0_5, %c0_6] : memref<1x20x26x4xbf16, #tpu.memory_space<vmem>>, vector<1x20x26x4xbf16>
    %11 = vector.shape_cast %10 : vector<1x20x26x4xbf16> to vector<20x26x4xbf16>
    %c0_7 = arith.constant 0 : index
    %c0_8 = arith.constant 0 : index
    %12 = vector.load %arg2[%c0_7, %c0_8] : memref<36x128xbf16, #tpu.memory_space<vmem>>, vector<36x128xbf16>
    %c0_9 = arith.constant 0 : index
    %c0_10 = arith.constant 0 : index
    %13 = vector.load %arg3[%c0_9, %c0_10] : memref<1x128xf32, #tpu.memory_space<vmem>>, vector<1x128xf32>
    %c0_11 = arith.constant 0 : index
    %c0_12 = arith.constant 0 : index
    %14 = vector.load %arg4[%c0_11, %c0_12] : memref<1x128xf32, #tpu.memory_space<vmem>>, vector<1x128xf32>
    %15 = vector.extract_strided_slice %11 {offsets = [0, 0, 0], sizes = [18, 24, 4], strides = [1, 1, 1]} : vector<20x26x4xbf16> to vector<18x24x4xbf16>
    %16 = vector.shape_cast %15 : vector<18x24x4xbf16> to vector<432x4xbf16>
    %17 = vector.extract_strided_slice %11 {offsets = [0, 1, 0], sizes = [18, 24, 4], strides = [1, 1, 1]} : vector<20x26x4xbf16> to vector<18x24x4xbf16>
    %18 = vector.shape_cast %17 : vector<18x24x4xbf16> to vector<432x4xbf16>
    %19 = vector.extract_strided_slice %11 {offsets = [0, 2, 0], sizes = [18, 24, 4], strides = [1, 1, 1]} : vector<20x26x4xbf16> to vector<18x24x4xbf16>
    %20 = vector.shape_cast %19 : vector<18x24x4xbf16> to vector<432x4xbf16>
    %21 = vector.extract_strided_slice %11 {offsets = [1, 0, 0], sizes = [18, 24, 4], strides = [1, 1, 1]} : vector<20x26x4xbf16> to vector<18x24x4xbf16>
    %22 = vector.shape_cast %21 : vector<18x24x4xbf16> to vector<432x4xbf16>
    %23 = vector.extract_strided_slice %11 {offsets = [1, 1, 0], sizes = [18, 24, 4], strides = [1, 1, 1]} : vector<20x26x4xbf16> to vector<18x24x4xbf16>
    %24 = vector.shape_cast %23 : vector<18x24x4xbf16> to vector<432x4xbf16>
    %25 = vector.extract_strided_slice %11 {offsets = [1, 2, 0], sizes = [18, 24, 4], strides = [1, 1, 1]} : vector<20x26x4xbf16> to vector<18x24x4xbf16>
    %26 = vector.shape_cast %25 : vector<18x24x4xbf16> to vector<432x4xbf16>
    %27 = vector.extract_strided_slice %11 {offsets = [2, 0, 0], sizes = [18, 24, 4], strides = [1, 1, 1]} : vector<20x26x4xbf16> to vector<18x24x4xbf16>
    %28 = vector.shape_cast %27 : vector<18x24x4xbf16> to vector<432x4xbf16>
    %29 = vector.extract_strided_slice %11 {offsets = [2, 1, 0], sizes = [18, 24, 4], strides = [1, 1, 1]} : vector<20x26x4xbf16> to vector<18x24x4xbf16>
    %30 = vector.shape_cast %29 : vector<18x24x4xbf16> to vector<432x4xbf16>
    %31 = vector.extract_strided_slice %11 {offsets = [2, 2, 0], sizes = [18, 24, 4], strides = [1, 1, 1]} : vector<20x26x4xbf16> to vector<18x24x4xbf16>
    %32 = vector.shape_cast %31 : vector<18x24x4xbf16> to vector<432x4xbf16>
    %33 = tpu.concatenate %16, %18, %20, %22, %24, %26, %28, %30, %32 in 1 : vector<432x4xbf16>, vector<432x4xbf16>, vector<432x4xbf16>, vector<432x4xbf16>, vector<432x4xbf16>, vector<432x4xbf16>, vector<432x4xbf16>, vector<432x4xbf16>, vector<432x4xbf16> -> vector<432x36xbf16>
    %cst = arith.constant dense<0.000000e+00> : vector<432x128xf32>
    %34 = tpu.matmul %33, %12, %cst {dimension_numbers = #tpu.dot_dimension_numbers<[1], [0], [0], [1], [0, 0, 1, 1], [], []>} : vector<432x36xbf16>, vector<36x128xbf16>, vector<432x128xf32> -> vector<432x128xf32>
    %35 = vector.broadcast %13 : vector<1x128xf32> to vector<432x128xf32>
    %36 = arith.mulf %34, %35 : vector<432x128xf32>
    %37 = vector.broadcast %14 : vector<1x128xf32> to vector<432x128xf32>
    %38 = arith.addf %36, %37 : vector<432x128xf32>
    %cst_13 = arith.constant 0.000000e+00 : f32
    %39 = vector.broadcast %cst_13 : f32 to vector<432x128xf32>
    %40 = arith.maximumf %38, %39 : vector<432x128xf32>
    %41 = vector.shape_cast %40 : vector<432x128xf32> to vector<18x24x128xf32>
    %42 = arith.truncf %41 : vector<18x24x128xf32> to vector<18x24x128xbf16>
    %c0_14 = arith.constant 0 : index
    %c0_15 = arith.constant 0 : index
    %c0_16 = arith.constant 0 : index
    %43 = vector.load %arg9[%c0_14, %c0_15, %c0_16] : memref<18x24x128xbf16, #tpu.memory_space<vmem>>, vector<18x24x128xbf16>
    tpu.vector_store %arg9[%c0_14, %c0_15, %c0_16], %42 {strides = array<i32>} : memref<18x24x128xbf16, #tpu.memory_space<vmem>>, vector<18x24x128xbf16>,
    %cst_17 = arith.constant 0.000000e+00 : bf16
    %44 = vector.broadcast %cst_17 : bf16 to vector<1x24x128xbf16>
    %cst_18 = arith.constant 0.000000e+00 : bf16
    %45 = vector.broadcast %cst_18 : bf16 to vector<18x1x128xbf16>
    %c0_19 = arith.constant 0 : index
    %c0_20 = arith.constant 0 : index
    %c0_21 = arith.constant 0 : index
    %46 = vector.load %arg9[%c0_19, %c0_20, %c0_21] : memref<18x24x128xbf16, #tpu.memory_space<vmem>>, vector<18x1x128xbf16>
    tpu.vector_store %arg9[%c0_19, %c0_20, %c0_21], %45 {strides = array<i32>} : memref<18x24x128xbf16, #tpu.memory_space<vmem>>, vector<18x1x128xbf16>,
    %cst_22 = arith.constant 0.000000e+00 : bf16
    %47 = vector.broadcast %cst_22 : bf16 to vector<18x7x128xbf16>
    %c0_23 = arith.constant 0 : index
    %c17 = arith.constant 17 : index
    %c0_24 = arith.constant 0 : index
    %48 = vector.load %arg9[%c0_23, %c17, %c0_24] : memref<18x24x128xbf16, #tpu.memory_space<vmem>>, vector<18x7x128xbf16>
    tpu.vector_store %arg9[%c0_23, %c17, %c0_24], %47 {strides = array<i32>} : memref<18x24x128xbf16, #tpu.memory_space<vmem>>, vector<18x7x128xbf16>,
    %c0_i32_25 = arith.constant 0 : i32
    %49 = arith.cmpi eq, %9, %c0_i32_25 : i32
    %50 = arith.extui %49 : i1 to i32
    %c0_i32_26 = arith.constant 0 : i32
    %51 = arith.cmpi ne, %50, %c0_i32_26 : i32
    scf.if %51 {
      %c0_45 = arith.constant 0 : index
      %c0_46 = arith.constant 0 : index
      %c0_47 = arith.constant 0 : index
      %91 = vector.load %arg9[%c0_45, %c0_46, %c0_47] : memref<18x24x128xbf16, #tpu.memory_space<vmem>>, vector<1x24x128xbf16>
      tpu.vector_store %arg9[%c0_45, %c0_46, %c0_47], %44 {strides = array<i32>} : memref<18x24x128xbf16, #tpu.memory_space<vmem>>, vector<1x24x128xbf16>,
    } else {
    }
    %c16_i32 = arith.constant 16 : i32
    %52 = arith.muli %9, %c16_i32 : i32
    %c17_i32 = arith.constant 17 : i32
    %53 = arith.subi %c17_i32, %52 : i32
    %c0_i32_27 = arith.constant 0 : i32
    %54 = arith.maxsi %53, %c0_i32_27 : i32
    %c0_i32_28 = arith.constant 0 : i32
    %c18_i32 = arith.constant 18 : i32
    %55 = arith.subi %c18_i32, %54 : i32
    %56 = arith.addi %54, %55 : i32
    %c1_i32_29 = arith.constant 1 : i32
    scf.for %arg10 = %54 to %56 step %c1_i32_29  : i32 {
      %91 = arith.index_cast %arg10 : i32 to index
      %c0_45 = arith.constant 0 : index
      %c0_46 = arith.constant 0 : index
      %92 = vector.load %arg9[%91, %c0_45, %c0_46] : memref<18x24x128xbf16, #tpu.memory_space<vmem>>, vector<1x24x128xbf16>
      tpu.vector_store %arg9[%91, %c0_45, %c0_46], %44 {strides = array<i32>} : memref<18x24x128xbf16, #tpu.memory_space<vmem>>, vector<1x24x128xbf16>,
    }
    %c0_30 = arith.constant 0 : index
    %c0_31 = arith.constant 0 : index
    %c0_32 = arith.constant 0 : index
    %57 = vector.load %arg9[%c0_30, %c0_31, %c0_32] : memref<18x24x128xbf16, #tpu.memory_space<vmem>>, vector<18x24x128xbf16>
    %c0_33 = arith.constant 0 : index
    %c0_34 = arith.constant 0 : index
    %58 = vector.load %arg5[%c0_33, %c0_34] : memref<1152x128xbf16, #tpu.memory_space<vmem>>, vector<1152x128xbf16>
    %c0_35 = arith.constant 0 : index
    %c0_36 = arith.constant 0 : index
    %59 = vector.load %arg6[%c0_35, %c0_36] : memref<1x128xf32, #tpu.memory_space<vmem>>, vector<1x128xf32>
    %c0_37 = arith.constant 0 : index
    %c0_38 = arith.constant 0 : index
    %60 = vector.load %arg7[%c0_37, %c0_38] : memref<1x128xf32, #tpu.memory_space<vmem>>, vector<1x128xf32>
    %61 = vector.extract_strided_slice %57 {offsets = [0, 0, 0], sizes = [16, 16, 128], strides = [1, 1, 1]} : vector<18x24x128xbf16> to vector<16x16x128xbf16>
    %62 = vector.shape_cast %61 : vector<16x16x128xbf16> to vector<256x128xbf16>
    %63 = vector.extract_strided_slice %57 {offsets = [0, 1, 0], sizes = [16, 16, 128], strides = [1, 1, 1]} : vector<18x24x128xbf16> to vector<16x16x128xbf16>
    %64 = vector.shape_cast %63 : vector<16x16x128xbf16> to vector<256x128xbf16>
    %65 = vector.extract_strided_slice %57 {offsets = [0, 2, 0], sizes = [16, 16, 128], strides = [1, 1, 1]} : vector<18x24x128xbf16> to vector<16x16x128xbf16>
    %66 = vector.shape_cast %65 : vector<16x16x128xbf16> to vector<256x128xbf16>
    %67 = vector.extract_strided_slice %57 {offsets = [1, 0, 0], sizes = [16, 16, 128], strides = [1, 1, 1]} : vector<18x24x128xbf16> to vector<16x16x128xbf16>
    %68 = vector.shape_cast %67 : vector<16x16x128xbf16> to vector<256x128xbf16>
    %69 = vector.extract_strided_slice %57 {offsets = [1, 1, 0], sizes = [16, 16, 128], strides = [1, 1, 1]} : vector<18x24x128xbf16> to vector<16x16x128xbf16>
    %70 = vector.shape_cast %69 : vector<16x16x128xbf16> to vector<256x128xbf16>
    %71 = vector.extract_strided_slice %57 {offsets = [1, 2, 0], sizes = [16, 16, 128], strides = [1, 1, 1]} : vector<18x24x128xbf16> to vector<16x16x128xbf16>
    %72 = vector.shape_cast %71 : vector<16x16x128xbf16> to vector<256x128xbf16>
    %73 = vector.extract_strided_slice %57 {offsets = [2, 0, 0], sizes = [16, 16, 128], strides = [1, 1, 1]} : vector<18x24x128xbf16> to vector<16x16x128xbf16>
    %74 = vector.shape_cast %73 : vector<16x16x128xbf16> to vector<256x128xbf16>
    %75 = vector.extract_strided_slice %57 {offsets = [2, 1, 0], sizes = [16, 16, 128], strides = [1, 1, 1]} : vector<18x24x128xbf16> to vector<16x16x128xbf16>
    %76 = vector.shape_cast %75 : vector<16x16x128xbf16> to vector<256x128xbf16>
    %77 = vector.extract_strided_slice %57 {offsets = [2, 2, 0], sizes = [16, 16, 128], strides = [1, 1, 1]} : vector<18x24x128xbf16> to vector<16x16x128xbf16>
    %78 = vector.shape_cast %77 : vector<16x16x128xbf16> to vector<256x128xbf16>
    %79 = tpu.concatenate %62, %64, %66, %68, %70, %72, %74, %76, %78 in 1 : vector<256x128xbf16>, vector<256x128xbf16>, vector<256x128xbf16>, vector<256x128xbf16>, vector<256x128xbf16>, vector<256x128xbf16>, vector<256x128xbf16>, vector<256x128xbf16>, vector<256x128xbf16> -> vector<256x1152xbf16>
    %cst_39 = arith.constant dense<0.000000e+00> : vector<256x128xf32>
    %80 = tpu.matmul %79, %58, %cst_39 {dimension_numbers = #tpu.dot_dimension_numbers<[1], [0], [0], [1], [0, 0, 1, 1], [], []>} : vector<256x1152xbf16>, vector<1152x128xbf16>, vector<256x128xf32> -> vector<256x128xf32>
    %81 = vector.broadcast %59 : vector<1x128xf32> to vector<256x128xf32>
    %82 = arith.mulf %80, %81 : vector<256x128xf32>
    %83 = vector.broadcast %60 : vector<1x128xf32> to vector<256x128xf32>
    %84 = arith.addf %82, %83 : vector<256x128xf32>
    %cst_40 = arith.constant 0.000000e+00 : f32
    %85 = vector.broadcast %cst_40 : f32 to vector<256x128xf32>
    %86 = arith.maximumf %84, %85 : vector<256x128xf32>
    %87 = vector.shape_cast %86 : vector<256x128xf32> to vector<16x16x128xf32>
    %88 = vector.shape_cast %87 : vector<16x16x128xf32> to vector<1x16x16x128xf32>
    %89 = arith.truncf %88 : vector<1x16x16x128xf32> to vector<1x16x16x128xbf16>
    %c0_41 = arith.constant 0 : index
    %c0_42 = arith.constant 0 : index
    %c0_43 = arith.constant 0 : index
    %c0_44 = arith.constant 0 : index
    %90 = vector.load %arg8[%c0_41, %c0_42, %c0_43, %c0_44] : memref<1x16x16x128xbf16, #tpu.memory_space<vmem>>, vector<1x16x16x128xbf16>
    tpu.vector_store %arg8[%c0_41, %c0_42, %c0_43, %c0_44], %89 {strides = array<i32>} : memref<1x16x16x128xbf16, #tpu.memory_space<vmem>>, vector<1x16x16x128xbf16>,
    return
  }
  func.func @transform_0(%arg0: i32) -> (i32, i32, i32, i32) {
    %c0_i32 = arith.constant 0 : i32
    %c0_i32_0 = arith.constant 0 : i32
    %c0_i32_1 = arith.constant 0 : i32
    %c0_i32_2 = arith.constant 0 : i32
    return %arg0, %c0_i32, %c0_i32_0, %c0_i32_1 : i32, i32, i32, i32
  }
  func.func @transform_1(%arg0: i32) -> (i32, i32) {
    %c0_i32 = arith.constant 0 : i32
    %c0_i32_0 = arith.constant 0 : i32
    %c0_i32_1 = arith.constant 0 : i32
    return %c0_i32, %c0_i32_0 : i32, i32
  }
  func.func @transform_2(%arg0: i32) -> (i32, i32) {
    %c0_i32 = arith.constant 0 : i32
    %c0_i32_0 = arith.constant 0 : i32
    %c0_i32_1 = arith.constant 0 : i32
    return %c0_i32, %c0_i32_0 : i32, i32
  }
  func.func @transform_3(%arg0: i32) -> (i32, i32) {
    %c0_i32 = arith.constant 0 : i32
    %c0_i32_0 = arith.constant 0 : i32
    %c0_i32_1 = arith.constant 0 : i32
    return %c0_i32, %c0_i32_0 : i32, i32
  }
  func.func @transform_4(%arg0: i32) -> (i32, i32) {
    %c0_i32 = arith.constant 0 : i32
    %c0_i32_0 = arith.constant 0 : i32
    %c0_i32_1 = arith.constant 0 : i32
    return %c0_i32, %c0_i32_0 : i32, i32
  }
  func.func @transform_5(%arg0: i32) -> (i32, i32) {
    %c0_i32 = arith.constant 0 : i32
    %c0_i32_0 = arith.constant 0 : i32
    %c0_i32_1 = arith.constant 0 : i32
    return %c0_i32, %c0_i32_0 : i32, i32
  }
  func.func @transform_6(%arg0: i32) -> (i32, i32) {
    %c0_i32 = arith.constant 0 : i32
    %c0_i32_0 = arith.constant 0 : i32
    %c0_i32_1 = arith.constant 0 : i32
    return %c0_i32, %c0_i32_0 : i32, i32
  }
  func.func @transform_7(%arg0: i32) -> (i32, i32, i32, i32) {
    %c0_i32 = arith.constant 0 : i32
    %c0_i32_0 = arith.constant 0 : i32
    %c0_i32_1 = arith.constant 0 : i32
    %c0_i32_2 = arith.constant 0 : i32
    return %arg0, %c0_i32, %c0_i32_0, %c0_i32_1 : i32, i32, i32, i32
  }
}

</mosaic_0001>

<bundles_post_ra>
// kernel: unet_conv2_forward.1
= control target key start
LH: loop header
LB: loop body
LE: loop exit
PB: predicated region body
PF: predicated region fallthrough
CT: control target
= control target key end

     0   :  { %s7789_s24 = smov 0   ;;  %s11273_s0 = inlined_call_operand.vmem [shape: bf16[2,20,26,4], index: 0, kind: input, shape index: {}]   ;;  %s11274_s1 = inlined_call_operand.vmem [shape: bf16[36,128], index: 1, kind: input, shape index: {}]   ;;  %s11275_s2 = inlined_call_operand.vmem [shape: f32[1,128], index: 2, kind: input, shape index: {}]   ;;  %s11276_s3 = inlined_call_operand.vmem [shape: f32[1,128], index: 3, kind: input, shape index: {}]   ;;  %s11277_s4 = inlined_call_operand.vmem [shape: bf16[1152,128], index: 4, kind: input, shape index: {}]   ;;  %s11278_s5 = inlined_call_operand.vmem [shape: f32[1,128], index: 5, kind: input, shape index: {}]   ;;  %s11279_s6 = inlined_call_operand.vmem [shape: f32[1,128], index: 6, kind: input, shape index: {}]   ;;  %s11280_s7 = inlined_call_operand.vmem [shape: bf16[2,16,16,128], index: 7, kind: output, shape index: {}]  }
   0x1 LB: > { %s6077_s25 = sadd.s32 4294967295, %s7736_s24   ;;  %p6081_p0 = scmp.ge.s32.totalorder %s7736_s24, 1  ;;  %s7736_s24 = sphi %s7789_s24, %s17_s24  }
   0x2   : > { %p237_p1 = scmp.lt.s32.totalorder %s7736_s24, 3 }
   0x4   : > { %p238_p2 = pnand %p6081_p0, %p237_p1 }
   0x6   : > { %241 = sbr.rel (%p238_p2) target bundleno = 1264 (0x4f0), region = 48 }
   0xd   : > { %p269_p3 = scmp.lt.s32.totalorder %s6077_s25, 1  ;;  %vm1054_vm0 = vcmask 1042432   ;;  %vm1055_vm1 = vcmask 1046532   ;;  %vm367_vm3 = vsmask.f32 3328  ;;  %s7738_s30 = smov 12  }
   0xe   : > { %vm7800_vm2 = vmor %vm1054_vm0, %vm1055_vm1  ;;  %vm368_vm4 = vsmask.f32 7440  ;;  %s7739_s8 = smov 24   ;;  %s7740_s9 = smov 8   ;;  %vm2653_vm6 = vcmask 1041408   ;;  %vm7747_vm7 = vmmov 0  }
   0xf   : > { %s11433_s25 = smov (!%p269_p3, %s6077_s25), 1  ;;  %s7741_s10 = smov 32   ;;  %vm7891_vm5 = vmor %vm367_vm3, %vm368_vm4  ;;  %vm2116_vm8 = vcmask 31744   ;;  %vm2198_vm9 = vcmask 64512   ;;  %vm2253_vm10 = vcmask 97280   ;;  %vm2308_vm11 = vcmask 130048  }
  0x10   : > { %s7549_s26 = smul.u32 320, %s11433_s25  ;;  %s7742_s11 = smov 20   ;;  %vm2363_vm12 = vcmask 162816   ;;  %vm2418_vm13 = vcmask 195584   ;;  %vm2473_vm14 = vcmask 228352   ;;  %vm2528_vm15 = vcmask 261120  }
  0x11   : > { %s7743_s12 = smov 4   ;;  %s7744_s13 = smov 16   ;;  %vm2598_vm0 = vcmask 293888   ;;  %vm3368_vm1 = vcmask 1040384   ;;  %vm3369_vm3 = vsmask.f32 256 }
  0x12   : > { %s7807_s29 = scalar_lea.vmem %s11273_s0, %s7549_s26  ;;  %s7745_s14 = smov 28   ;;  %vm9432_vm4 = vmand %vm3368_vm1, %vm3369_vm3  ;;  %vm3426_vm1 = vsmask.f32 7938 }
  0x13   : > { %v7810_v1 = vld [vmem:[%s7807_s29 + $0x10] sm:$0xf]  ;;  %v7813_v2 = vld [vmem:[%s7807_s29 + $0x14] sm:$0xf]  ;;  %v7816_v3 = vld [vmem:[%s7807_s29 + $0x20] sm:$0xf] }
  0x14   : > { %v6186_v4 = vcombine.low %v7810_v1, %v7813_v2  ;;  %v7821_v5 = vld [vmem:[%s7807_s29 + $0x24] sm:$0xf]  ;;  %v280_v6 = vld [vmem:[%s7807_s29] sm:$0xf]  ;;  %v7830_v9 = vld [vmem:[%s7807_s29 + $0x8] sm:$0xf] }
  0x15   : > { %v281_v7 = vld [vmem:[%s7807_s29 + $0x4] sm:$0xf]  ;;  %v7827_v8 = vcombine.low %v7816_v3, %v7821_v5  ;;  %v6085_v10 = vrot.slane %v280_v6, 9  ;;  %v7833_v12 = vld [vmem:[%s7807_s29 + $0x28] sm:$0xf]  ;;  %v1062_v13 = vrot.slane %v7830_v9, 5 }
  0x16   : > { %v1059_v11 = vrot.slane %v281_v7, 5  ;;  %1714 = vrot.lane.b32.xlu1 %v6186_v4, %s7738_s30  ;;  %v6087_v14 = vrot.slane %v7816_v3, 9  ;;  %v1079_v15 = vrot.slane %v7821_v5, 5  ;;  %v1082_v16 = vrot.slane %v7833_v12, 5  ;;  %v7841_v17 = vld [vmem:[%s7807_s29 + $0x18] sm:$0xf] }
  0x17   : > { %v6086_v20 = vrot.slane %v7810_v1, 9  ;;  %v1069_v21 = vrot.slane %v7813_v2, 5  ;;  %v7848_v22 = vld [vmem:[%s7807_s29 + $0xc] sm:$0x1]  ;;  %v1064_v23 = vrot.slane %v1062_v13, 4  ;;  %v1072_v26 = vrot.slane %v7841_v17, 5 }
  0x18   : > { %v1060_v18 = vsel %vm7800_vm2, %v6085_v10, %v1059_v11  ;;  %v1061_v19 = vrot.slane %v1059_v11, 4  ;;  %v7852_v24 = vsel %vm7800_vm2, %v6087_v14, %v1079_v15  ;;  %v1081_v25 = vrot.slane %v1079_v15, 4  ;;  %s6542_s16 = sshll.u32 %s11433_s25, 7 }
  0x19   : > { %v1070_v28 = vsel %vm7800_vm2, %v6086_v20, %v1069_v21  ;;  %v1071_v29 = vrot.slane %v1069_v21, 4  ;;  %v1065_v30 = vrot.slane %v7848_v22, 5  ;;  %v371_v33 = vshrl.u32 %v280_v6, 16 }
  0x1a   : > { %v1063_v27 = vsel %vm7800_vm2, %v1061_v19, %v1062_v13  ;;  %1942 = vrot.lane.b32.xlu1 %v7827_v8, %s7739_s8  ;;  %v7866_v32 = vsel %vm7800_vm2, %v1081_v25, %v1082_v16  ;;  %v374_v34 = vshll.u32 %v280_v6, 16  ;;  %v380_v38 = vshll.u32 %v281_v7, 16 }
  0x1b   : > { %v6159_v31 = vcombine.low %v1060_v18, %v1063_v27  ;;  %v7870_v35 = vcombine.low %v7852_v24, %v7866_v32  ;;  %v7876_v36 = vsel %vm7800_vm2, %v1071_v29, %v1072_v26  ;;  %v1066_v37 = vsel %vm7800_vm2, %v1064_v23, %v1065_v30  ;;  %v287_v27 = vld [vmem:[%s7807_s29 + $0x1c] sm:$0x1] }
  0x1c   : > { %v6240_v39 = vcombine.low %v1070_v28, %v7876_v36  ;;  %v6160_v40 = vcombine.low %v1066_v37, %v1070_v28  ;;  %v373_v41 = vrot.slane %v371_v33, 4  ;;  %v376_v42 = vrot.slane %v374_v34, 5 }
  0x1d   : > { %1630 = vrot.lane.b32.xlu0 %v6159_v31, %s7740_s9  ;;  %v382_v43 = vrot.slane %v380_v38, 5  ;;  %v384_v44 = vshrl.u32 %v281_v7, 16  ;;  %v390_v45 = vshll.u32 %v7830_v9, 16  ;;  %v405_v46 = vshrl.u32 %v7810_v1, 16 }
  0x1e   : > { %2062 = vrot.lane.b32.xlu1 %v7870_v35, %s7741_s10  ;;  %v377_v47 = vor.u32 %v376_v42, %v373_v41  ;;  %v408_v48 = vshll.u32 %v7810_v1, 16  ;;  %v414_v49 = vshll.u32 %v7813_v2, 16  ;;  %v418_v50 = vshrl.u32 %v7813_v2, 16  ;;  %v7920_v41 = vld [vmem:[%s7807_s29 + $0x30] sm:$0xf] }
  0x1f   : > { %v386_v52 = vrot.slane %v384_v44, 4  ;;  %v392_v53 = vrot.slane %v390_v45, 5  ;;  %v407_v54 = vrot.slane %v405_v46, 4  ;;  %v424_v55 = vshll.u32 %v7841_v17, 16  ;;  %v291_v45 = vld [vmem:[%s7807_s29 + $0x2c] sm:$0x1] }
  0x20   : > { %v378_v56 = vrot.slane %v377_v47, 4  ;;  %v410_v57 = vrot.slane %v408_v48, 5  ;;  %v416_v58 = vrot.slane %v414_v49, 5  ;;  %v420_v59 = vrot.slane %v418_v50, 4 }
  0x21   : > { %1882 = vrot.lane.b32.xlu0 %v6240_v39, %s7742_s11  ;;  %v387_v60 = vor.u32 %v386_v52, %v382_v43  ;;  %v426_v61 = vrot.slane %v424_v55, 5  ;;  %v439_v62 = vshrl.u32 %v7816_v3, 16  ;;  %v442_v63 = vshll.u32 %v7816_v3, 16 }
  0x22   : > { %1632 = vrot.lane.b32.xlu1 %v6160_v40, %s7740_s9  ;;  %v383_v1 = vsel %vm7891_vm5, %v378_v56, %v382_v43  ;;  %v411_v2 = vor.u32 %v410_v57, %v407_v54  ;;  %v421_v4 = vor.u32 %v420_v59, %v416_v58  ;;  %v448_v6 = vshll.u32 %v7821_v5, 16 }
  0x23   : > { %v388_v7 = vrot.slane %v387_v60, 4  ;;  %v441_v10 = vrot.slane %v439_v62, 4  ;;  %v444_v11 = vrot.slane %v442_v63, 5  ;;  %v452_v13 = vshrl.u32 %v7821_v5, 16 }
  0x24   : > { %v412_v14 = vrot.slane %v411_v2, 4  ;;  %v422_v15 = vrot.slane %v421_v4, 4  ;;  %v450_v18 = vrot.slane %v448_v6, 5  ;;  %v458_v19 = vshll.u32 %v7833_v12, 16 }
  0x25   : > { %v393_v20 = vsel %vm7891_vm5, %v388_v7, %v392_v53  ;;  %v445_v21 = vor.u32 %v444_v11, %v441_v10  ;;  %v454_v23 = vrot.slane %v452_v13, 4  ;;  %v394_v25 = vshrl.u32 %v7830_v9, 16 }
  0x26   : > { %v6132_v28 = vcombine.low %v383_v1, %v393_v20  ;;  %v417_v29 = vsel %vm7891_vm5, %v412_v14, %v416_v58  ;;  %v7913_v30 = vsel %vm7891_vm5, %v422_v15, %v426_v61  ;;  %v460_v31 = vrot.slane %v458_v19, 5 }
  0x27   : > { %v6213_v33 = vcombine.low %v417_v29, %v7913_v30  ;;  %v446_v34 = vrot.slane %v445_v21, 4  ;;  %v455_v37 = vor.u32 %v454_v23, %v450_v18  ;;  %v396_v38 = vrot.slane %v394_v25, 4 }
  0x28   : > { %1495 = vrot.lane.b32.xlu0 %v6132_v28, %s7743_s12  ;;  %v400_v9 = vshll.u32 %v7848_v22, 16  ;;  %v428_v39 = vshrl.u32 %v7841_v17, 16  ;;  %v434_v40 = vshll.u32 %v287_v27, 16  ;;  %v1074_v48 = vrot.slane %v1072_v26, 4  ;;  %v7929_v22 = vld [vmem:[%s7807_s29 + $0x34] sm:$0xf] }
  0x29   : > { %1798 = vrot.lane.b32.xlu1 %v6213_v33, %s7744_s13  ;;  %v451_v42 = vsel %vm7891_vm5, %v446_v34, %v450_v18  ;;  %v456_v43 = vrot.slane %v455_v37, 4  ;;  %v397_v44 = vor.u32 %v396_v38, %v392_v53  ;;  %v462_v52 = vshrl.u32 %v7833_v12, 16 }
  0x2a   : > { %v402_v46 = vrot.slane %v400_v9, 5  ;;  %v430_v47 = vrot.slane %v428_v39, 4  ;;  %v436_v53 = vrot.slane %v434_v40, 5  ;;  %v1075_v56 = vrot.slane %v287_v27, 5  ;;  %v295_v9 = vld [vmem:[%s7807_s29 + $0x3c] sm:$0x1] }
  0x2b   : > { %v7933_v49 = vsel %vm7891_vm5, %v456_v43, %v460_v31  ;;  %v398_v50 = vrot.slane %v397_v44, 4  ;;  %v464_v58 = vrot.slane %v462_v52, 4  ;;  %v473_v26 = vshrl.u32 %v7920_v41, 16 }
  0x2c   : > { %v7937_v54 = vcombine.low %v451_v42, %v7933_v49  ;;  %v431_v55 = vor.u32 %v430_v47, %v426_v61  ;;  %v468_v62 = vshll.u32 %v291_v45, 16  ;;  %v476_v63 = vshll.u32 %v7920_v41, 16 }
  0x2d   : > { %v403_v57 = vsel %vm7891_vm5, %v398_v50, %v402_v46  ;;  %v465_v1 = vor.u32 %v464_v58, %v460_v31  ;;  %v475_v61 = vrot.slane %v473_v26, 4  ;;  %v482_v2 = vshll.u32 %v7929_v22, 16  ;;  %v8008_v58 = vld [vmem:[%s7807_s29 + $0x44] sm:$0xf] }
  0x2e   : > { %2002 = vrot.lane.b32.xlu0 %v7937_v54, %s7745_s14  ;;  %v6133_v59 = vcombine.low %v403_v57, %v417_v29  ;;  %v432_v60 = vrot.slane %v431_v55, 4  ;;  %v1084_v4 = vrot.slane %v1082_v16, 4  ;;  %v478_v7 = vrot.slane %v476_v63, 5  ;;  %v7956_v16 = vld [vmem:[%s7807_s29 + $0x38] sm:$0xf] }
  0x2f   : > { %v1085_v10 = vrot.slane %v291_v45, 5  ;;  %v6088_v11 = vrot.slane %v7920_v41, 9  ;;  %v6187_v13 = vcombine.low %v7841_v17, %v7816_v3  ;;  %v1089_v15 = vrot.slane %v7929_v22, 5 }
  0x30   : > { %v437_v6 = vsel %vm7891_vm5, %v432_v60, %v436_v53  ;;  %v466_v18 = vrot.slane %v465_v1, 4  ;;  %v470_v19 = vrot.slane %v468_v62, 5  ;;  %v479_v20 = vor.u32 %v478_v7, %v475_v61  ;;  %v8002_v53 = vld [vmem:[%s7807_s29 + $0x40] sm:$0xf] }
  0x31   : > { %v6214_v14 = vcombine.low %v437_v6, %v451_v42  ;;  %v484_v21 = vrot.slane %v482_v2, 5  ;;  %v1076_v23 = vsel %vm7800_vm2, %v1074_v48, %v1075_v56  ;;  %v7963_v3 = vcombine.low %v7833_v12, %v7920_v41 }
  0x32   : > { %1497 = vrot.lane.b32.xlu0 %v6133_v59, %s7743_s12  ;;  %v1086_v17 = vsel %vm7800_vm2, %v1084_v4, %v1085_v10  ;;  %v7969_v25 = vsel %vm7800_vm2, %v6088_v11, %v1089_v15  ;;  %v480_v27 = vrot.slane %v479_v20, 4  ;;  %v6241_v28 = vcombine.low %v1076_v23, %v7852_v24 }
  0x33   : > { %1800 = vrot.lane.b32.xlu1 %v6214_v14, %s7744_s13  ;;  %v471_v29 = vsel %vm7891_vm5, %v466_v18, %v470_v19  ;;  %v7976_v31 = vcombine.low %v1086_v17, %v7969_v25  ;;  %v486_v34 = vshrl.u32 %v7929_v22, 16  ;;  %v492_v37 = vshll.u32 %v7956_v16, 16 }
  0x34   : > { %v7982_v33 = vsel %vm7891_vm5, %v480_v27, %v484_v21  ;;  %v496_v38 = vshrl.u32 %v7956_v16, 16  ;;  %v6161_v39 = vcombine.low %v7876_v36, %v1076_v23  ;;  %v1092_v44 = vrot.slane %v7956_v16, 5 }
  0x35   : > { %v7989_v24 = vcombine.low %v471_v29, %v7982_v33  ;;  %v488_v40 = vrot.slane %v486_v34, 4  ;;  %v494_v42 = vrot.slane %v492_v37, 5  ;;  %v6134_v45 = vcombine.low %v7913_v30, %v437_v6  ;;  %v8043_v6 = vld [vmem:[%s7807_s29 + $0x48] sm:$0xf] }
  0x36   : > { %1716 = vrot.lane.b32.xlu0 %v6187_v13, %s7738_s30  ;;  %v498_v43 = vrot.slane %v496_v38, 4  ;;  %v502_v46 = vshll.u32 %v295_v9, 16  ;;  %v6215_v47 = vcombine.low %v7933_v49, %v471_v29  ;;  %v1091_v52 = vrot.slane %v1089_v15, 4  ;;  %v8061_v29 = vld [vmem:[%s7807_s29 + $0x50] sm:$0xf] }
  0x37   : > { %1944 = vrot.lane.b32.xlu1 %v7963_v3, %s7739_s8  ;;  %v489_v48 = vor.u32 %v488_v40, %v484_v21  ;;  %v1094_v36 = vrot.slane %v1092_v44, 4  ;;  %v1095_v55 = vrot.slane %v295_v9, 5  ;;  %v6188_v56 = vcombine.low %v7821_v5, %v7833_v12  ;;  %v7587_v40 = vld [vmem:[%s11274_s1 + $0x8] sm:$0xff]  }
  0x38   : > { %v499_v50 = vor.u32 %v498_v43, %v494_v42  ;;  %v504_v57 = vrot.slane %v502_v46, 5  ;;  %v8013_v30 = vcombine.low %v7929_v22, %v7956_v16  ;;  %v1093_v59 = vsel %vm7800_vm2, %v1091_v52, %v1092_v44 }
  0x39   : > { %v490_v49 = vrot.slane %v489_v48, 4  ;;  %v8019_v60 = vsel %vm7800_vm2, %v1094_v36, %v1095_v55  ;;  %v6242_v5 = vcombine.low %v7866_v32, %v1086_v17  ;;  %v507_v12 = vshrl.u32 %v8002_v53, 16  ;;  %v7588_v48 = vld [vmem:[%s11274_s1 + $0x10] ss:$0 sps:$4 sm:$0x33]  }
  0x3a   : > { %1884 = vrot.lane.b32.xlu0 %v6241_v28, %s7742_s11  ;;  %v500_v26 = vrot.slane %v499_v50, 4  ;;  %v510_v62 = vshll.u32 %v8002_v53, 16  ;;  %v516_v63 = vshll.u32 %v8008_v58, 16  ;;  %v8035_v2 = vcombine.low %v1093_v59, %v8019_v60  ;;  %v8112_v50 = vld [vmem:[%s7807_s29 + $0x54] sm:$0xf] }
  0x3b   : > { %2064 = vrot.lane.b32.xlu1 %v7976_v31, %s7741_s10  ;;  %v495_v1 = vsel %vm7891_vm5, %v490_v49, %v494_v42  ;;  %v520_v32 = vshrl.u32 %v8008_v58, 16  ;;  %v509_v7 = vrot.slane %v507_v12, 4  ;;  %v1099_v14 = vrot.slane %v8008_v58, 5 }
  0x3c   : > { %v8032_v61 = vsel %vm7891_vm5, %v500_v26, %v504_v57  ;;  %v512_v10 = vrot.slane %v510_v62, 5  ;;  %v518_v11 = vrot.slane %v516_v63, 5  ;;  %v526_v15 = vshll.u32 %v8043_v6, 16 }
  0x3d   : > { %v8040_v4 = vcombine.low %v495_v1, %v8032_v61  ;;  %v522_v13 = vrot.slane %v520_v32, 4  ;;  %v6216_v18 = vcombine.low %v7982_v33, %v495_v1  ;;  %v6089_v21 = vrot.slane %v8002_v53, 9 }
  0x3e   : > { %2004 = vrot.lane.b32.xlu0 %v7989_v24, %s7745_s14  ;;  %v513_v19 = vor.u32 %v512_v10, %v509_v7  ;;  %v1101_v23 = vrot.slane %v1099_v14, 4  ;;  %v1102_v17 = vrot.slane %v8043_v6, 5  ;;  %v6189_v27 = vcombine.low %v7920_v41, %v7929_v22 }
  0x3f   : > { %1634 = vrot.lane.b32.xlu1 %v6161_v39, %s7740_s9  ;;  %v523_v20 = vor.u32 %v522_v13, %v518_v11  ;;  %v528_v28 = vrot.slane %v526_v15, 5  ;;  %v8069_v33 = vcombine.low %v8002_v53, %v8008_v58  ;;  %v11284_v22 = vmov 0.0   ;;  %v8141_v13 = vld [vmem:[%s7807_s29 + $0x58] sm:$0xf] }
  0x40   : > { %v514_v34 = vrot.slane %v513_v19, 4  ;;  %v8077_v41 = vsel %vm7800_vm2, %v1101_v23, %v1102_v17  ;;  %7387 = vmatprep.subr.bf16.mxu0 %v11284_v22  ;;  %v6243_v38 = vcombine.low %v7969_v25, %v1093_v59  ;;  %v530_v9 = vshrl.u32 %v8043_v6, 16  ;;  %7393 = vmatprep.mubr.msk.bf16.mxu0 %vm7747_vm7, %v11284_v22 }
  0x41   : > { %v524_v37 = vrot.slane %v523_v20, 4  ;;  %v541_v39 = vshrl.u32 %v8061_v29, 16  ;;  %v544_v44 = vshll.u32 %v8061_v29, 16  ;;  %v550_v49 = vshll.u32 %v8112_v50, 16 }
  0x42   : > { %1499 = vrot.lane.b32.xlu0 %v6134_v45, %s7743_s12  ;;  %v519_v42 = vsel %vm7891_vm5, %v514_v34, %v518_v11  ;;  %v299_v45 = vld [vmem:[%s7807_s29 + $0x4c] sm:$0x1]  ;;  %v1104_v26 = vrot.slane %v1102_v17, 4  ;;  %v2655_v12 = vsel %vm2653_vm6, %v7588_v48, 0  ;;  %v6090_v62 = vrot.slane %v8061_v29, 9 }
  0x43   : > { %1802 = vrot.lane.b32.xlu1 %v6215_v47, %s7744_s13  ;;  %v8093_v43 = vsel %vm7891_vm5, %v524_v37, %v528_v28  ;;  %v532_v47 = vrot.slane %v530_v9, 4  ;;  %v543_v52 = vrot.slane %v541_v39, 4  ;;  %v546_v36 = vrot.slane %v544_v44, 5 }
  0x44   : > { %v8104_v46 = vcombine.low %v519_v42, %v8093_v43  ;;  %v6217_v55 = vcombine.low %v8032_v61, %v519_v42  ;;  %v1109_v63 = vrot.slane %v8112_v50, 5  ;;  %v6190_v1 = vcombine.low %v7956_v16, %v8002_v53 }
  0x45   : > { %v533_v57 = vor.u32 %v532_v47, %v528_v28  ;;  %v547_v59 = vor.u32 %v546_v36, %v543_v52  ;;  %v8132_v32 = vcombine.low %v8043_v6, %v8061_v29  ;;  %v552_v10 = vrot.slane %v550_v49, 5 }
  0x46   : > { %1718 = vrot.lane.b32.xlu0 %v6188_v56, %s7738_s30  ;;  %v536_v56 = vshll.u32 %v299_v45, 16  ;;  %v560_v19 = vshll.u32 %v8141_v13, 16  ;;  %v564_v20 = vshrl.u32 %v8141_v13, 16  ;;  %v1112_v28 = vrot.slane %v8141_v13, 5 }
  0x47   : > { %1946 = vrot.lane.b32.xlu1 %v8013_v30, %s7739_s8  ;;  %v548_v7 = vrot.slane %v547_v59, 4  ;;  %vm3425_vm6 = vcmask 1043456  }
  0x48   : > { %v538_v61 = vrot.slane %v536_v56, 5  ;;  %v562_v17 = vrot.slane %v560_v19, 5  ;;  %v1114_v9 = vrot.slane %v1112_v28, 4  ;;  %vm9541_vm3 = vmand %vm3425_vm6, %vm3426_vm1 }
  0x49   : > { %v8153_v15 = vsel %vm7891_vm5, %v548_v7, %v552_v10 }
  0x4a   : > { %1886 = vrot.lane.b32.xlu0 %v6242_v5, %s7742_s11  ;;  %v1105_v5 = vrot.slane %v299_v45, 5  ;;  %v8183_v45 = vld [vmem:[%s7807_s29 + $0x60] sm:$0xf] }
  0x4b   : > { %2066 = vrot.lane.b32.xlu1 %v8035_v2, %s7741_s10  ;;  %v575_v52 = vshrl.u32 %v8183_v45, 16  ;;  %v578_v36 = vshll.u32 %v8183_v45, 16 }
  0x4c   : > { %v1106_v11 = vsel %vm7800_vm2, %v1104_v26, %v1105_v5  ;;  %v8216_v26 = vld [vmem:[%s7807_s29 + $0x68] sm:$0xf] }
  0x4d   : > { %v577_v59 = vrot.slane %v575_v52, 4  ;;  %v580_v5 = vrot.slane %v578_v36, 5 }
  0x4e   : > { %2006 = vrot.lane.b32.xlu0 %v8040_v4, %s7745_s14 }
  0x4f   : > { %1636 = vrot.lane.b32.xlu1 %v7870_v35, %s7740_s9  ;;  %v7584_v35 = vld [vmem:[%s11274_s1] sm:$0xff]  }
  0x50   : > { %7388 = vmatpush3.bf16.msra.mxu0 %v7584_v35 }
  0x51   : > { %7389 = vmatprep.subr.bf16.mxu0 %v11284_v22 }
  0x52   : > { %1501 = vrot.lane.b32.xlu0 %v7937_v54, %s7743_s12  ;;  %v8073_v54 = vsel %vm7800_vm2, %v6089_v21, %v1099_v14  ;;  %v554_v14 = vshrl.u32 %v8112_v50, 16  ;;  %v303_v21 = vld [vmem:[%s7807_s29 + $0x5c] sm:$0x1] }
  0x53   : > { %1804 = vrot.lane.b32.xlu1 %v6216_v18, %s7744_s13  ;;  %v8097_v25 = vcombine.low %v8073_v54, %v8077_v41  ;;  %v6244_v16 = vcombine.low %v8019_v60, %v8073_v54  ;;  %v570_v54 = vshll.u32 %v303_v21, 16  ;;  %v1115_v39 = vrot.slane %v303_v21, 5 }
  0x54   : > { %7390 = vmatpush3.bf16.msra.mxu0 %v7587_v40  ;;  %v556_v23 = vrot.slane %v554_v14, 4  ;;  %v6191_v40 = vcombine.low %v8008_v58, %v8043_v6  ;;  %v8192_v58 = vld [vmem:[%s7807_s29 + $0x64] sm:$0xf]  ;;  %v6245_v6 = vcombine.low %v8077_v41, %v1106_v11 }
  0x55   : > { %7391 = vmatprep.subr.bf16.mxu0 %v11284_v22  ;;  %v572_v44 = vrot.slane %v570_v54, 5  ;;  %v588_v41 = vshrl.u32 %v8192_v58, 16  ;;  %v8236_v19 = vcombine.low %v8183_v45, %v8192_v58  ;;  %v307_v54 = vld [vmem:[%s7807_s29 + $0x6c] sm:$0x1] }
  0x56   : > { %1720 = vrot.lane.b32.xlu0 %v6189_v27, %s7738_s30  ;;  %v566_v27 = vrot.slane %v564_v20, 4  ;;  %v557_v35 = vor.u32 %v556_v23, %v552_v10  ;;  %v598_v23 = vshrl.u32 %v8216_v26, 16  ;;  %v1125_v36 = vrot.slane %v307_v54, 5 }
  0x57   : > { %1948 = vrot.lane.b32.xlu1 %v8069_v33, %s7739_s8 }
  0x58   : > { %7392 = vmatpush3.bf16.msra.mxu0 %v2655_v12  ;;  %v567_v37 = vor.u32 %v566_v27, %v562_v17  ;;  %v558_v42 = vrot.slane %v557_v35, 4 }
  0x5a   : > { %1888 = vrot.lane.b32.xlu0 %v6243_v38, %s7742_s11  ;;  %v1111_v38 = vrot.slane %v1109_v63, 4  ;;  %v563_v48 = vsel %vm7891_vm5, %v558_v42, %v562_v17 }
  0x5b   : > { %2068 = vrot.lane.b32.xlu1 %v8097_v25, %s7741_s10  ;;  %v6219_v7 = vcombine.low %v8153_v15, %v563_v48 }
  0x5c   : > { %v1113_v47 = vsel %vm7800_vm2, %v1111_v38, %v1112_v28  ;;  %v8273_v38 = vld [vmem:[%s7807_s29 + $0x74] sm:$0xf] }
  0x5e   : > { %2008 = vrot.lane.b32.xlu0 %v8104_v46, %s7745_s14 }
  0x5f   : > { %1638 = vrot.lane.b32.xlu1 %v7976_v31, %s7740_s9  ;;  %v534_v31 = vrot.slane %v533_v57, 4  ;;  %v584_v57 = vshll.u32 %v8192_v58, 16 }
  0x61   : > { %v539_v53 = vsel %vm7891_vm5, %v534_v31, %v538_v61  ;;  %v586_v12 = vrot.slane %v584_v57, 5  ;;  %v594_v31 = vshll.u32 %v8216_v26, 16  ;;  %v6091_v61 = vrot.slane %v8183_v45, 9 }
  0x62   : > { %1503 = vrot.lane.b32.xlu0 %v7989_v24, %s7743_s12  ;;  %v8138_v24 = vsel %vm7800_vm2, %v6090_v62, %v1109_v63  ;;  %v8162_v60 = vcombine.low %v539_v53, %v8153_v15  ;;  %v6218_v34 = vcombine.low %v8093_v43, %v539_v53  ;;  %v568_v43 = vrot.slane %v567_v37, 4 }
  0x63   : > { %1806 = vrot.lane.b32.xlu1 %v6217_v55, %s7744_s13  ;;  %v8156_v18 = vcombine.low %v1106_v11, %v8138_v24  ;;  %v590_v62 = vrot.slane %v588_v41, 4  ;;  %v1119_v63 = vrot.slane %v8192_v58, 5  ;;  %v6192_v53 = vcombine.low %v8061_v29, %v8112_v50 }
  0x64   : > { %v8204_v55 = vsel %vm7891_vm5, %v568_v43, %v572_v44  ;;  %v596_v20 = vrot.slane %v594_v31, 5  ;;  %v6246_v29 = vcombine.low %v8138_v24, %v1113_v47  ;;  %v600_v37 = vrot.slane %v598_v23, 4 }
  0x65   : > { %v8213_v49 = vcombine.low %v563_v48, %v8204_v55  ;;  %v591_v10 = vor.u32 %v590_v62, %v586_v12  ;;  %v1121_v11 = vrot.slane %v1119_v63, 4  ;;  %v1120_v15 = vsel %vm7800_vm2, %v6091_v61, %v1119_v63 }
  0x66   : > { %1722 = vrot.lane.b32.xlu0 %v6190_v1, %s7738_s30  ;;  %v581_v1 = vor.u32 %v580_v5, %v577_v59  ;;  %v601_v44 = vor.u32 %v600_v37, %v596_v20  ;;  %v1129_v41 = vrot.slane %v8273_v38, 5  ;;  %v6193_v59 = vcombine.low %v8141_v13, %v8183_v45  ;;  %v8307_v45 = vld [vmem:[%s7807_s29 + $0x78] sm:$0xf] }
  0x67   : > { %1950 = vrot.lane.b32.xlu1 %v8132_v32, %s7739_s8 }
  0x68   : > { %v582_v14 = vrot.slane %v581_v1, 4  ;;  %v602_v5 = vrot.slane %v601_v44, 4 }
  0x6a   : > { %1890 = vrot.lane.b32.xlu0 %v6244_v16, %s7742_s11  ;;  %v1122_v16 = vrot.slane %v8216_v26, 5 }
  0x6b   : > { %2070 = vrot.lane.b32.xlu1 %v8156_v18, %s7741_s10 }
  0x6c   : > { %v8242_v21 = vsel %vm7800_vm2, %v1121_v11, %v1122_v16  ;;  %v1124_v48 = vrot.slane %v1122_v16, 4 }
  0x6d   : > { %v8259_v27 = vcombine.low %v1120_v15, %v8242_v21 }
  0x6e   : > { %2010 = vrot.lane.b32.xlu0 %v8162_v60, %s7745_s14  ;;  %v8300_v1 = vsel %vm7800_vm2, %v1124_v48, %v1125_v36 }
  0x6f   : > { %1640 = vrot.lane.b32.xlu1 %v8035_v2, %s7740_s9  ;;  %v8180_v2 = vcombine.low %v8112_v50, %v8141_v13  ;;  %v587_v50 = vsel %vm7891_vm5, %v582_v14, %v586_v12 }
  0x70   : > { %v6220_v42 = vcombine.low %v8204_v55, %v587_v50 }
  0x72   : > { %1505 = vrot.lane.b32.xlu0 %v8040_v4, %s7743_s12  ;;  %v8189_v4 = vsel %vm7800_vm2, %v1114_v9, %v1115_v39 }
  0x73   : > { %1808 = vrot.lane.b32.xlu1 %v6218_v34, %s7744_s13  ;;  %v8207_v56 = vcombine.low %v1113_v47, %v8189_v4  ;;  %v604_v47 = vshll.u32 %v307_v54, 16  ;;  %v6247_v61 = vcombine.low %v8189_v4, %v1120_v15  ;;  %v622_v4 = vshrl.u32 %v8273_v38, 16 }
  0x75   : > { %v606_v12 = vrot.slane %v604_v47, 5 }
  0x76   : > { %1724 = vrot.lane.b32.xlu0 %v6191_v40, %s7738_s30 }
  0x77   : > { %1952 = vrot.lane.b32.xlu1 %v8180_v2, %s7739_s8  ;;  %v607_v16 = vsel %vm7891_vm5, %v602_v5, %v606_v12  ;;  %v7721_v12 = vld [vmem:[%s7807_s29 + $0x10] sm:$0xf] }
  0x7a   : > { %1892 = vrot.lane.b32.xlu0 %v6245_v6, %s7742_s11  ;;  %v618_v6 = vshll.u32 %v8273_v38, 16 }
  0x7b   : > { %2072 = vrot.lane.b32.xlu1 %v8207_v56, %s7741_s10 }
  0x7c   : > { %v8296_v63 = vrot.slane %v618_v6, 5 }
  0x7e   : > { %2012 = vrot.lane.b32.xlu0 %v8213_v49, %s7745_s14 }
  0x7f   : > { %1642 = vrot.lane.b32.xlu1 %v8097_v25, %s7740_s9  ;;  %v592_v25 = vrot.slane %v591_v10, 4  ;;  %v7720_v10 = vld [vmem:[%s7807_s29 + $0x4] sm:$0xf] }
  0x81   : > { %v8256_v17 = vsel %vm7891_vm5, %v592_v25, %v596_v20  ;;  %v628_v25 = vshll.u32 %v8307_v45, 16  ;;  %v632_v20 = vshrl.u32 %v8307_v45, 16 }
  0x82   : > { %1507 = vrot.lane.b32.xlu0 %v8104_v46, %s7743_s12  ;;  %v8245_v46 = vld [vmem:[%s7807_s29 + $0x70] sm:$0xf]  ;;  %v8267_v34 = vcombine.low %v587_v50, %v8256_v17 }
  0x83   : > { %1810 = vrot.lane.b32.xlu1 %v6219_v7, %s7744_s13  ;;  %v609_v28 = vshrl.u32 %v8245_v46, 16  ;;  %v612_v35 = vshll.u32 %v8245_v46, 16  ;;  %v6092_v57 = vrot.slane %v8245_v46, 9  ;;  %v7719_v7 = vld [vmem:[%s7807_s29] sm:$0xf]  ;;  %v634_v37 = vrot.slane %v632_v20, 4 }
  0x84   : > { %v6105_v11 = vcombine.low %v7719_v7, %v7720_v10 }
  0x85   : > { %v611_v9 = vrot.slane %v609_v28, 4  ;;  %v614_v39 = vrot.slane %v612_v35, 5  ;;  %v624_v28 = vrot.slane %v622_v4, 4  ;;  %v630_v35 = vrot.slane %v628_v25, 5 }
  0x86   : > { %1726 = vrot.lane.b32.xlu0 %v6192_v53, %s7738_s30  ;;  %v6248_v4 = vcombine.low %v8242_v21, %v8300_v1 }
  0x87   : > { %1954 = vrot.lane.b32.xlu1 %v8236_v19, %s7739_s8  ;;  %v615_v52 = vor.u32 %v614_v39, %v611_v9  ;;  %v311_v9 = vld [vmem:[%s7807_s29 + $0x7c] sm:$0x1]  ;;  %v1132_v39 = vrot.slane %v8307_v45, 5  ;;  %v635_v6 = vor.u32 %v634_v37, %v630_v35 }
  0x88   : > { %v8263_v24 = vpop.permute.xlu1 %1714  ;;  %v638_v48 = vshll.u32 %v311_v9, 16  ;;  %v1135_v5 = vrot.slane %v311_v9, 5 }
  0x89   : > { %v616_v62 = vrot.slane %v615_v52, 4  ;;  %v636_v7 = vrot.slane %v635_v6, 4 }
  0x8a   : > { %1894 = vrot.lane.b32.xlu0 %v6246_v29, %s7742_s11  ;;  %v640_v10 = vrot.slane %v638_v48, 5 }
  0x8b   : > { %2074 = vrot.lane.b32.xlu1 %v8259_v27, %s7741_s10  ;;  %v8326_v14 = vsel %vm7891_vm5, %v616_v62, %v8296_v63  ;;  %v7722_v62 = vld [vmem:[%s7807_s29 + $0x8] sm:$0xf] }
  0x8c   : > { %v8275_v40 = vpop.permute.xlu1 %1942  ;;  %v8333_v29 = vcombine.low %v607_v16, %v8326_v14 }
  0x8e   : > { %2014 = vrot.lane.b32.xlu0 %v8267_v34, %s7745_s14 }
  0x8f   : > { %v1631_v43 = vpop.permute.xlu0 %1630  ;;  %1644 = vrot.lane.b32.xlu1 %v8156_v18, %s7740_s9  ;;  %v8293_v18 = vcombine.low %v8216_v26, %v8245_v46 }
  0x90   : > { %v8285_v55 = vpop.permute.xlu1 %2062 }
  0x92   : > { %1509 = vrot.lane.b32.xlu0 %v8162_v60, %s7743_s12  ;;  %v8304_v60 = vsel %vm7800_vm2, %v6092_v57, %v1129_v41  ;;  %v1131_v57 = vrot.slane %v1129_v41, 4  ;;  %v8369_v41 = vcombine.low %v8273_v38, %v8307_v45 }
  0x93   : > { %1812 = vrot.lane.b32.xlu1 %v6220_v42, %s7744_s13  ;;  %v1883_v13 = vpop.permute.xlu0 %1882  ;;  %v8319_v53 = vcombine.low %v8300_v1, %v8304_v60 }
  0x94   : > { %v8309_v31 = vpop.permute.xlu1 %1632 }
  0x96   : > { %1728 = vrot.lane.b32.xlu0 %v6193_v59, %s7738_s30  ;;  %v1134_v59 = vrot.slane %v1132_v39, 4 }
  0x97   : > { %1956 = vrot.lane.b32.xlu1 %v8293_v18, %s7739_s8 }
  0x9a   : > { %1896 = vrot.lane.b32.xlu0 %v6247_v61, %s7742_s11  ;;  %v1496_v15 = vpop.permute.xlu0 %1495 }
  0x9b   : > { %v2119_v50 = vsel %vm2116_vm8, %v6105_v11, %v1496_v15  ;;  %2076 = vrot.lane.b32.xlu1 %v8319_v53, %s7741_s10  ;;  %v1799_v23 = vpop.permute.xlu1 %1798 }
  0x9c   : > { %v2200_v54 = vsel %vm2198_vm9, %v2119_v50, %v1631_v43  ;;  %v6221_v43 = vcombine.low %v8256_v17, %v607_v16 }
  0x9d   : > { %v2255_v42 = vsel %vm2253_vm10, %v2200_v54, %v8263_v24  ;;  %v625_v24 = vor.u32 %v624_v28, %v8296_v63  ;;  %v6194_v63 = vcombine.low %v8192_v58, %v8216_v26  ;;  %v8380_v58 = vsel %vm7800_vm2, %v1134_v59, %v1135_v5 }
  0x9e   : > { %2016 = vrot.lane.b32.xlu0 %v8333_v29, %s7745_s14  ;;  %v2310_v44 = vsel %vm2308_vm11, %v2255_v42, %v1799_v23  ;;  %v8397_v23 = vsel %vm7891_vm5, %v636_v7, %v640_v10  ;;  %v7724_v7 = vld [vmem:[%s7807_s29 + $0x18] sm:$0xf] }
  0x9f   : > { %v2365_v47 = vsel %vm2363_vm12, %v2310_v44, %v1883_v13  ;;  %1646 = vrot.lane.b32.xlu1 %v8207_v56, %s7740_s9  ;;  %v6106_v13 = vcombine.low %v7722_v62, %v7721_v12  ;;  %v626_v61 = vrot.slane %v625_v24, 4 }
  0xa0   : > { %v2420_v52 = vsel %vm2418_vm13, %v2365_v47, %v8275_v40  ;;  %v2003_v36 = vpop.permute.xlu0 %2002  ;;  %v8363_v40 = vld [vmem:[%s7807_s29 + $0x80] sm:$0xf] }
  0xa1   : > { %v2475_v17 = vsel %vm2473_vm14, %v2420_v52, %v2003_v36  ;;  %v643_v25 = vshrl.u32 %v8363_v40, 16  ;;  %v646_v20 = vshll.u32 %v8363_v40, 16  ;;  %v631_v50 = vsel %vm7891_vm5, %v626_v61, %v630_v35  ;;  %v7723_v61 = vld [vmem:[%s7807_s29 + $0x14] sm:$0xf] }
  0xa2   : > { %1511 = vrot.lane.b32.xlu0 %v8213_v49, %s7743_s12  ;;  %v2530_v56 = vsel %vm2528_vm15, %v2475_v17, %v8285_v55  ;;  %v8372_v49 = vld [vmem:[%s7807_s29 + $0x84] sm:$0xf]  ;;  %v8376_v55 = vsel %vm7800_vm2, %v1131_v57, %v1132_v39  ;;  %v8409_v35 = vcombine.low %v631_v50, %v8397_v23  ;;  %v6222_v36 = vcombine.low %v8326_v14, %v631_v50 }
  0xa3   : > { %7394 = vmatmul.mubr.msk.bf16.vlgmr.msra.gmra.mrb[0].mxu0 %vm2598_vm0, %v2530_v56  ;;  %1814 = vrot.lane.b32.xlu1 %v6221_v43, %s7744_s13  ;;  %v652_v15 = vshll.u32 %v8372_v49, 16  ;;  %v8401_v21 = vcombine.low %v8376_v55, %v8380_v58  ;;  %v656_v1 = vshrl.u32 %v8372_v49, 16  ;;  %v645_v39 = vrot.slane %v643_v25, 4 }
  0xa4   : > { %v1498_v11 = vpop.permute.xlu0 %1497  ;;  %7397 = vmatprep.mubr.msk.bf16.mxu0 %vm7747_vm7, %v11284_v22  ;;  %v648_v42 = vrot.slane %v646_v20, 5  ;;  %v1139_v6 = vrot.slane %v8372_v49, 5  ;;  %v6093_v62 = vrot.slane %v8363_v40, 9  ;;  %v8443_v20 = vld [vmem:[%s7807_s29 + $0x90] sm:$0xf] }
  0xa5   : > { %v2122_v26 = vsel %vm2116_vm8, %v6106_v13, %v1498_v11  ;;  %v1801_v16 = vpop.permute.xlu1 %1800  ;;  %v654_v44 = vrot.slane %v652_v15, 5  ;;  %v658_v43 = vrot.slane %v656_v1, 4  ;;  %v6195_v11 = vcombine.low %v8245_v46, %v8273_v38 }
  0xa6   : > { %1730 = vrot.lane.b32.xlu0 %v6194_v63, %s7738_s30  ;;  %v2202_v28 = vsel %vm2198_vm9, %v2122_v26, %v8309_v31  ;;  %v8415_v31 = vld [vmem:[%s7807_s29 + $0x88] sm:$0xf]  ;;  %v649_v57 = vor.u32 %v648_v42, %v645_v39  ;;  %v1141_v13 = vrot.slane %v1139_v6, 4  ;;  %v8440_v26 = vcombine.low %v8363_v40, %v8372_v49 }
  0xa7   : > { %1958 = vrot.lane.b32.xlu1 %v8369_v41, %s7739_s8  ;;  %v659_v59 = vor.u32 %v658_v43, %v654_v44  ;;  %v662_v5 = vshll.u32 %v8415_v31, 16  ;;  %v1142_v56 = vrot.slane %v8415_v31, 5  ;;  %v6249_v1 = vcombine.low %v8304_v60, %v8376_v55 }
  0xa8   : > { %v1717_v37 = vpop.permute.xlu0 %1716  ;;  %v680_v60 = vshll.u32 %v8443_v20, 16 }
  0xa9   : > { %v2257_v54 = vsel %vm2253_vm10, %v2202_v28, %v1717_v37  ;;  %v1945_v9 = vpop.permute.xlu1 %1944  ;;  %v664_v25 = vrot.slane %v662_v5, 5  ;;  %v8451_v46 = vsel %vm7800_vm2, %v1141_v13, %v1142_v56  ;;  %v666_v28 = vshrl.u32 %v8415_v31, 16 }
  0xaa   : > { %1898 = vrot.lane.b32.xlu0 %v6248_v4, %s7742_s11  ;;  %v2312_v47 = vsel %vm2308_vm11, %v2257_v54, %v1801_v16  ;;  %v650_v16 = vrot.slane %v649_v57, 4  ;;  %v660_v4 = vrot.slane %v659_v59, 4  ;;  %v677_v37 = vshrl.u32 %v8443_v20, 16  ;;  %v8485_v59 = vld [vmem:[%s7807_s29 + $0x94] sm:$0xf] }
  0xab   : > { %2078 = vrot.lane.b32.xlu1 %v8401_v21, %s7741_s10 }
  0xac   : > { %v1885_v24 = vpop.permute.xlu0 %1884  ;;  %v655_v54 = vsel %vm7891_vm5, %v650_v16, %v654_v44  ;;  %v1149_v16 = vrot.slane %v8485_v59, 5 }
  0xad   : > { %v2367_v48 = vsel %vm2363_vm12, %v2312_v47, %v1885_v24  ;;  %v2065_v52 = vpop.permute.xlu1 %2064  ;;  %v668_v24 = vrot.slane %v666_v28, 4  ;;  %v6223_v13 = vcombine.low %v8397_v23, %v655_v54  ;;  %v6196_v23 = vcombine.low %v8307_v45, %v8363_v40 }
  0xae   : > { %2018 = vrot.lane.b32.xlu0 %v8409_v35, %s7745_s14  ;;  %v2422_v17 = vsel %vm2418_vm13, %v2367_v48, %v1945_v9  ;;  %v8467_v9 = vsel %vm7891_vm5, %v660_v4, %v664_v25  ;;  %v679_v48 = vrot.slane %v677_v37, 4 }
  0xaf   : > { %1648 = vrot.lane.b32.xlu1 %v8259_v27, %s7740_s9  ;;  %v6107_v27 = vcombine.low %v7723_v61, %v7724_v7  ;;  %v8478_v44 = vcombine.low %v655_v54, %v8467_v9  ;;  %v686_v61 = vshll.u32 %v8485_v59, 16  ;;  %v1144_v7 = vrot.slane %v1142_v56, 4 }
  0xb0   : > { %v2005_v12 = vpop.permute.xlu0 %2004 }
  0xb1   : > { %v2477_v63 = vsel %vm2473_vm14, %v2422_v17, %v2005_v12  ;;  %v1635_v10 = vpop.permute.xlu1 %1634  ;;  %v669_v12 = vor.u32 %v668_v24, %v664_v25 }
  0xb2   : > { %v2532_v14 = vsel %vm2528_vm15, %v2477_v63, %v2065_v52  ;;  %1513 = vrot.lane.b32.xlu0 %v8267_v34, %s7743_s12  ;;  %v8447_v34 = vsel %vm7800_vm2, %v6093_v62, %v1139_v6  ;;  %v315_v6 = vld [vmem:[%s7807_s29 + $0x8c] sm:$0x1]  ;;  %v682_v52 = vrot.slane %v680_v60, 5 }
  0xb3   : > { %7398 = vmatmul.mubr.msk.bf16.gmra.mrb[4].mxu0 %vm2598_vm0, %v2532_v14  ;;  %1816 = vrot.lane.b32.xlu1 %v6222_v36, %s7744_s13  ;;  %v8471_v39 = vcombine.low %v8447_v34, %v8451_v46  ;;  %v672_v62 = vshll.u32 %v315_v6, 16  ;;  %v1145_v14 = vrot.slane %v315_v6, 5  ;;  %v670_v56 = vrot.slane %v669_v12, 4 }
  0xb4   : > { %v1500_v15 = vpop.permute.xlu0 %1499  ;;  %7401 = vmatprep.mubr.msk.bf16.mxu0 %vm7747_vm7, %v11284_v22  ;;  %v683_v63 = vor.u32 %v682_v52, %v679_v48  ;;  %v6250_v60 = vcombine.low %v8380_v58, %v8447_v34 }
  0xb5   : > { %v2125_v38 = vsel %vm2116_vm8, %v6107_v27, %v1500_v15  ;;  %v1803_v50 = vpop.permute.xlu1 %1802  ;;  %v674_v15 = vrot.slane %v672_v62, 5  ;;  %v8511_v37 = vsel %vm7800_vm2, %v1144_v7, %v1145_v14  ;;  %v319_v62 = vld [vmem:[%s7807_s29 + $0x9c] sm:$0x1] }
  0xb6   : > { %1732 = vrot.lane.b32.xlu0 %v6195_v11, %s7738_s30  ;;  %v2204_v55 = vsel %vm2198_vm9, %v2125_v38, %v1635_v10  ;;  %v6094_v11 = vrot.slane %v8443_v20, 9  ;;  %v8507_v38 = vcombine.low %v8415_v31, %v8443_v20  ;;  %v706_v14 = vshll.u32 %v319_v62, 16 }
  0xb7   : > { %1960 = vrot.lane.b32.xlu1 %v8440_v26, %s7739_s8 }
  0xb8   : > { %v1719_v42 = vpop.permute.xlu0 %1718  ;;  %v8515_v45 = vsel %vm7800_vm2, %v6094_v11, %v1149_v16 }
  0xb9   : > { %v2259_v43 = vsel %vm2253_vm10, %v2204_v55, %v1719_v42  ;;  %v1947_v47 = vpop.permute.xlu1 %1946  ;;  %v675_v55 = vsel %vm7891_vm5, %v670_v56, %v674_v15  ;;  %v690_v42 = vshrl.u32 %v8485_v59, 16 }
  0xba   : > { %1900 = vrot.lane.b32.xlu0 %v6249_v1, %s7742_s11  ;;  %v2314_v36 = vsel %vm2308_vm11, %v2259_v43, %v1803_v50  ;;  %v684_v50 = vrot.slane %v683_v63, 4  ;;  %v688_v1 = vrot.slane %v686_v61, 5  ;;  %v6224_v7 = vcombine.low %v8467_v9, %v675_v55  ;;  %v8567_v9 = vld [vmem:[%s7807_s29 + $0xa0] sm:$0xf] }
  0xbb   : > { %2080 = vrot.lane.b32.xlu1 %v8471_v39, %s7741_s10 }
  0xbc   : > { %v1887_v57 = vpop.permute.xlu0 %1886  ;;  %v8534_v43 = vsel %vm7891_vm5, %v684_v50, %v688_v1 }
  0xbd   : > { %v2369_v5 = vsel %vm2363_vm12, %v2314_v36, %v1887_v57  ;;  %v2067_v17 = vpop.permute.xlu1 %2066  ;;  %v8546_v52 = vcombine.low %v675_v55, %v8534_v43  ;;  %v692_v36 = vrot.slane %v690_v42, 4  ;;  %v6251_v42 = vcombine.low %v8451_v46, %v8511_v37 }
  0xbe   : > { %2020 = vrot.lane.b32.xlu0 %v8478_v44, %s7745_s14  ;;  %v2424_v27 = vsel %vm2418_vm13, %v2369_v5, %v1947_v47 }
  0xbf   : > { %1650 = vrot.lane.b32.xlu1 %v8319_v53, %s7740_s9 }
  0xc0   : > { %v2007_v10 = vpop.permute.xlu0 %2006 }
  0xc1   : > { %v2479_v4 = vsel %vm2473_vm14, %v2424_v27, %v2007_v10  ;;  %v1637_v25 = vpop.permute.xlu1 %1636  ;;  %v693_v27 = vor.u32 %v692_v36, %v688_v1  ;;  %v8576_v1 = vld [vmem:[%s7807_s29 + $0xa4] sm:$0xf] }
  0xc2   : > { %v2534_v53 = vsel %vm2528_vm15, %v2479_v4, %v2067_v17  ;;  %1515 = vrot.lane.b32.xlu0 %v8333_v29, %s7743_s12  ;;  %v8520_v29 = vld [vmem:[%s7807_s29 + $0x98] sm:$0xf]  ;;  %v724_v46 = vshrl.u32 %v8576_v1, 16 }
  0xc3   : > { %7402 = vmatmul.mubr.msk.bf16.gmra.mrb[8].mxu0 %vm2598_vm0, %v2534_v53  ;;  %1818 = vrot.lane.b32.xlu1 %v6223_v13, %s7744_s13  ;;  %v696_v47 = vshll.u32 %v8520_v29, 16  ;;  %v700_v58 = vshrl.u32 %v8520_v29, 16  ;;  %v1152_v13 = vrot.slane %v8520_v29, 5 }
  0xc4   : > { %v1502_v28 = vpop.permute.xlu0 %1501  ;;  %7405 = vmatprep.mubr.msk.bf16.mxu0 %vm7747_vm7, %v11284_v22 }
  0xc5   : > { %v2128_v40 = vsel %vm2116_vm8, %v7827_v8, %v1502_v28  ;;  %v1805_v54 = vpop.permute.xlu1 %1804  ;;  %v8538_v8 = vcombine.low %v8511_v37, %v8515_v45  ;;  %v698_v57 = vrot.slane %v696_v47, 5  ;;  %v702_v5 = vrot.slane %v700_v58, 4 }
  0xc6   : > { %1734 = vrot.lane.b32.xlu0 %v6196_v23, %s7738_s30  ;;  %v2206_v34 = vsel %vm2198_vm9, %v2128_v40, %v1637_v25  ;;  %v1151_v25 = vrot.slane %v1149_v16, 4  ;;  %v1154_v53 = vrot.slane %v1152_v13, 4  ;;  %v1155_v23 = vrot.slane %v319_v62, 5 }
  0xc7   : > { %1962 = vrot.lane.b32.xlu1 %v8507_v38, %s7739_s8  ;;  %v703_v10 = vor.u32 %v702_v5, %v698_v57  ;;  %v8573_v16 = vcombine.low %v8485_v59, %v8520_v29  ;;  %v694_v28 = vrot.slane %v693_v27, 4  ;;  %v711_v47 = vshrl.u32 %v8567_v9, 16  ;;  %v8620_v27 = vld [vmem:[%s7807_s29 + $0xa8] sm:$0xf] }
  0xc8   : > { %v1721_v24 = vpop.permute.xlu0 %1720  ;;  %v714_v58 = vshll.u32 %v8567_v9, 16 }
  0xc9   : > { %v2261_v6 = vsel %vm2253_vm10, %v2206_v34, %v1721_v24  ;;  %v1949_v48 = vpop.permute.xlu1 %1948  ;;  %v704_v40 = vrot.slane %v703_v10, 4  ;;  %v720_v34 = vshll.u32 %v8576_v1, 16  ;;  %v699_v24 = vsel %vm7891_vm5, %v694_v28, %v698_v57 }
  0xca   : > { %1902 = vrot.lane.b32.xlu0 %v6250_v60, %s7742_s11  ;;  %v2316_v17 = vsel %vm2308_vm11, %v2261_v6, %v1805_v54  ;;  %v708_v54 = vrot.slane %v706_v14, 5  ;;  %v713_v57 = vrot.slane %v711_v47, 4 }
  0xcb   : > { %2082 = vrot.lane.b32.xlu1 %v8538_v8, %s7741_s10  ;;  %v722_v62 = vrot.slane %v720_v34, 5 }
  0xcc   : > { %v1889_v12 = vpop.permute.xlu0 %1888 }
  0xcd   : > { %v2371_v63 = vsel %vm2363_vm12, %v2316_v17, %v1889_v12  ;;  %v2069_v61 = vpop.permute.xlu1 %2068  ;;  %v716_v17 = vrot.slane %v714_v58, 5 }
  0xce   : > { %2022 = vrot.lane.b32.xlu0 %v8546_v52, %s7745_s14  ;;  %v2426_v11 = vsel %vm2418_vm13, %v2371_v63, %v1949_v48 }
  0xcf   : > { %1652 = vrot.lane.b32.xlu1 %v8401_v21, %s7740_s9  ;;  %v6197_v21 = vcombine.low %v8372_v49, %v8415_v31  ;;  %v8584_v49 = vsel %vm7800_vm2, %v1154_v53, %v1155_v23  ;;  %v730_v53 = vshll.u32 %v8620_v27, 16 }
  0xd0   : > { %v2009_v4 = vpop.permute.xlu0 %2008 }
  0xd1   : > { %v2481_v56 = vsel %vm2473_vm14, %v2426_v11, %v2009_v4  ;;  %v1639_v15 = vpop.permute.xlu1 %1638  ;;  %v717_v11 = vor.u32 %v716_v17, %v713_v57  ;;  %v6225_v4 = vcombine.low %v8534_v43, %v699_v24 }
  0xd2   : > { %v2536_v50 = vsel %vm2528_vm15, %v2481_v56, %v2069_v61  ;;  %1517 = vrot.lane.b32.xlu0 %v8409_v35, %s7743_s12  ;;  %v8580_v35 = vsel %vm7800_vm2, %v1151_v25, %v1152_v13  ;;  %v726_v13 = vrot.slane %v724_v46, 4  ;;  %v6095_v56 = vrot.slane %v8567_v9, 9 }
  0xd3   : > { %7406 = vmatmul.mubr.msk.bf16.gmra.mrb[12].mxu0 %vm2598_vm0, %v2536_v50  ;;  %1820 = vrot.lane.b32.xlu1 %v6224_v7, %s7744_s13  ;;  %v8606_v6 = vcombine.low %v8580_v35, %v8584_v49  ;;  %v1159_v7 = vrot.slane %v8576_v1, 5  ;;  %v734_v46 = vshrl.u32 %v8620_v27, 16 }
  0xd4   : > { %v1504_v60 = vpop.permute.xlu0 %1503  ;;  %7409 = vmatprep.mubr.msk.bf16.mxu0 %vm7747_vm7, %v11284_v22  ;;  %v727_v25 = vor.u32 %v726_v13, %v722_v62  ;;  %v323_v13 = vld [vmem:[%s7807_s29 + $0xac] sm:$0x1] }
  0xd5   : > { %v2131_v31 = vsel %vm2116_vm8, %v7963_v3, %v1504_v60  ;;  %v1807_v55 = vpop.permute.xlu1 %1806  ;;  %v8602_v3 = vsel %vm7891_vm5, %v704_v40, %v708_v54  ;;  %v1161_v50 = vrot.slane %v1159_v7, 4  ;;  %v718_v54 = vrot.slane %v717_v11, 4 }
  0xd6   : > { %1736 = vrot.lane.b32.xlu0 %v6197_v21, %s7738_s30  ;;  %v2208_v37 = vsel %vm2198_vm9, %v2131_v31, %v1639_v15  ;;  %v8613_v12 = vcombine.low %v699_v24, %v8602_v3  ;;  %v1162_v21 = vrot.slane %v8620_v27, 5  ;;  %v8642_v60 = vcombine.low %v8567_v9, %v8576_v1 }
  0xd7   : > { %1964 = vrot.lane.b32.xlu1 %v8573_v16, %s7739_s8  ;;  %v728_v31 = vrot.slane %v727_v25, 4  ;;  %v723_v34 = vsel %vm7891_vm5, %v718_v54, %v722_v62  ;;  %v6252_v24 = vcombine.low %v8515_v45, %v8580_v35  ;;  %v736_v62 = vrot.slane %v734_v46, 4 }
  0xd8   : > { %v1723_v48 = vpop.permute.xlu0 %1722  ;;  %v1165_v54 = vrot.slane %v323_v13, 5 }
  0xd9   : > { %v2263_v36 = vsel %vm2253_vm10, %v2208_v37, %v1723_v48  ;;  %v1951_v5 = vpop.permute.xlu1 %1950 }
  0xda   : > { %1904 = vrot.lane.b32.xlu0 %v6251_v42, %s7742_s11  ;;  %v2318_v63 = vsel %vm2308_vm11, %v2263_v36, %v1807_v55  ;;  %v732_v55 = vrot.slane %v730_v53, 5  ;;  %v8646_v42 = vsel %vm7800_vm2, %v6095_v56, %v1159_v7  ;;  %v740_v53 = vshll.u32 %v323_v13, 16 }
  0xdb   : > { %2084 = vrot.lane.b32.xlu1 %v8606_v6, %s7741_s10 }
  0xdc   : > { %v1891_v61 = vpop.permute.xlu0 %1890  ;;  %v8669_v37 = vsel %vm7891_vm5, %v728_v31, %v732_v55  ;;  %v737_v25 = vor.u32 %v736_v62, %v732_v55 }
  0xdd   : > { %v2373_v10 = vsel %vm2363_vm12, %v2318_v63, %v1891_v61  ;;  %v2071_v14 = vpop.permute.xlu1 %2070  ;;  %v8681_v17 = vcombine.low %v723_v34, %v8669_v37 }
  0xde   : > { %2024 = vrot.lane.b32.xlu0 %v8613_v12, %s7745_s14  ;;  %v2428_v23 = vsel %vm2418_vm13, %v2373_v10, %v1951_v5 }
  0xdf   : > { %1654 = vrot.lane.b32.xlu1 %v8471_v39, %s7740_s9  ;;  %v6198_v39 = vcombine.low %v8443_v20, %v8485_v59  ;;  %v8655_v20 = vld [vmem:[%s7807_s29 + $0xb0] sm:$0xf] }
  0xe0   : > { %v2011_v15 = vpop.permute.xlu0 %2010  ;;  %v745_v48 = vshrl.u32 %v8655_v20, 16  ;;  %v748_v45 = vshll.u32 %v8655_v20, 16 }
  0xe1   : > { %v2483_v28 = vsel %vm2473_vm14, %v2428_v23, %v2011_v15  ;;  %v1641_v40 = vpop.permute.xlu1 %1640  ;;  %v6226_v23 = vcombine.low %v8602_v3, %v723_v34 }
  0xe2   : > { %v2538_v43 = vsel %vm2528_vm15, %v2483_v28, %v2071_v14  ;;  %1519 = vrot.lane.b32.xlu0 %v8478_v44, %s7743_s12  ;;  %v8650_v44 = vsel %vm7800_vm2, %v1161_v50, %v1162_v21  ;;  %v747_v63 = vrot.slane %v745_v48, 4  ;;  %v750_v61 = vrot.slane %v748_v45, 5  ;;  %v8688_v14 = vld [vmem:[%s7807_s29 + $0xb4] sm:$0xf] }
  0xe3   : > { %7410 = vmatmul.mubr.msk.bf16.gmra.mrb[16].mxu0 %vm2598_vm0, %v2538_v43  ;;  %1822 = vrot.lane.b32.xlu1 %v6225_v4, %s7744_s13  ;;  %v754_v15 = vshll.u32 %v8688_v14, 16  ;;  %v1164_v50 = vrot.slane %v1162_v21, 4  ;;  %v6096_v43 = vrot.slane %v8655_v20, 9  ;;  %v738_v21 = vrot.slane %v737_v25, 4 }
  0xe4   : > { %v1506_v47 = vpop.permute.xlu0 %1505  ;;  %7413 = vmatprep.mubr.msk.bf16.mxu0 %vm7747_vm7, %v11284_v22  ;;  %v751_v56 = vor.u32 %v750_v61, %v747_v63  ;;  %v6253_v45 = vcombine.low %v8584_v49, %v8646_v42 }
  0xe5   : > { %v2134_v59 = vsel %vm2116_vm8, %v8013_v30, %v1506_v47  ;;  %v1809_v58 = vpop.permute.xlu1 %1808  ;;  %v8673_v30 = vcombine.low %v8646_v42, %v8650_v44  ;;  %v742_v47 = vrot.slane %v740_v53, 5  ;;  %v756_v34 = vrot.slane %v754_v15, 5  ;;  %v327_v53 = vld [vmem:[%s7807_s29 + $0xbc] sm:$0x1] }
  0xe6   : > { %1738 = vrot.lane.b32.xlu0 %v6198_v39, %s7738_s30  ;;  %v2210_v35 = vsel %vm2198_vm9, %v2134_v59, %v1641_v40  ;;  %v1169_v39 = vrot.slane %v8688_v14, 5  ;;  %v8710_v59 = vcombine.low %v8620_v27, %v8655_v20  ;;  %v8714_v46 = vsel %vm7800_vm2, %v1164_v50, %v1165_v54 }
  0xe7   : > { %1966 = vrot.lane.b32.xlu1 %v8642_v60, %s7739_s8  ;;  %v774_v54 = vshll.u32 %v327_v53, 16 }
  0xe8   : > { %v1725_v36 = vpop.permute.xlu0 %1724 }
  0xe9   : > { %v2265_v5 = vsel %vm2253_vm10, %v2210_v35, %v1725_v36  ;;  %v1953_v57 = vpop.permute.xlu1 %1952  ;;  %v743_v35 = vsel %vm7891_vm5, %v738_v21, %v742_v47  ;;  %v758_v36 = vshrl.u32 %v8688_v14, 16 }
  0xea   : > { %1906 = vrot.lane.b32.xlu0 %v6252_v24, %s7742_s11  ;;  %v2320_v7 = vsel %vm2308_vm11, %v2265_v5, %v1809_v58  ;;  %v752_v58 = vrot.slane %v751_v56, 4 }
  0xeb   : > { %2086 = vrot.lane.b32.xlu1 %v8673_v30, %s7741_s10 }
  0xec   : > { %v1893_v10 = vpop.permute.xlu0 %1892  ;;  %v8737_v5 = vsel %vm7891_vm5, %v752_v58, %v756_v34 }
  0xed   : > { %v2375_v11 = vsel %vm2363_vm12, %v2320_v7, %v1893_v10  ;;  %v2073_v4 = vpop.permute.xlu1 %2072  ;;  %v8749_v61 = vcombine.low %v743_v35, %v8737_v5  ;;  %v760_v7 = vrot.slane %v758_v36, 4  ;;  %v6254_v36 = vcombine.low %v8650_v44, %v8714_v46 }
  0xee   : > { %2026 = vrot.lane.b32.xlu0 %v8681_v17, %s7745_s14  ;;  %v2430_v28 = vsel %vm2418_vm13, %v2375_v11, %v1953_v57 }
  0xef   : > { %1656 = vrot.lane.b32.xlu1 %v8538_v8, %s7740_s9  ;;  %v6199_v8 = vcombine.low %v8520_v29, %v8567_v9  ;;  %v8718_v29 = vsel %vm7800_vm2, %v6096_v43, %v1169_v39  ;;  %v761_v50 = vor.u32 %v760_v7, %v756_v34 }
  0xf0   : > { %v2013_v40 = vpop.permute.xlu0 %2012 }
  0xf1   : > { %v2485_v31 = vsel %vm2473_vm14, %v2430_v28, %v2013_v40  ;;  %v1643_v55 = vpop.permute.xlu1 %1642  ;;  %v6227_v28 = vcombine.low %v8669_v37, %v743_v35  ;;  %v762_v37 = vrot.slane %v761_v50, 4  ;;  %v8822_v50 = vld [vmem:[%s7807_s29 + $0xc8] sm:$0xf] }
  0xf2   : > { %v2540_v3 = vsel %vm2528_vm15, %v2485_v31, %v2073_v4  ;;  %1521 = vrot.lane.b32.xlu0 %v8546_v52, %s7743_s12  ;;  %v8723_v52 = vld [vmem:[%s7807_s29 + $0xb8] sm:$0xf] }
  0xf3   : > { %7414 = vmatmul.mubr.msk.bf16.gmra.mrb[20].mxu0 %vm2598_vm0, %v2540_v3  ;;  %1824 = vrot.lane.b32.xlu1 %v6226_v23, %s7744_s13  ;;  %v764_v49 = vshll.u32 %v8723_v52, 16  ;;  %v768_v42 = vshrl.u32 %v8723_v52, 16  ;;  %v1172_v23 = vrot.slane %v8723_v52, 5 }
  0xf4   : > { %v1508_v24 = vpop.permute.xlu0 %1507  ;;  %7417 = vmatprep.mubr.msk.bf16.mxu0 %vm7747_vm7, %v11284_v22 }
  0xf5   : > { %v2137_v9 = vsel %vm2116_vm8, %v8069_v33, %v1508_v24  ;;  %v1811_v48 = vpop.permute.xlu1 %1810  ;;  %v8741_v33 = vcombine.low %v8714_v46, %v8718_v29  ;;  %v766_v10 = vrot.slane %v764_v49, 5  ;;  %v770_v11 = vrot.slane %v768_v42, 4 }
  0xf6   : > { %1740 = vrot.lane.b32.xlu0 %v6199_v8, %s7738_s30  ;;  %v2212_v57 = vsel %vm2198_vm9, %v2137_v9, %v1643_v55  ;;  %v1171_v55 = vrot.slane %v1169_v39, 4  ;;  %v1174_v3 = vrot.slane %v1172_v23, 4  ;;  %v1175_v8 = vrot.slane %v327_v53, 5  ;;  %v8776_v9 = vld [vmem:[%s7807_s29 + $0xc0] sm:$0xf] }
  0xf7   : > { %1968 = vrot.lane.b32.xlu1 %v8710_v59, %s7739_s8  ;;  %v771_v40 = vor.u32 %v770_v11, %v766_v10  ;;  %v8773_v39 = vcombine.low %v8688_v14, %v8723_v52  ;;  %v776_v24 = vrot.slane %v774_v54, 5  ;;  %v767_v49 = vsel %vm7891_vm5, %v762_v37, %v766_v10  ;;  %v7621_v37 = vld [vmem:[%s11277_s4 + $0x40] sm:$0xff]  }
  0xf8   : > { %v1727_v62 = vpop.permute.xlu0 %1726  ;;  %v779_v42 = vshrl.u32 %v8776_v9, 16  ;;  %6915 = vmatprep.subr.bf16.mxu1 %v7621_v37  ;;  %v7629_v37 = vld [vmem:[%s11277_s4 + $0x58] sm:$0xff]  }
  0xf9   : > { %v2267_v13 = vsel %vm2253_vm10, %v2212_v57, %v1727_v62  ;;  %v1955_v63 = vpop.permute.xlu1 %1954  ;;  %v772_v34 = vrot.slane %v771_v40, 4  ;;  %v782_v57 = vshll.u32 %v8776_v9, 16 }
  0xfa   : > { %1908 = vrot.lane.b32.xlu0 %v6253_v45, %s7742_s11  ;;  %v2322_v4 = vsel %vm2308_vm11, %v2267_v13, %v1811_v48 }
  0xfb   : > { %2088 = vrot.lane.b32.xlu1 %v8741_v33, %s7741_s10  ;;  %v8804_v62 = vsel %vm7891_vm5, %v772_v34, %v776_v24 }
  0xfc   : > { %v1895_v25 = vpop.permute.xlu0 %1894  ;;  %v8816_v11 = vcombine.low %v767_v49, %v8804_v62 }
  0xfd   : > { %v2377_v56 = vsel %vm2363_vm12, %v2322_v4, %v1895_v25  ;;  %v2075_v15 = vpop.permute.xlu1 %2074  ;;  %v781_v4 = vrot.slane %v779_v42, 4  ;;  %v784_v25 = vrot.slane %v782_v57, 5  ;;  %v7623_v57 = vld [vmem:[%s11277_s4 + $0x48] sm:$0xff]  }
  0xfe   : > { %2028 = vrot.lane.b32.xlu0 %v8749_v61, %s7745_s14  ;;  %v2432_v43 = vsel %vm2418_vm13, %v2377_v56, %v1955_v63 }
  0xff   : > { %1658 = vrot.lane.b32.xlu1 %v8606_v6, %s7740_s9  ;;  %v6200_v6 = vcombine.low %v8576_v1, %v8620_v27  ;;  %v8784_v1 = vsel %vm7800_vm2, %v1174_v3, %v1175_v8  ;;  %v8789_v27 = vld [vmem:[%s7807_s29 + $0xc4] sm:$0xf]  ;;  %v798_v3 = vshll.u32 %v8822_v50, 16 }
 0x100   : > { %v2015_v31 = vpop.permute.xlu0 %2014  ;;  %v788_v44 = vshll.u32 %v8789_v27, 16  ;;  %v792_v46 = vshrl.u32 %v8789_v27, 16 }
 0x101   : > { %v2487_v21 = vsel %vm2473_vm14, %v2432_v43, %v2015_v31  ;;  %v1645_v47 = vpop.permute.xlu1 %1644  ;;  %v785_v43 = vor.u32 %v784_v25, %v781_v4  ;;  %v6228_v31 = vcombine.low %v8737_v5, %v767_v49  ;;  %v7622_v5 = vld [vmem:[%s11277_s4] sm:$0xff]   ;;  %v8853_v49 = vrot.slane %v798_v3, 5 }
 0x102   : > { %v2542_v58 = vsel %vm2528_vm15, %v2487_v21, %v2075_v15  ;;  %1523 = vrot.lane.b32.xlu0 %v8613_v12, %s7743_s12  ;;  %v8780_v12 = vsel %vm7800_vm2, %v1171_v55, %v1172_v23  ;;  %v790_v53 = vrot.slane %v788_v44, 5  ;;  %v794_v23 = vrot.slane %v792_v46, 4  ;;  %6916 = vmatpush3.bf16.msra.mxu1 %v7622_v5  ;;  %v7630_v5 = vld [vmem:[%s11277_s4 + $0x18] sm:$0xff]  }
 0x103   : > { %7418 = vmatmul.mubr.msk.bf16.gmra.mrb[24].mxu0 %vm2598_vm0, %v2542_v58  ;;  %1826 = vrot.lane.b32.xlu1 %v6227_v28, %s7744_s13  ;;  %v1179_v28 = vrot.slane %v8789_v27, 5 }
 0x104   : > { %v1510_v48 = vpop.permute.xlu0 %1509  ;;  %7421 = vmatprep.mubr.msk.bf16.mxu0 %vm7747_vm7, %v11284_v22  ;;  %v795_v55 = vor.u32 %v794_v23, %v790_v53  ;;  %6917 = vmatprep.subr.bf16.mxu1 %v7623_v57 }
 0x105   : > { %v2140_v45 = vsel %vm2116_vm8, %v8132_v32, %v1510_v48  ;;  %v1813_v35 = vpop.permute.xlu1 %1812  ;;  %v8808_v32 = vcombine.low %v8780_v12, %v8784_v1  ;;  %v1181_v58 = vrot.slane %v1179_v28, 4  ;;  %v6201_v48 = vcombine.low %v8655_v20, %v8688_v14  ;;  %v8868_v14 = vld [vmem:[%s7807_s29 + $0xd0] sm:$0xf] }
 0x106   : > { %1742 = vrot.lane.b32.xlu0 %v6200_v6, %s7738_s30  ;;  %v2214_v13 = vsel %vm2198_vm9, %v2140_v45, %v1645_v47  ;;  %v6097_v47 = vrot.slane %v8776_v9, 9  ;;  %v1182_v6 = vrot.slane %v8822_v50, 5  ;;  %v786_v45 = vrot.slane %v785_v43, 4  ;;  %v331_v43 = vld [vmem:[%s7807_s29 + $0xcc] sm:$0x1] }
 0x107   : > { %1970 = vrot.lane.b32.xlu1 %v8773_v39, %s7739_s8  ;;  %v1185_v57 = vrot.slane %v331_v43, 5 }
 0x108   : > { %v1729_v63 = vpop.permute.xlu0 %1728  ;;  %v8863_v20 = vsel %vm7800_vm2, %v1181_v58, %v1182_v6 }
 0x109   : > { %v2269_v7 = vsel %vm2253_vm10, %v2214_v13, %v1729_v63  ;;  %v1957_v10 = vpop.permute.xlu1 %1956  ;;  %v7625_v13 = vld [vmem:[%s11277_s4 + $0x8] sm:$0xff]   ;;  %v6255_v63 = vcombine.low %v8718_v29, %v8780_v12  ;;  %v813_v29 = vshrl.u32 %v8868_v14, 16  ;;  %v816_v12 = vshll.u32 %v8868_v14, 16 }
 0x10a   : > { %1910 = vrot.lane.b32.xlu0 %v6254_v36, %s7742_s11  ;;  %v2324_v56 = vsel %vm2308_vm11, %v2269_v7, %v1813_v35  ;;  %v8851_v35 = vcombine.low %v8776_v9, %v8789_v27  ;;  %v796_v36 = vrot.slane %v795_v55, 4  ;;  %v791_v7 = vsel %vm7891_vm5, %v786_v45, %v790_v53  ;;  %6918 = vmatpush3.bf16.msra.mxu1 %v7625_v13 }
 0x10b   : > { %2090 = vrot.lane.b32.xlu1 %v8808_v32, %s7741_s10  ;;  %v818_v55 = vrot.slane %v816_v12, 5  ;;  %v8951_v12 = vcombine.low %v8822_v50, %v8868_v14 }
 0x10c   : > { %v1897_v15 = vpop.permute.xlu0 %1896 }
 0x10d   : > { %v2379_v40 = vsel %vm2363_vm12, %v2324_v56, %v1897_v15  ;;  %v2077_v54 = vpop.permute.xlu1 %2076  ;;  %v7626_v15 = vld [vmem:[%s11277_s4 + $0x50] sm:$0xff]  }
 0x10e   : > { %2030 = vrot.lane.b32.xlu0 %v8816_v11, %s7745_s14  ;;  %v2434_v8 = vsel %vm2418_vm13, %v2379_v40, %v1957_v10  ;;  %v802_v10 = vshrl.u32 %v8822_v50, 16  ;;  %6919 = vmatprep.subr.bf16.mxu1 %v7626_v15 }
 0x10f   : > { %1660 = vrot.lane.b32.xlu1 %v8673_v30, %s7740_s9 }
 0x110   : > { %v2017_v21 = vpop.permute.xlu0 %2016  ;;  %v804_v40 = vrot.slane %v802_v10, 4 }
 0x111   : > { %v2489_v34 = vsel %vm2473_vm14, %v2434_v8, %v2017_v21  ;;  %v1647_v30 = vpop.permute.xlu1 %1646  ;;  %v8914_v21 = vld [vmem:[%s7807_s29 + $0xd4] sm:$0xf] }
 0x112   : > { %v2544_v24 = vsel %vm2528_vm15, %v2489_v34, %v2077_v54  ;;  %1525 = vrot.lane.b32.xlu0 %v8681_v17, %s7743_s12  ;;  %v8857_v17 = vsel %vm7800_vm2, %v6097_v47, %v1179_v28  ;;  %v7627_v54 = vld [vmem:[%s11277_s4 + $0x10] sm:$0xff]   ;;  %v805_v34 = vor.u32 %v804_v40, %v8853_v49  ;;  %v822_v45 = vshll.u32 %v8914_v21, 16  ;;  %v7633_v40 = vld [vmem:[%s11277_s4 + $0x68] sm:$0xff]  }
 0x113   : > { %7422 = vmatmul.mubr.msk.bf16.gmra.mrb[28].mxu0 %vm2598_vm0, %v2544_v24  ;;  %1828 = vrot.lane.b32.xlu1 %v6228_v31, %s7744_s13  ;;  %v8893_v4 = vcombine.low %v8857_v17, %v8863_v20  ;;  %v815_v31 = vrot.slane %v813_v29, 4  ;;  %v6229_v24 = vcombine.low %v8804_v62, %v791_v7  ;;  %v7631_v62 = vld [vmem:[%s11277_s4 + $0x60] sm:$0xff]  }
 0x114   : > { %v1512_v42 = vpop.permute.xlu0 %1511  ;;  %7425 = vmatprep.mubr.msk.bf16.mxu0 %vm7747_vm7, %v11284_v22  ;;  %6920 = vmatpush3.bf16.msra.mxu1 %v7627_v54  ;;  %v7632_v29 = vld [vmem:[%s11277_s4 + $0x20] sm:$0xff]   ;;  %v6256_v54 = vcombine.low %v8784_v1, %v8857_v17 }
 0x115   : > { %v2143_v44 = vsel %vm2116_vm8, %v8180_v2, %v1512_v42  ;;  %v1815_v46 = vpop.permute.xlu1 %1814  ;;  %v8889_v2 = vsel %vm7891_vm5, %v796_v36, %v8853_v49  ;;  %v1184_v36 = vrot.slane %v1182_v6, 4  ;;  %6921 = vmatprep.subr.bf16.mxu1 %v7629_v37 }
 0x116   : > { %1744 = vrot.lane.b32.xlu0 %v6201_v48, %s7738_s30  ;;  %v2216_v25 = vsel %vm2198_vm9, %v2143_v44, %v1647_v30  ;;  %v8904_v28 = vcombine.low %v791_v7, %v8889_v2  ;;  %v808_v30 = vshll.u32 %v331_v43, 16  ;;  %v819_v48 = vor.u32 %v818_v55, %v815_v31 }
 0x117   : > { %1972 = vrot.lane.b32.xlu1 %v8851_v35, %s7739_s8  ;;  %v6098_v44 = vrot.slane %v8868_v14, 9  ;;  %v806_v7 = vrot.slane %v805_v34, 4  ;;  %v826_v31 = vshrl.u32 %v8914_v21, 16  ;;  %v7636_v34 = vld [vmem:[%s11277_s4 + $0x70] sm:$0xff]  }
 0x118   : > { %v1731_v53 = vpop.permute.xlu0 %1730  ;;  %6922 = vmatpush3.bf16.msra.mxu1 %v7630_v5  ;;  %v810_v10 = vrot.slane %v808_v30, 5 }
 0x119   : > { %v2271_v23 = vsel %vm2253_vm10, %v2216_v25, %v1731_v53  ;;  %v1959_v56 = vpop.permute.xlu1 %1958  ;;  %v820_v25 = vrot.slane %v819_v48, 4  ;;  %v8953_v53 = vrot.slane %v822_v45, 5  ;;  %6923 = vmatprep.subr.bf16.mxu1 %v7631_v62  ;;  %v828_v5 = vrot.slane %v826_v31, 4 }
 0x11a   : > { %1912 = vrot.lane.b32.xlu0 %v6255_v63, %s7742_s11  ;;  %v2326_v3 = vsel %vm2308_vm11, %v2271_v23, %v1815_v46  ;;  %v1189_v46 = vrot.slane %v8914_v21, 5  ;;  %v6202_v63 = vcombine.low %v8723_v52, %v8776_v9  ;;  %v8957_v52 = vsel %vm7800_vm2, %v1184_v36, %v1185_v57  ;;  %v8968_v23 = vld [vmem:[%s7807_s29 + $0xd8] sm:$0xf] }
 0x11b   : > { %2092 = vrot.lane.b32.xlu1 %v8893_v4, %s7741_s10  ;;  %v811_v43 = vsel %vm7891_vm5, %v806_v7, %v810_v10  ;;  %v8989_v55 = vsel %vm7891_vm5, %v820_v25, %v8953_v53  ;;  %v832_v17 = vshll.u32 %v8968_v23, 16  ;;  %v1192_v57 = vrot.slane %v8968_v23, 5 }
 0x11c   : > { %v1899_v8 = vpop.permute.xlu0 %1898  ;;  %v8963_v9 = vsel %vm7800_vm2, %v6098_v44, %v1189_v46  ;;  %6924 = vmatpush3.bf16.msra.mxu1 %v7632_v29  ;;  %v9004_v30 = vcombine.low %v811_v43, %v8989_v55  ;;  %v829_v62 = vor.u32 %v828_v5, %v8953_v53 }
 0x11d   : > { %v2381_v47 = vsel %vm2363_vm12, %v2326_v3, %v1899_v8  ;;  %v2079_v58 = vpop.permute.xlu1 %2078  ;;  %v8993_v1 = vcombine.low %v8957_v52, %v8963_v9  ;;  %v836_v3 = vshrl.u32 %v8968_v23, 16  ;;  %6925 = vmatprep.subr.bf16.mxu1 %v7633_v40  ;;  %v834_v48 = vrot.slane %v832_v17, 5 }
 0x11e   : > { %2032 = vrot.lane.b32.xlu0 %v8904_v28, %s7745_s14  ;;  %v2436_v42 = vsel %vm2418_vm13, %v2381_v47, %v1959_v56  ;;  %v1194_v53 = vrot.slane %v1192_v57, 4 }
 0x11f   : > { %1662 = vrot.lane.b32.xlu1 %v8741_v33, %s7740_s9  ;;  %v838_v45 = vrot.slane %v836_v3, 4 }
 0x120   : > { %v2019_v49 = vpop.permute.xlu0 %2018 }
 0x121   : > { %v2491_v33 = vsel %vm2473_vm14, %v2436_v42, %v2019_v49  ;;  %v1649_v13 = vpop.permute.xlu1 %1648  ;;  %v335_v49 = vld [vmem:[%s7807_s29 + $0xdc] sm:$0x1]  ;;  %v839_v7 = vor.u32 %v838_v45, %v834_v48 }
 0x122   : > { %v2546_v6 = vsel %vm2528_vm15, %v2491_v33, %v2079_v58  ;;  %1527 = vrot.lane.b32.xlu0 %v8749_v61, %s7743_s12  ;;  %v842_v10 = vshll.u32 %v335_v49, 16 }
 0x123   : > { %7426 = vmatmul.mubr.msk.bf16.gmra.mrb[32].mxu0 %vm2598_vm0, %v2546_v6  ;;  %1830 = vrot.lane.b32.xlu1 %v6229_v24, %s7744_s13  ;;  %v7637_v24 = vld [vmem:[%s11277_s4 + $0x30] sm:$0xff]   ;;  %v7640_v6 = vld [vmem:[%s11277_s4 + $0x38] sm:$0xff]  }
 0x124   : > { %v1514_v61 = vpop.permute.xlu0 %1513  ;;  %7429 = vmatprep.mubr.msk.bf16.mxu0 %vm7747_vm7, %v11284_v22  ;;  %v844_v31 = vrot.slane %v842_v10, 5 }
 0x125   : > { %v2146_v56 = vsel %vm2116_vm8, %v8236_v19, %v1514_v61  ;;  %v1817_v15 = vpop.permute.xlu1 %1816  ;;  %v7635_v19 = vld [vmem:[%s11277_s4 + $0x28] sm:$0xff]   ;;  %v1191_v61 = vrot.slane %v1189_v46, 4  ;;  %v9040_v46 = vcombine.low %v8914_v21, %v8968_v23 }
 0x126   : > { %1746 = vrot.lane.b32.xlu0 %v6202_v63, %s7738_s30  ;;  %v2218_v8 = vsel %vm2198_vm9, %v2146_v56, %v1649_v13  ;;  %6926 = vmatpush3.bf16.msra.mxu1 %v7635_v19  ;;  %v7639_v13 = vld [vmem:[%s11277_s4 + $0x78] sm:$0xff]   ;;  %v6230_v63 = vcombine.low %v8889_v2, %v811_v43  ;;  %v1195_v56 = vrot.slane %v335_v49, 5  ;;  %v6203_v2 = vcombine.low %v8789_v27, %v8822_v50  ;;  %v9043_v19 = vld [vmem:[%s7807_s29 + $0xe0] sm:$0xf]  ;;  %v9056_v50 = vld [vmem:[%s7807_s29 + $0xe4] sm:$0xf] }
 0x127   : > { %1974 = vrot.lane.b32.xlu1 %v8951_v12, %s7739_s8  ;;  %6927 = vmatprep.subr.bf16.mxu1 %v7636_v34  ;;  %v840_v43 = vrot.slane %v839_v7, 4  ;;  %v850_v34 = vshll.u32 %v9043_v19, 16 }
 0x128   : > { %v1733_v47 = vpop.permute.xlu0 %1732  ;;  %v9051_v27 = vsel %vm7800_vm2, %v1194_v53, %v1195_v56 }
 0x129   : > { %v2273_v58 = vsel %vm2253_vm10, %v2218_v8, %v1733_v47  ;;  %v1961_v37 = vpop.permute.xlu1 %1960  ;;  %v6257_v47 = vcombine.low %v8863_v20, %v8957_v52  ;;  %v9071_v5 = vsel %vm7891_vm5, %v840_v43, %v844_v31  ;;  %v856_v20 = vshll.u32 %v9056_v50, 16 }
 0x12a   : > { %1914 = vrot.lane.b32.xlu0 %v6256_v54, %s7742_s11  ;;  %v2328_v36 = vsel %vm2308_vm11, %v2273_v58, %v1817_v15  ;;  %6928 = vmatpush3.bf16.msra.mxu1 %v7637_v24  ;;  %v830_v54 = vrot.slane %v829_v62, 4  ;;  %v860_v52 = vshrl.u32 %v9056_v50, 16 }
 0x12b   : > { %2094 = vrot.lane.b32.xlu1 %v8993_v1, %s7741_s10  ;;  %6929 = vmatprep.subr.bf16.mxu1 %v7639_v13 }
 0x12c   : > { %v1901_v42 = vpop.permute.xlu0 %1900  ;;  %v835_v58 = vsel %vm7891_vm5, %v830_v54, %v834_v48 }
 0x12d   : > { %v2383_v44 = vsel %vm2363_vm12, %v2328_v36, %v1901_v42  ;;  %v2081_v33 = vpop.permute.xlu1 %2080  ;;  %v9083_v42 = vcombine.low %v835_v58, %v9071_v5 }
 0x12e   : > { %2034 = vrot.lane.b32.xlu0 %v9004_v30, %s7745_s14  ;;  %v2438_v29 = vsel %vm2418_vm13, %v2383_v44, %v1961_v37  ;;  %6930 = vmatpush3.bf16.msra.mxu1 %v7640_v6  ;;  %v847_v37 = vshrl.u32 %v9043_v19, 16  ;;  %v858_v44 = vrot.slane %v856_v20, 5  ;;  %v9089_v6 = vld [vmem:[%s7807_s29 + $0xe8] sm:$0xf] }
 0x12f   : > { %1664 = vrot.lane.b32.xlu1 %v8808_v32, %s7740_s9  ;;  %v866_v53 = vshll.u32 %v9089_v6, 16 }
 0x130   : > { %v2021_v25 = vpop.permute.xlu0 %2020  ;;  %v849_v49 = vrot.slane %v847_v37, 4 }
 0x131   : > { %v2493_v15 = vsel %vm2473_vm14, %v2438_v29, %v2021_v25  ;;  %v1651_v40 = vpop.permute.xlu1 %1650  ;;  %v6231_v25 = vcombine.low %v8989_v55, %v835_v58 }
 0x132   : > { %v2548_v32 = vsel %vm2528_vm15, %v2493_v15, %v2081_v33  ;;  %1529 = vrot.lane.b32.xlu0 %v8816_v11, %s7743_s12  ;;  %v9047_v11 = vsel %vm7800_vm2, %v1191_v61, %v1192_v57  ;;  %v852_v57 = vrot.slane %v850_v34, 5  ;;  %v862_v33 = vrot.slane %v860_v52, 4 }
 0x133   : > { %7430 = vmatmul.mubr.msk.bf16.gmra.mrb[36].mxu0 %vm2598_vm0, %v2548_v32  ;;  %1832 = vrot.lane.b32.xlu1 %v6230_v63, %s7744_s13  ;;  %v1199_v63 = vrot.slane %v9056_v50, 5  ;;  %v6258_v34 = vcombine.low %v8963_v9, %v9047_v11  ;;  %v870_v52 = vshrl.u32 %v9089_v6, 16 }
 0x134   : > { %v1516_v17 = vpop.permute.xlu0 %1515  ;;  %7433 = vmatprep.mubr.msk.bf16.mxu0 %vm7747_vm7, %v11284_v22  ;;  %v853_v29 = vor.u32 %v852_v57, %v849_v49  ;;  %v863_v61 = vor.u32 %v862_v33, %v858_v44 }
 0x135   : > { %v2149_v3 = vsel %vm2116_vm8, %v8293_v18, %v1516_v17  ;;  %v1819_v8 = vpop.permute.xlu1 %1818  ;;  %v9075_v18 = vcombine.low %v9047_v11, %v9051_v27  ;;  %v1201_v32 = vrot.slane %v1199_v63, 4  ;;  %v9112_v17 = vcombine.low %v9043_v19, %v9056_v50 }
 0x136   : > { %1748 = vrot.lane.b32.xlu0 %v6203_v2, %s7738_s30  ;;  %v2220_v24 = vsel %vm2198_vm9, %v2149_v3, %v1651_v40  ;;  %v6099_v40 = vrot.slane %v9043_v19, 9  ;;  %v1202_v2 = vrot.slane %v9089_v6, 5  ;;  %v854_v55 = vrot.slane %v853_v29, 4 }
 0x137   : > { %1976 = vrot.lane.b32.xlu1 %v9040_v46, %s7739_s8  ;;  %v864_v3 = vrot.slane %v863_v61, 4 }
 0x138   : > { %v1735_v48 = vpop.permute.xlu0 %1734  ;;  %v9116_v58 = vsel %vm7800_vm2, %v6099_v40, %v1199_v63  ;;  %v859_v20 = vsel %vm7891_vm5, %v854_v55, %v858_v44  ;;  %v872_v44 = vrot.slane %v870_v52, 4 }
 0x139   : > { %v2275_v45 = vsel %vm2253_vm10, %v2220_v24, %v1735_v48  ;;  %v1963_v36 = vpop.permute.xlu1 %1962  ;;  %v6232_v61 = vcombine.low %v9071_v5, %v859_v20 }
 0x13a   : > { %1916 = vrot.lane.b32.xlu0 %v6257_v47, %s7742_s11  ;;  %v2330_v13 = vsel %vm2308_vm11, %v2275_v45, %v1819_v8  ;;  %v868_v8 = vrot.slane %v866_v53, 5 }
 0x13b   : > { %2096 = vrot.lane.b32.xlu1 %v9075_v18, %s7741_s10 }
 0x13c   : > { %v1903_v62 = vpop.permute.xlu0 %1902  ;;  %v9139_v24 = vsel %vm7891_vm5, %v864_v3, %v868_v8  ;;  %v873_v53 = vor.u32 %v872_v44, %v868_v8 }
 0x13d   : > { %v2385_v7 = vsel %vm2363_vm12, %v2330_v13, %v1903_v62  ;;  %v2083_v10 = vpop.permute.xlu1 %2082  ;;  %v9151_v57 = vcombine.low %v859_v20, %v9139_v24  ;;  %v9183_v20 = vld [vmem:[%s7807_s29 + $0xf8] sm:$0xf] }
 0x13e   : > { %2036 = vrot.lane.b32.xlu0 %v9083_v42, %s7745_s14  ;;  %v2440_v56 = vsel %vm2418_vm13, %v2385_v7, %v1963_v36  ;;  %v339_v7 = vld [vmem:[%s7807_s29 + $0xec] sm:$0x1] }
 0x13f   : > { %1666 = vrot.lane.b32.xlu1 %v8893_v4, %s7740_s9  ;;  %v6204_v4 = vcombine.low %v8868_v14, %v8914_v21  ;;  %v9125_v14 = vld [vmem:[%s7807_s29 + $0xf0] sm:$0xf] }
 0x140   : > { %v2023_v15 = vpop.permute.xlu0 %2022  ;;  %v881_v9 = vshrl.u32 %v9125_v14, 16  ;;  %v884_v11 = vshll.u32 %v9125_v14, 16 }
 0x141   : > { %v2495_v54 = vsel %vm2473_vm14, %v2440_v56, %v2023_v15  ;;  %v1653_v43 = vpop.permute.xlu1 %1652  ;;  %v876_v56 = vshll.u32 %v339_v7, 16 }
 0x142   : > { %v2550_v31 = vsel %vm2528_vm15, %v2495_v54, %v2083_v10  ;;  %1531 = vrot.lane.b32.xlu0 %v8904_v28, %s7743_s12  ;;  %v9120_v28 = vsel %vm7800_vm2, %v1201_v32, %v1202_v2  ;;  %v883_v33 = vrot.slane %v881_v9, 4  ;;  %v886_v13 = vrot.slane %v884_v11, 5  ;;  %v9158_v10 = vld [vmem:[%s7807_s29 + $0xf4] sm:$0xf] }
 0x143   : > { %7434 = vmatmul.mubr.msk.bf16.gmra.mrb[40].mxu0 %vm2598_vm0, %v2550_v31  ;;  %1834 = vrot.lane.b32.xlu1 %v6231_v25, %s7744_s13  ;;  %v890_v40 = vshll.u32 %v9158_v10, 16  ;;  %v1204_v32 = vrot.slane %v1202_v2, 4  ;;  %v1205_v31 = vrot.slane %v339_v7, 5  ;;  %v1209_v55 = vrot.slane %v9158_v10, 5 }
 0x144   : > { %v1518_v47 = vpop.permute.xlu0 %1517  ;;  %7437 = vmatprep.mubr.msk.bf16.mxu0 %vm7747_vm7, %v11284_v22  ;;  %v887_v15 = vor.u32 %v886_v13, %v883_v33  ;;  %v9178_v2 = vcombine.low %v9089_v6, %v9125_v14  ;;  %v6259_v11 = vcombine.low %v9051_v27, %v9116_v58 }
 0x145   : > { %v2152_v21 = vsel %vm2116_vm8, %v8369_v41, %v1518_v47  ;;  %v1821_v37 = vpop.permute.xlu1 %1820  ;;  %v9143_v41 = vcombine.low %v9116_v58, %v9120_v28  ;;  %v874_v47 = vrot.slane %v873_v53, 4 }
 0x146   : > { %1750 = vrot.lane.b32.xlu0 %v6204_v4, %s7738_s30  ;;  %v2222_v48 = vsel %vm2198_vm9, %v2152_v21, %v1653_v43  ;;  %v6100_v4 = vrot.slane %v9125_v14, 9  ;;  %v878_v21 = vrot.slane %v876_v56, 5 }
 0x147   : > { %1978 = vrot.lane.b32.xlu1 %v9112_v17, %s7739_s8 }
 0x148   : > { %v1737_v45 = vpop.permute.xlu0 %1736 }
 0x149   : > { %v2277_v36 = vsel %vm2253_vm10, %v2222_v48, %v1737_v45  ;;  %v1965_v49 = vpop.permute.xlu1 %1964  ;;  %v894_v48 = vshrl.u32 %v9158_v10, 16  ;;  %v900_v45 = vshll.u32 %v9183_v20, 16 }
 0x14a   : > { %1918 = vrot.lane.b32.xlu0 %v6258_v34, %s7742_s11  ;;  %v2332_v62 = vsel %vm2308_vm11, %v2277_v36, %v1821_v37  ;;  %v888_v37 = vrot.slane %v887_v15, 4  ;;  %v892_v34 = vrot.slane %v890_v40, 5  ;;  %v904_v36 = vshrl.u32 %v9183_v20, 16 }
 0x14b   : > { %2098 = vrot.lane.b32.xlu1 %v9143_v41, %s7741_s10  ;;  %v902_v7 = vrot.slane %v900_v45, 5 }
 0x14c   : > { %v1905_v63 = vpop.permute.xlu0 %1904 }
 0x14d   : > { %v2387_v29 = vsel %vm2363_vm12, %v2332_v62, %v1905_v63  ;;  %v2085_v25 = vpop.permute.xlu1 %2084  ;;  %v896_v63 = vrot.slane %v894_v48, 4 }
 0x14e   : > { %2038 = vrot.lane.b32.xlu0 %v9151_v57, %s7745_s14  ;;  %v2442_v54 = vsel %vm2418_vm13, %v2387_v29, %v1965_v49  ;;  %v879_v49 = vsel %vm7891_vm5, %v874_v47, %v878_v21  ;;  %v906_v29 = vrot.slane %v904_v36, 4 }
 0x14f   : > { %1668 = vrot.lane.b32.xlu1 %v8993_v1, %s7740_s9  ;;  %v6205_v1 = vcombine.low %v8968_v23, %v9043_v19  ;;  %v9191_v23 = vsel %vm7800_vm2, %v6100_v4, %v1209_v55  ;;  %v1211_v4 = vrot.slane %v1209_v55, 4 }
 0x150   : > { %v2025_v43 = vpop.permute.xlu0 %2024 }
 0x151   : > { %v2497_v5 = vsel %vm2473_vm14, %v2442_v54, %v2025_v43  ;;  %v1655_v3 = vpop.permute.xlu1 %1654  ;;  %v907_v54 = vor.u32 %v906_v29, %v902_v7 }
 0x152   : > { %v2552_v8 = vsel %vm2528_vm15, %v2497_v5, %v2085_v25  ;;  %1533 = vrot.lane.b32.xlu0 %v9004_v30, %s7743_s12  ;;  %v9187_v30 = vsel %vm7800_vm2, %v1204_v32, %v1205_v31  ;;  %v343_v25 = vld [vmem:[%s7807_s29 + $0xfc] sm:$0x1]  ;;  %v897_v32 = vor.u32 %v896_v63, %v892_v34  ;;  %v6233_v31 = vcombine.low %v9139_v24, %v879_v49 }
 0x153   : > { %7438 = vmatmul.mubr.msk.bf16.gmra.mrb[44].mxu0 %vm2598_vm0, %v2552_v8  ;;  %1836 = vrot.lane.b32.xlu1 %v6232_v61, %s7744_s13  ;;  %v9213_v27 = vcombine.low %v9187_v30, %v9191_v23  ;;  %v1212_v61 = vrot.slane %v9183_v20, 5  ;;  %v910_v43 = vshll.u32 %v343_v25, 16  ;;  %v908_v24 = vrot.slane %v907_v54, 4 }
 0x154   : > { %v1520_v52 = vpop.permute.xlu0 %1519  ;;  %7441 = vmatprep.mubr.msk.bf16.mxu0 %vm7747_vm7, %v11284_v22  ;;  %v6260_v45 = vcombine.low %v9120_v28, %v9187_v30 }
 0x155   : > { %v2155_v19 = vsel %vm2116_vm8, %v8440_v26, %v1520_v52  ;;  %v1823_v9 = vpop.permute.xlu1 %1822  ;;  %v9209_v26 = vsel %vm7891_vm5, %v888_v37, %v892_v34  ;;  %v1214_v5 = vrot.slane %v1212_v61, 4  ;;  %v6206_v37 = vcombine.low %v9056_v50, %v9089_v6  ;;  %v9256_v6 = vld [vmem:[%s7807_s29 + $0x100] sm:$0xf] }
 0x156   : > { %1752 = vrot.lane.b32.xlu0 %v6205_v1, %s7738_s30  ;;  %v2224_v58 = vsel %vm2198_vm9, %v2155_v19, %v1655_v3  ;;  %v9219_v62 = vcombine.low %v879_v49, %v9209_v26  ;;  %v1215_v3 = vrot.slane %v343_v25, 5  ;;  %v912_v55 = vrot.slane %v910_v43, 5 }
 0x157   : > { %1980 = vrot.lane.b32.xlu1 %v9178_v2, %s7739_s8  ;;  %v9243_v52 = vcombine.low %v9158_v10, %v9183_v20  ;;  %v9247_v19 = vsel %vm7800_vm2, %v1211_v4, %v1212_v61 }
 0x158   : > { %v1739_v44 = vpop.permute.xlu0 %1738  ;;  %v9251_v50 = vsel %vm7800_vm2, %v1214_v5, %v1215_v3  ;;  %v9270_v49 = vsel %vm7891_vm5, %v908_v24, %v912_v55 }
 0x159   : > { %v2279_v33 = vsel %vm2253_vm10, %v2224_v58, %v1739_v44  ;;  %v1967_v13 = vpop.permute.xlu1 %1966  ;;  %v9274_v58 = vcombine.low %v9247_v19, %v9251_v50  ;;  %v918_v44 = vshll.u32 %v9256_v6, 16 }
 0x15a   : > { %1920 = vrot.lane.b32.xlu0 %v6259_v11, %s7742_s11  ;;  %v2334_v53 = vsel %vm2308_vm11, %v2279_v33, %v1823_v9  ;;  %v9259_v9 = vld [vmem:[%s7807_s29 + $0x104] sm:$0xf] }
 0x15b   : > { %2100 = vrot.lane.b32.xlu1 %v9213_v27, %s7741_s10  ;;  %v924_v28 = vshll.u32 %v9259_v9, 16  ;;  %v928_v30 = vshrl.u32 %v9259_v9, 16  ;;  %v920_v61 = vrot.slane %v918_v44, 5  ;;  %v1219_v54 = vrot.slane %v9259_v9, 5 }
 0x15c   : > { %v1907_v56 = vpop.permute.xlu0 %1906  ;;  %v9315_v55 = vcombine.low %v9256_v6, %v9259_v9 }
 0x15d   : > { %v2389_v15 = vsel %vm2363_vm12, %v2334_v53, %v1907_v56  ;;  %v2087_v40 = vpop.permute.xlu1 %2086  ;;  %v926_v53 = vrot.slane %v924_v28, 5  ;;  %v930_v56 = vrot.slane %v928_v30, 4  ;;  %v9345_v28 = vld [vmem:[%s11276_s3] ss:$0 sm:$0xff] }
 0x15e   : > { %2040 = vrot.lane.b32.xlu0 %v9219_v62, %s7745_s14  ;;  %v2444_v8 = vsel %vm2418_vm13, %v2389_v15, %v1967_v13 }
 0x15f   : > { %1670 = vrot.lane.b32.xlu1 %v9075_v18, %s7740_s9  ;;  %v898_v18 = vrot.slane %v897_v32, 4  ;;  %v9292_v32 = vld [vmem:[%s7807_s29 + $0x108] sm:$0xf]  ;;  %v931_v3 = vor.u32 %v930_v56, %v926_v53 }
 0x160   : > { %v2027_v1 = vpop.permute.xlu0 %2026 }
 0x161   : > { %v2499_v47 = vsel %vm2473_vm14, %v2444_v8, %v2027_v1  ;;  %v1657_v21 = vpop.permute.xlu1 %1656  ;;  %v903_v36 = vsel %vm7891_vm5, %v898_v18, %v902_v7  ;;  %v934_v8 = vshll.u32 %v9292_v32, 16 }
 0x162   : > { %v2554_v34 = vsel %vm2528_vm15, %v2499_v47, %v2087_v40  ;;  %1535 = vrot.lane.b32.xlu0 %v9083_v42, %s7743_s12  ;;  %v9286_v29 = vcombine.low %v903_v36, %v9270_v49  ;;  %v6234_v4 = vcombine.low %v9209_v26, %v903_v36  ;;  %v6207_v26 = vcombine.low %v9125_v14, %v9158_v10 }
 0x163   : > { %7442 = vmatmul.mubr.msk.bf16.gmra.mrb[48].mxu0 %vm2598_vm0, %v2554_v34  ;;  %1838 = vrot.lane.b32.xlu1 %v6233_v31, %s7744_s13  ;;  %v1222_v34 = vrot.slane %v9292_v32, 5 }
 0x164   : > { %v1522_v42 = vpop.permute.xlu0 %1521  ;;  %7445 = vmatprep.mubr.msk.bf16.mxu0 %vm7747_vm7, %v11284_v22 }
 0x165   : > { %v2158_v11 = vsel %vm2116_vm8, %v8507_v38, %v1522_v42  ;;  %v1825_v48 = vpop.permute.xlu1 %1824  ;;  %v915_v38 = vshrl.u32 %v9256_v6, 16 }
 0x166   : > { %1754 = vrot.lane.b32.xlu0 %v6206_v37, %s7738_s30  ;;  %v2226_v33 = vsel %vm2198_vm9, %v2158_v11, %v1657_v21  ;;  %v6101_v21 = vrot.slane %v9256_v6, 9  ;;  %v1221_v37 = vrot.slane %v1219_v54, 4  ;;  %v932_v11 = vrot.slane %v931_v3, 4 }
 0x167   : > { %1982 = vrot.lane.b32.xlu1 %v9243_v52, %s7739_s8  ;;  %v917_v25 = vrot.slane %v915_v38, 4 }
 0x168   : > { %v1741_v13 = vpop.permute.xlu0 %1740  ;;  %v9329_v14 = vsel %vm7800_vm2, %v6101_v21, %v1219_v54  ;;  %v9335_v10 = vsel %vm7800_vm2, %v1221_v37, %v1222_v34  ;;  %v347_v21 = vld [vmem:[%s7807_s29 + $0x10c] sm:$0x1]  ;;  %v9379_v37 = vld [vmem:[%s7807_s29 + $0x114] sm:$0xf] }
 0x169   : > { %v2281_v63 = vsel %vm2253_vm10, %v2226_v33, %v1741_v13  ;;  %v1969_v7 = vpop.permute.xlu1 %1968  ;;  %v921_v5 = vor.u32 %v920_v61, %v917_v25  ;;  %v6261_v33 = vcombine.low %v9191_v23, %v9247_v19  ;;  %v938_v13 = vshrl.u32 %v9292_v32, 16 }
 0x16a   : > { %1922 = vrot.lane.b32.xlu0 %v6260_v45, %s7742_s11  ;;  %v2336_v15 = vsel %vm2308_vm11, %v2281_v63, %v1825_v48  ;;  %v9317_v48 = vrot.slane %v934_v8, 5  ;;  %v9320_v45 = vld [vmem:[%s7807_s29 + $0x110] sm:$0xf]  ;;  %v9364_v23 = vcombine.low %v9329_v14, %v9335_v10 }
 0x16b   : > { %2102 = vrot.lane.b32.xlu1 %v9274_v58, %s7741_s10  ;;  %v922_v42 = vrot.slane %v921_v5, 4  ;;  %v949_v63 = vshrl.u32 %v9320_v45, 16  ;;  %v940_v3 = vrot.slane %v938_v13, 4  ;;  %v958_v13 = vshll.u32 %v9379_v37, 16 }
 0x16c   : > { %v1909_v40 = vpop.permute.xlu0 %1908  ;;  %v9360_v56 = vsel %vm7891_vm5, %v932_v11, %v9317_v48 }
 0x16d   : > { %v2391_v43 = vsel %vm2363_vm12, %v2336_v15, %v1909_v40  ;;  %v2089_v31 = vpop.permute.xlu1 %2088  ;;  %v927_v61 = vsel %vm7891_vm5, %v922_v42, %v926_v53  ;;  %v951_v8 = vrot.slane %v949_v63, 4 }
 0x16e   : > { %2042 = vrot.lane.b32.xlu0 %v9286_v29, %s7745_s14  ;;  %v2446_v1 = vsel %vm2418_vm13, %v2391_v43, %v1969_v7  ;;  %v952_v7 = vshll.u32 %v9320_v45, 16  ;;  %v9372_v5 = vcombine.low %v927_v61, %v9360_v56 }
 0x16f   : > { %1672 = vrot.lane.b32.xlu1 %v9143_v41, %s7740_s9 }
 0x170   : > { %v2029_v47 = vpop.permute.xlu0 %2028 }
 0x171   : > { %v2501_v18 = vsel %vm2473_vm14, %v2446_v1, %v2029_v47  ;;  %v1659_v24 = vpop.permute.xlu1 %1658  ;;  %v954_v1 = vrot.slane %v952_v7, 5  ;;  %v1225_v7 = vrot.slane %v347_v21, 5 }
 0x172   : > { %v2556_v41 = vsel %vm2528_vm15, %v2501_v18, %v2089_v31  ;;  %1537 = vrot.lane.b32.xlu0 %v9151_v57, %s7743_s12  ;;  %v9325_v57 = vld [vmem:[%s11275_s2] ss:$0 sm:$0xff] }
 0x173   : > { %7446 = vmatmul.mubr.msk.bf16.gmra.mrb[52].mxu0 %vm2598_vm0, %v2556_v41  ;;  %1840 = vrot.lane.b32.xlu1 %v6234_v4, %s7744_s13 }
 0x174   : > { %v1524_v36 = vpop.permute.xlu0 %1523  ;;  %7449 = vmatprep.mubr.msk.bf16.mxu0 %vm7747_vm7, %v11284_v22 }
 0x175   : > { %v2161_v38 = vsel %vm2116_vm8, %v8573_v16, %v1524_v36  ;;  %v1827_v44 = vpop.permute.xlu1 %1826  ;;  %v6235_v36 = vcombine.low %v9270_v49, %v927_v61 }
 0x176   : > { %1756 = vrot.lane.b32.xlu0 %v6207_v26, %s7738_s30  ;;  %v2691_v30 = vpop.f32.mrb[0].mxu0  ;;  %v2228_v19 = vsel %vm2198_vm9, %v2161_v38, %v1659_v24  ;;  %v941_v38 = vor.u32 %v940_v3, %v9317_v48  ;;  %v1229_v48 = vrot.slane %v9379_v37, 5 }
 0x177   : > { %v2912_v16 = vmul.f32 %v9325_v57, %v2691_v30  ;;  %v7395_v25 = vpop.f32.mrb[1].mxu0  ;;  %1984 = vrot.lane.b32.xlu1 %v9315_v55, %s7739_s8  ;;  %v944_v30 = vshll.u32 %v347_v21, 16 }
 0x178   : > { %v1743_v15 = vpop.permute.xlu0 %1742  ;;  %v2694_v40 = vpop.f32.mrb[2].mxu0  ;;  %v6102_v25 = vrot.slane %v9320_v45, 9 }
 0x179   : > { %v2972_v54 = vadd.f32 %v9345_v28, %v2912_v16  ;;  %v2283_v43 = vsel %vm2253_vm10, %v2228_v19, %v1743_v15  ;;  %v2913_v53 = vmul.f32 %v9325_v57, %v2694_v40  ;;  %v7396_v31 = vpop.f32.mrb[3].mxu0  ;;  %v1971_v4 = vpop.permute.xlu1 %1970  ;;  %v9397_v15 = vld [vmem:[%s7807_s29 + $0x118] sm:$0xf]  ;;  %v6208_v40 = vcombine.low %v9183_v20, %v9256_v6 }
 0x17a   : > { %1924 = vrot.lane.b32.xlu0 %v6261_v33, %s7742_s11  ;;  %v2338_v18 = vsel %vm2308_vm11, %v2283_v43, %v1827_v44  ;;  %v955_v33 = vor.u32 %v954_v1, %v951_v8  ;;  %v1224_v44 = vrot.slane %v1222_v34, 4  ;;  %v942_v43 = vrot.slane %v941_v38, 4 }
 0x17b   : > { %v2973_v47 = vadd.f32 %v9345_v28, %v2913_v53  ;;  %2104 = vrot.lane.b32.xlu1 %v9364_v23, %s7741_s10  ;;  %v3026_v41 = vmax.f32 %v2972_v54, 0.0  ;;  %v9407_v54 = vcombine.low %v9292_v32, %v9320_v45  ;;  %v946_v53 = vrot.slane %v944_v30, 5 }
 0x17c   : > { %v1911_v24 = vpop.permute.xlu0 %1910  ;;  %v956_v31 = vrot.slane %v955_v33, 4  ;;  %v9415_v3 = vsel %vm7800_vm2, %v1224_v44, %v1225_v7  ;;  %v9421_v20 = vsel %vm7800_vm2, %v6102_v25, %v1229_v48  ;;  %v962_v6 = vshrl.u32 %v9379_v37, 16 }
 0x17d   : > { %v3027_v26 = vmax.f32 %v2973_v47, 0.0  ;;  %v2393_v42 = vsel %vm2363_vm12, %v2338_v18, %v1911_v24  ;;  %v2091_v11 = vpop.permute.xlu1 %2090  ;;  %v968_v8 = vshll.u32 %v9397_v15, 16  ;;  %v972_v1 = vshrl.u32 %v9397_v15, 16 }
 0x17e   : > { %2044 = vrot.lane.b32.xlu0 %v9372_v5, %s7745_s14  ;;  %v2448_v49 = vsel %vm2418_vm13, %v2393_v42, %v1971_v4  ;;  %v9411_v4 = vrot.slane %v958_v13, 5  ;;  %v964_v33 = vrot.slane %v962_v6, 4  ;;  %v6209_v6 = vcombine.low %v9259_v9, %v9292_v32 }
 0x17f   : > { %v6632_v63 = vpack.c.bf16 %v3027_v26, %v3026_v41  ;;  %1674 = vrot.lane.b32.xlu1 %v9213_v27, %s7740_s9  ;;  %v11281_v27 = vmov 0   ;;  %v6262_v41 = vcombine.low %v9251_v50, %v9329_v14  ;;  %v9456_v13 = vrot.slane %v968_v8, 5 }
 0x180   : > { %v2031_v16 = vpop.permute.xlu0 %2030  ;;  %v965_v8 = vor.u32 %v964_v33, %v9411_v4 }
 0x181   : > { %6633 = vst [vmem:[#allocation2] sm:$0xff] %v6632_v63   ;;  %v2503_v61 = vsel %vm2473_vm14, %v2448_v49, %v2031_v16  ;;  %v1661_v19 = vpop.permute.xlu1 %1660  ;;  %v974_v63 = vrot.slane %v972_v1, 4 }
 0x182   : > { %3483 = vst [vmem:[#allocation2 + $0x4] sm:$0xf] %v11281_v27  ;;  %v2558_v34 = vsel %vm2528_vm15, %v2503_v61, %v2091_v11  ;;  %1539 = vrot.lane.b32.xlu0 %v9219_v62, %s7743_s12  ;;  %v9449_v11 = vsel %vm7891_vm5, %v956_v31, %v9411_v4 }
 0x183   : > { %7450 = vmatmul.mubr.msk.bf16.gmra.mrb[56].mxu0 %vm2598_vm0, %v2558_v34  ;;  %1842 = vrot.lane.b32.xlu1 %v6235_v36, %s7744_s13  ;;  %v9453_v36 = vcombine.low %v9415_v3, %v9421_v20 }
 0x184   : > { %v1526_v62 = vpop.permute.xlu0 %1525  ;;  %7453 = vmatprep.mubr.msk.bf16.mxu0 %vm7747_vm7, %v11284_v22 }
 0x185   : > { %v2164_v47 = vsel %vm2116_vm8, %v8642_v60, %v1526_v62  ;;  %v1829_v21 = vpop.permute.xlu1 %1828  ;;  %v9444_v60 = vsel %vm7891_vm5, %v942_v43, %v946_v53  ;;  %v1232_v43 = vrot.slane %v9397_v15, 5  ;;  %v9475_v53 = vld [vmem:[%s7807_s29 + $0x120] sm:$0xf] }
 0x186   : > { %v2699_v24 = vpop.f32.mrb[4].mxu0  ;;  %1758 = vrot.lane.b32.xlu0 %v6208_v40, %s7738_s30  ;;  %v2230_v14 = vsel %vm2198_vm9, %v2164_v47, %v1661_v19  ;;  %v9466_v19 = vcombine.low %v9444_v60, %v9449_v11  ;;  %v351_v40 = vld [vmem:[%s7807_s29 + $0x11c] sm:$0x1]  ;;  %v1238_v9 = vshrl.u32 %v9475_v53, 16  ;;  %v1241_v32 = vshll.u32 %v9475_v53, 16 }
 0x187   : > { %v2914_v26 = vmul.f32 %v9325_v57, %v2699_v24  ;;  %v7399_v42 = vpop.f32.mrb[5].mxu0  ;;  %1986 = vrot.lane.b32.xlu1 %v9407_v54, %s7739_s8 }
 0x188   : > { %v3371_v50 = vld [vmem:[#allocation2] sm:$0x1]  ;;  %v2702_v38 = vpop.f32.mrb[6].mxu0  ;;  %v1745_v30 = vpop.permute.xlu0 %1744  ;;  %v9484_v42 = vld [vmem:[%s7807_s29 + $0x124] sm:$0xf] }
 0x189   : > { %v3372_v44 = vsel %vm9432_vm4, 0, %v3371_v50  ;;  %v2974_v7 = vadd.f32 %v9345_v28, %v2914_v26  ;;  %v2915_v49 = vmul.f32 %v9325_v57, %v2702_v38  ;;  %v2285_v16 = vsel %vm2253_vm10, %v2230_v14, %v1745_v30  ;;  %v7400_v25 = vpop.f32.mrb[7].mxu0  ;;  %v1973_v61 = vpop.permute.xlu1 %1972 }
 0x18a   : > { %3373 = vst [vmem:[#allocation2] sm:$0x1] %v3372_v44  ;;  %1926 = vrot.lane.b32.xlu0 %v6262_v41, %s7742_s11  ;;  %v2340_v31 = vsel %vm2308_vm11, %v2285_v16, %v1829_v21  ;;  %v975_v26 = vor.u32 %v974_v63, %v9456_v13  ;;  %v6236_v21 = vcombine.low %v9360_v56, %v9444_v60  ;;  %v978_v50 = vshll.u32 %v351_v40, 16 }
 0x18b   : > { %3482 = vst [vmem:[#allocation2] sm:$0xf] %v11281_v27  ;;  %v2975_v34 = vadd.f32 %v9345_v28, %v2915_v49  ;;  %2106 = vrot.lane.b32.xlu1 %v9453_v36, %s7741_s10  ;;  %v3028_v1 = vmax.f32 %v2974_v7, 0.0  ;;  %v1231_v14 = vrot.slane %v1229_v48, 4  ;;  %v1234_v38 = vrot.slane %v1232_v43, 4 }
 0x18c   : > { %v1913_v62 = vpop.permute.xlu0 %1912  ;;  %v1235_v30 = vrot.slane %v351_v40, 5  ;;  %v1247_v56 = vshll.u32 %v9484_v42, 16  ;;  %v1251_v60 = vshrl.u32 %v9484_v42, 16  ;;  %v976_v49 = vrot.slane %v975_v26, 4 }
 0x18d   : > { %v3029_v47 = vmax.f32 %v2975_v34, 0.0  ;;  %v2395_v24 = vsel %vm2363_vm12, %v2340_v31, %v1913_v62  ;;  %v2093_v41 = vpop.permute.xlu1 %2092  ;;  %v980_v16 = vrot.slane %v978_v50, 5  ;;  %v1240_v25 = vrot.slane %v1238_v9, 4  ;;  %v9520_v62 = vld [vmem:[%s7807_s29 + $0x128] sm:$0xf] }
 0x18e   : > { %2046 = vrot.lane.b32.xlu0 %v9466_v19, %s7745_s14  ;;  %v2450_v33 = vsel %vm2418_vm13, %v2395_v24, %v1973_v61  ;;  %v1243_v61 = vrot.slane %v1241_v32, 5  ;;  %v9509_v40 = vcombine.low %v9379_v37, %v9397_v15  ;;  %v9513_v31 = vsel %vm7800_vm2, %v1231_v14, %v1232_v43  ;;  %v7716_v32 = vld [vmem:[%s11277_s4 + $0x1b8] sm:$0xff]  }
 0x18f   : > { %v6637_v4 = vpack.c.bf16 %v3029_v47, %v3028_v1  ;;  %1676 = vrot.lane.b32.xlu1 %v9274_v58, %s7740_s9  ;;  %v966_v58 = vrot.slane %v965_v8, 4  ;;  %v9525_v47 = vrot.slane %v1247_v56, 5  ;;  %v1253_v24 = vrot.slane %v1251_v60, 4 }
 0x190   : > { %v2033_v63 = vpop.permute.xlu0 %2032  ;;  %v6263_v50 = vcombine.low %v9335_v10, %v9415_v3  ;;  %v1244_v3 = vor.u32 %v1243_v61, %v1240_v25 }
 0x191   : > { %6844 = vst [vmem:[#allocation2 + $0x8] sm:$0xff] %v6637_v4   ;;  %v2505_v44 = vsel %vm2473_vm14, %v2450_v33, %v2033_v63  ;;  %v1663_v7 = vpop.permute.xlu1 %1662  ;;  %v9537_v9 = vsel %vm7891_vm5, %v966_v58, %v9456_v13  ;;  %v1257_v13 = vshll.u32 %v9520_v62, 16 }
 0x192   : > { %v2560_v48 = vsel %vm2528_vm15, %v2505_v44, %v2093_v41  ;;  %1541 = vrot.lane.b32.xlu0 %v9286_v29, %s7743_s12  ;;  %v9503_v34 = vld [vmem:[#allocation2] sm:$0xf]  ;;  %v9517_v29 = vsel %vm7800_vm2, %v1234_v38, %v1235_v30  ;;  %v9527_v41 = vld [vmem:[#allocation2 + $0x4] sm:$0xf] }
 0x193   : > { %7454 = vmatmul.mubr.msk.bf16.gmra.mrb[60].mxu0 %vm2598_vm0, %v2560_v48  ;;  %1844 = vrot.lane.b32.xlu1 %v6236_v21, %s7744_s13  ;;  %v3690_v8 = vshrl.u32 %v9503_v34, 16  ;;  %v3693_v43 = vshll.u32 %v9503_v34, 16  ;;  %v9552_v10 = vcombine.low %v9513_v31, %v9517_v29  ;;  %v3703_v33 = vshrl.u32 %v9527_v41, 16 }
 0x194   : > { %v1528_v1 = vpop.permute.xlu0 %1527  ;;  %7457 = vmatprep.mubr.msk.bf16.mxu0 %vm7747_vm7, %v11284_v22 }
 0x195   : > { %v2167_v26 = vsel %vm2116_vm8, %v8710_v59, %v1528_v1  ;;  %v1831_v21 = vpop.permute.xlu1 %1830  ;;  %v9548_v59 = vsel %vm7891_vm5, %v976_v49, %v980_v16  ;;  %v3692_v30 = vrot.slane %v3690_v8, 4  ;;  %v1254_v49 = vor.u32 %v1253_v24, %v9525_v47 }
 0x196   : > { %v2707_v4 = vpop.f32.mrb[8].mxu0  ;;  %1760 = vrot.lane.b32.xlu0 %v6209_v6, %s7738_s30  ;;  %v3699_v6 = vshll.u32 %v9527_v41, 16  ;;  %v2232_v60 = vsel %vm2198_vm9, %v2167_v26, %v1663_v7  ;;  %v3695_v48 = vrot.slane %v3693_v43, 5  ;;  %v9572_v24 = vcombine.low %v9537_v9, %v9548_v59 }
 0x197   : > { %v2916_v14 = vmul.f32 %v9325_v57, %v2707_v4  ;;  %v7403_v38 = vpop.f32.mrb[9].mxu0  ;;  %1988 = vrot.lane.b32.xlu1 %v9509_v40, %s7739_s8  ;;  %v1277_v43 = vrot.slane %v9484_v42, 5 }
 0x198   : > { %v3374_v63 = vld [vmem:[#allocation2 + $0xc] sm:$0x1]  ;;  %v3428_v56 = vld [vmem:[#allocation2 + $0x8] sm:$0xf]  ;;  %v2710_v44 = vpop.f32.mrb[10].mxu0  ;;  %v1747_v58 = vpop.permute.xlu0 %1746  ;;  %v9579_v38 = vrot.slane %v3699_v6, 5 }
 0x199   : > { %v3375_v16 = vsel %vm9432_vm4, 0, %v3374_v63  ;;  %v3429_v25 = vsel %vm9541_vm3, 0, %v3428_v56  ;;  %v2976_v61 = vadd.f32 %v9345_v28, %v2916_v14  ;;  %v2917_v8 = vmul.f32 %v9325_v57, %v2710_v44  ;;  %v7404_v1 = vpop.f32.mrb[11].mxu0  ;;  %v1975_v4 = vpop.permute.xlu1 %1974 }
 0x19a   : > { %3376 = vst [vmem:[#allocation2 + $0xc] sm:$0x1] %v3375_v16  ;;  %3430 = vst [vmem:[#allocation2 + $0x8] sm:$0xf] %v3429_v25  ;;  %v2287_v7 = vsel %vm2253_vm10, %v2232_v60, %v1747_v58  ;;  %1928 = vrot.lane.b32.xlu0 %v6263_v50, %s7742_s11  ;;  %v1245_v14 = vrot.slane %v1244_v3, 4  ;;  %v3705_v63 = vrot.slane %v3703_v33, 4  ;;  %v6210_v3 = vcombine.low %v9320_v45, %v9379_v37 }
 0x19b   : > { %3484 = vst [vmem:[#allocation2 + $0x8] sm:$0xf] %v11281_v27  ;;  %v2977_v26 = vadd.f32 %v9345_v28, %v2917_v8  ;;  %2108 = vrot.lane.b32.xlu1 %v9552_v10, %s7741_s10  ;;  %v2342_v56 = vsel %vm2308_vm11, %v2287_v7, %v1831_v21  ;;  %v1255_v60 = vrot.slane %v1254_v49, 4  ;;  %v9582_v44 = vrot.slane %v1257_v13, 5 }
 0x19c   : > { %v1915_v50 = vpop.permute.xlu0 %1914  ;;  %v11283_v58 = vrot.slane %v9527_v41, 5  ;;  %v3030_v16 = vmax.f32 %v2976_v61, 0.0  ;;  %v3696_v27 = vor.u32 %v3695_v48, %v3692_v30  ;;  %v6237_v21 = vcombine.low %v9449_v11, %v9537_v9  ;;  %v9598_v48 = vld [vmem:[%s7807_s29 + $0x130] sm:$0xf] }
 0x19d   : > { %v3031_v25 = vmax.f32 %v2977_v26, 0.0  ;;  %v2397_v8 = vsel %vm2363_vm12, %v2342_v56, %v1915_v50  ;;  %v2095_v1 = vpop.permute.xlu1 %2094  ;;  %v6103_v13 = vrot.slane %v9475_v53, 9  ;;  %v1279_v33 = vrot.slane %v1277_v43, 4 }
 0x19e   : > { %2048 = vrot.lane.b32.xlu0 %v9572_v24, %s7745_s14  ;;  %v1280_v49 = vrot.slane %v9520_v62, 5  ;;  %v3706_v30 = vor.u32 %v3705_v63, %v9579_v38  ;;  %v2452_v61 = vsel %vm2418_vm13, %v2397_v8, %v1975_v4  ;;  %v6267_v45 = vcombine.low %v9475_v53, %v9484_v42 }
 0x19f   : > { %v6642_v6 = vpack.c.bf16 %v3031_v25, %v3030_v16  ;;  %1678 = vrot.lane.b32.xlu1 %v9364_v23, %s7740_s9  ;;  %v9606_v37 = vsel %vm7891_vm5, %v1245_v14, %v9525_v47  ;;  %v1261_v23 = vshrl.u32 %v9520_v62, 16  ;;  %v9613_v4 = vsel %vm7891_vm5, %v1255_v60, %v9582_v44 }
 0x1a0   : > { %v2035_v7 = vpop.permute.xlu0 %2034  ;;  %v3697_v26 = vrot.slane %v3696_v27, 4  ;;  %v4125_v63 = vrot.slane %v11283_v58, 4  ;;  %v9622_v47 = vsel %vm7800_vm2, %v6103_v13, %v1277_v43  ;;  %v1286_v50 = vshrl.u32 %v9598_v48, 16  ;;  %v9635_v43 = vld [vmem:[%s7807_s29 + $0x12c] sm:$0x1] }
 0x1a1   : > { %6845 = vst [vmem:[#allocation2 + $0x10] sm:$0xff] %v6642_v6   ;;  %v2507_v11 = vsel %vm2473_vm14, %v2452_v61, %v2035_v7  ;;  %v1665_v9 = vpop.permute.xlu1 %1664  ;;  %v1289_v16 = vshll.u32 %v9598_v48, 16  ;;  %v9632_v27 = vsel %vm7800_vm2, %v1279_v33, %v1280_v49  ;;  %v6270_v13 = vcombine.low %v9606_v37, %v9613_v4 }
 0x1a2   : > { %v2562_v56 = vsel %vm2528_vm15, %v2507_v11, %v2095_v1  ;;  %1543 = vrot.lane.b32.xlu0 %v9372_v5, %s7743_s12  ;;  %v3491_v14 = vld [vmem:[#allocation2 + $0x8] sm:$0xf]  ;;  %v3707_v5 = vrot.slane %v3706_v30, 4  ;;  %v6264_v1 = vcombine.low %v9421_v20, %v9513_v31  ;;  %v9645_v6 = vrot.slane %v1261_v23, 4 }
 0x1a3   : > { %7458 = vmatmul.mubr.msk.bf16.gmra.mrb[64].mxu0 %vm2598_vm0, %v2562_v56  ;;  %1846 = vrot.lane.b32.xlu1 %v6237_v21, %s7744_s13  ;;  %v3709_v60 = vshll.u32 %v3491_v14, 16  ;;  %v4126_v25 = vrot.slane %v3491_v14, 5  ;;  %v9643_v21 = vld [vmem:[#allocation2 + $0xc] sm:$0xf]  ;;  %v3702_v61 = vsel %vm7891_vm5, %v3697_v26, %v9579_v38  ;;  %v6273_v23 = vcombine.low %v9622_v47, %v9632_v27 }
 0x1a4   : > { %v1530_v8 = vpop.permute.xlu0 %1529  ;;  %7461 = vmatprep.mubr.msk.bf16.mxu0 %vm7747_vm7, %v11284_v22  ;;  %v9662_v56 = vrot.slane %v1289_v16, 5 }
 0x1a5   : > { %v2170_v33 = vsel %vm2116_vm8, %v8773_v39, %v1530_v8  ;;  %v1833_v30 = vpop.permute.xlu1 %1832  ;;  %v3711_v20 = vrot.slane %v3709_v60, 5  ;;  %v9654_v31 = vsel %vm7800_vm2, %v4125_v63, %v4126_v25  ;;  %v9660_v39 = vrot.slane %v1286_v50, 4  ;;  %v9672_v60 = vld [vmem:[%s7807_s29 + $0x134] sm:$0xf] }
 0x1a6   : > { %v2715_v7 = vpop.f32.mrb[12].mxu0  ;;  %1762 = vrot.lane.b32.xlu0 %v6210_v3, %s7738_s30  ;;  %v6380_v3 = vcombine.low %v9503_v34, %v9527_v41  ;;  %v3714_v63 = vshrl.u32 %v9643_v21, 16  ;;  %v2234_v50 = vsel %vm2198_vm9, %v2170_v33, %v1665_v9 }
 0x1a7   : > { %v2918_v14 = vmul.f32 %v9325_v57, %v2715_v7  ;;  %v7407_v38 = vpop.f32.mrb[13].mxu0  ;;  %1990 = vrot.lane.b32.xlu1 %v6267_v45, %s7739_s8  ;;  %v3712_v26 = vsel %vm7891_vm5, %v3707_v5, %v3711_v20  ;;  %v3717_v45 = vshll.u32 %v9643_v21, 16  ;;  %v1264_v5 = vor.u32 %v9645_v6, %v9582_v44 }
 0x1a8   : > { %v3431_v25 = vld [vmem:[#allocation2 + $0x14] sm:$0xf]  ;;  %v2718_v16 = vpop.f32.mrb[14].mxu0  ;;  %v1749_v8 = vpop.permute.xlu0 %1748  ;;  %v6396_v58 = vcombine.low %v3702_v61, %v3712_v26  ;;  %v9675_v7 = vld [vmem:[#allocation2 + $0x10] sm:$0xf]  ;;  %v1292_v44 = vor.u32 %v9662_v56, %v9660_v39  ;;  %v1295_v6 = vshll.u32 %v9672_v60, 16 }
 0x1a9   : > { %v3432_v34 = vsel %vm9541_vm3, 0, %v3431_v25  ;;  %v2978_v20 = vadd.f32 %v9345_v28, %v2918_v14  ;;  %v2919_v38 = vmul.f32 %v9325_v57, %v2718_v16  ;;  %v2289_v22 = vsel %vm2253_vm10, %v2234_v50, %v1749_v8  ;;  %v7408_v9 = vpop.f32.mrb[15].mxu0  ;;  %v1977_v33 = vpop.permute.xlu1 %1976  ;;  %v7651_v14 = vld [vmem:[%s11277_s4 + $0x140] sm:$0xff]  }
 0x1aa   : > { %3433 = vst [vmem:[#allocation2 + $0x14] sm:$0xf] %v3432_v34  ;;  %1930 = vrot.lane.b32.xlu0 %v6264_v1, %s7742_s11  ;;  %4981 = vmatprep.mubr.bf16.mxu1 %v6396_v58  ;;  %v3723_v61 = vshll.u32 %v9675_v7, 16  ;;  %v3727_v26 = vshrl.u32 %v9675_v7, 16  ;;  %v3716_v1 = vrot.slane %v3714_v63, 4  ;;  %v7652_v58 = vld [vmem:[%s11277_s4 + $0x100] sm:$0xff]   ;;  %v2344_v56 = vsel %vm2308_vm11, %v2289_v22, %v1833_v30 }
 0x1ab   : > { %v2979_v25 = vadd.f32 %v9345_v28, %v2919_v38  ;;  %2110 = vrot.lane.b32.xlu1 %v6273_v23, %s7741_s10  ;;  %4982 = vmatmul.mubr.bf16.vlgmr.msra.gmra.mrb[0].mxu1 %v6380_v3  ;;  %v6363_v50 = vrot.slane %v9643_v21, 9  ;;  %v4130_v39 = vrot.slane %v9675_v7, 5  ;;  %v3719_v8 = vrot.slane %v3717_v45, 5 }
 0x1ac   : > { %v1917_v16 = vpop.permute.xlu0 %1916  ;;  %v9702_v34 = vrot.slane %v3723_v61, 5  ;;  %v3729_v9 = vrot.slane %v3727_v26, 4  ;;  %7139 = vmatprep.subr.bf16.mxu0 %v7651_v14  ;;  %v3032_v38 = vmax.f32 %v2978_v20, 0.0  ;;  %v6211_v22 = vcombine.low %v9397_v15, %v9475_v53  ;;  %v7653_v61 = vld [vmem:[%s11277_s4 + $0x148] sm:$0xff]  }
 0x1ad   : > { %v3033_v23 = vmax.f32 %v2979_v25, 0.0  ;;  %v2399_v3 = vsel %vm2363_vm12, %v2344_v56, %v1917_v16  ;;  %v2097_v63 = vpop.permute.xlu1 %2096  ;;  %7140 = vmatpush3.bf16.msra.mxu0 %v7652_v58  ;;  %v4131_v11 = vsel %vm7800_vm2, %v6363_v50, %v4130_v39  ;;  %v6238_v30 = vcombine.low %v9548_v59, %v9606_v37  ;;  %v7654_v59 = vld [vmem:[%s11277_s4 + $0x108] sm:$0xff]  }
 0x1ae   : > { %2050 = vrot.lane.b32.xlu0 %v6270_v13, %s7745_s14  ;;  %v1282_v20 = vrot.slane %v1280_v49, 4  ;;  %v1283_v13 = vrot.slane %v9635_v43, 5  ;;  %v6104_v15 = vrot.slane %v9598_v48, 9  ;;  %v1325_v53 = vrot.slane %v9672_v60, 5  ;;  %7141 = vmatprep.subr.bf16.mxu0 %v7653_v61 }
 0x1af   : > { %v6647_v26 = vpack.c.bf16 %v3033_v23, %v3032_v38  ;;  %1680 = vrot.lane.b32.xlu1 %v9453_v36, %s7740_s9  ;;  %v2454_v49 = vsel %vm2418_vm13, %v2399_v3, %v1977_v33  ;;  %v3720_v14 = vor.u32 %v3719_v8, %v3716_v1  ;;  %v3730_v25 = vor.u32 %v3729_v9, %v9702_v34  ;;  %v7655_v1 = vld [vmem:[%s11277_s4 + $0x150] sm:$0xff]  }
 0x1b0   : > { %v2037_v37 = vpop.permute.xlu0 %2036  ;;  %v1265_v58 = vrot.slane %v1264_v5, 4  ;;  %v11304_v16 = vshll.u32 %v9635_v43, 16  ;;  %v1293_v23 = vrot.slane %v1292_v44, 4  ;;  %v9735_v45 = vrot.slane %v1295_v6, 5  ;;  %v7656_v6 = vld [vmem:[%s11277_s4 + $0x110] sm:$0xff]  }
 0x1b1   : > { %6846 = vst [vmem:[#allocation2 + $0x18] sm:$0xff] %v6647_v26   ;;  %v2509_v36 = vsel %vm2473_vm14, %v2454_v49, %v2037_v37  ;;  %v1667_v50 = vpop.permute.xlu1 %1666  ;;  %v3494_v56 = vld [vmem:[#allocation2 + $0x14] sm:$0xf]  ;;  %7142 = vmatpush3.bf16.msra.mxu0 %v7654_v59  ;;  %v4132_v8 = vrot.slane %v4130_v39, 4  ;;  %v6268_v43 = vcombine.low %v9520_v62, %v9598_v48  ;;  %v9749_v44 = vsel %vm7800_vm2, %v1282_v20, %v1283_v13  ;;  %v9761_v48 = vld [vmem:[%s7807_s29 + $0x138] sm:$0xf] }
 0x1b2   : > { %v1269_v38 = vrot.slane %v11304_v16, 5  ;;  %v2564_v33 = vsel %vm2528_vm15, %v2509_v36, %v2097_v63  ;;  %1545 = vrot.lane.b32.xlu0 %v9466_v19, %s7743_s12  ;;  %v3733_v5 = vshll.u32 %v3494_v56, 16  ;;  %v4133_v9 = vrot.slane %v3494_v56, 5  ;;  %7143 = vmatprep.subr.bf16.mxu0 %v7655_v1  ;;  %v7657_v36 = vld [vmem:[%s11277_s4 + $0x158] sm:$0xff]  }
 0x1b3   : > { %7462 = vmatmul.mubr.msk.bf16.gmra.mrb[68].mxu0 %vm2598_vm0, %v2564_v33  ;;  %1848 = vrot.lane.b32.xlu1 %v6238_v30, %s7744_s13  ;;  %v1326_v19 = vsel %vm7800_vm2, %v6104_v15, %v1325_v53  ;;  %v3721_v3 = vrot.slane %v3720_v14, 4  ;;  %v3731_v63 = vrot.slane %v3730_v25, 4  ;;  %v11305_v61 = vmov 0.0  }
 0x1b4   : > { %v1532_v39 = vpop.permute.xlu0 %1531  ;;  %v3735_v30 = vrot.slane %v3733_v5, 5  ;;  %7465 = vmatprep.mubr.msk.bf16.mxu0 %vm7747_vm7, %v11305_v61  ;;  %v4134_v20 = vsel %vm7800_vm2, %v4132_v8, %v4133_v9  ;;  %v9769_v15 = vsel %vm7891_vm5, %v1265_v58, %v1269_v38  ;;  %v1298_v59 = vsel %vm7891_vm5, %v1293_v23, %v9735_v45  ;;  %v7658_v38 = vld [vmem:[%s11277_s4 + $0x118] sm:$0xff]  }
 0x1b5   : > { %v2173_v26 = vsel %vm2116_vm8, %v8851_v35, %v1532_v39  ;;  %v1835_v13 = vpop.permute.xlu1 %1834  ;;  %7144 = vmatpush3.bf16.msra.mxu0 %v7656_v6  ;;  %v9774_v49 = vcombine.low %v4131_v11, %v4134_v20  ;;  %v3726_v14 = vsel %vm7891_vm5, %v3721_v3, %v9702_v34  ;;  %v6274_v25 = vcombine.low %v9749_v44, %v1326_v19 }
 0x1b6   : > { %v2723_v37 = vpop.f32.mrb[16].mxu0  ;;  %1764 = vrot.lane.b32.xlu0 %v6211_v22, %s7738_s30  ;;  %v3736_v35 = vsel %vm7891_vm5, %v3731_v63, %v3735_v30  ;;  %v1299_v58 = vshrl.u32 %v9672_v60, 16  ;;  %v1309_v34 = vshrl.u32 %v9761_v48, 16  ;;  %v1305_v22 = vshll.u32 %v9761_v48, 16  ;;  %7145 = vmatprep.subr.bf16.mxu0 %v7657_v36  ;;  %v7660_v63 = vld [vmem:[%s11277_s4 + $0x160] sm:$0xff]  }
 0x1b7   : > { %v2920_v11 = vmul.f32 %v9325_v57, %v2723_v37  ;;  %v7411_v56 = vpop.f32.mrb[17].mxu0  ;;  %v9788_v16 = vcombine.low %v3726_v14, %v3736_v35  ;;  %1992 = vrot.lane.b32.xlu1 %v6268_v43, %s7739_s8  ;;  %v2236_v33 = vsel %vm2198_vm9, %v2173_v26, %v1667_v50  ;;  %v9799_v8 = vcombine.low %v9643_v21, %v9675_v7  ;;  %v7661_v37 = vld [vmem:[%s11277_s4 + $0x120] sm:$0xff]  }
 0x1b8   : > { %v3377_v23 = vld [vmem:[#allocation2 + $0x18] sm:$0x1]  ;;  %v2726_v5 = vpop.f32.mrb[18].mxu0  ;;  %v1751_v1 = vpop.permute.xlu0 %1750  ;;  %v11306_v21 = vcombine.low %v9517_v29, %v9622_v47  ;;  %v6271_v7 = vcombine.low %v9769_v15, %v1298_v59  ;;  %v1301_v3 = vrot.slane %v1299_v58, 4  ;;  %v9818_v20 = vrot.slane %v1305_v22, 5  ;;  %v7662_v56 = vld [vmem:[%s11277_s4 + $0x168] sm:$0xff]  }
 0x1b9   : > { %v3378_v9 = vsel %vm9432_vm4, 0, %v3377_v23  ;;  %v2980_v43 = vadd.f32 %v9345_v28, %v2920_v11  ;;  %v2921_v19 = vmul.f32 %v9325_v57, %v2726_v5  ;;  %v2291_v6 = vsel %vm2253_vm10, %v2236_v33, %v1751_v1  ;;  %v7412_v39 = vpop.f32.mrb[19].mxu0  ;;  %4989 = vmatprep.mubr.bf16.mxu1 %v9788_v16  ;;  %v1979_v50 = vpop.permute.xlu1 %1978  ;;  %7146 = vmatpush3.bf16.msra.mxu0 %v7658_v38  ;;  %v359_v59 = vld [vmem:[%s7807_s29 + $0x13c] sm:$0x1]  ;;  %v7663_v23 = vld [vmem:[%s11277_s4 + $0x128] sm:$0xff]   ;;  %s11135_s29 = scalar_lea.vmem %s11280_s7, %s6542_s16 }
 0x1ba   : > { %3379 = vst [vmem:[#allocation2 + $0x18] sm:$0x1] %v3378_v9  ;;  %4990 = vmatmul.mubr.bf16.gmra.mrb[4].mxu1 %v9799_v8  ;;  %1932 = vrot.lane.b32.xlu0 %v11306_v21, %s7742_s11  ;;  %v1311_v26 = vrot.slane %v1309_v34, 4  ;;  %v2346_v29 = vsel %vm2308_vm11, %v2291_v6, %v1835_v13  ;;  %v1328_v14 = vrot.slane %v9761_v48, 5  ;;  %v6239_v34 = vcombine.low %v9613_v4, %v9769_v15 }
 0x1bb   : > { %v2981_v30 = vadd.f32 %v9345_v28, %v2921_v19  ;;  %2112 = vrot.lane.b32.xlu1 %v6274_v25, %s7741_s10  ;;  %7147 = vmatprep.subr.bf16.mxu0 %v7660_v63  ;;  %v3034_v35 = vmax.f32 %v2980_v43, 0.0  ;;  %v1302_v25 = vor.u32 %v1301_v3, %v9735_v45  ;;  %v1315_v38 = vshll.u32 %v359_v59, 16  ;;  %v9843_v43 = vld [vmem:[#allocation2 + $0x1c] sm:$0xf] }
 0x1bc   : > { %v1919_v47 = vpop.permute.xlu0 %1918  ;;  %v1312_v22 = vor.u32 %v1311_v26, %v9818_v20  ;;  %v1327_v5 = vrot.slane %v1325_v53, 4  ;;  %v1330_v1 = vrot.slane %v1328_v14, 4  ;;  %v1331_v9 = vrot.slane %v359_v59, 5 }
 0x1bd   : > { %v3035_v58 = vmax.f32 %v2981_v30, 0.0  ;;  %v2401_v36 = vsel %vm2363_vm12, %v2346_v29, %v1919_v47  ;;  %v2099_v11 = vpop.permute.xlu1 %2098  ;;  %7148 = vmatpush3.bf16.msra.mxu0 %v7661_v37  ;;  %v6212_v53 = vcombine.low %v9484_v42, %v9520_v62  ;;  %v6269_v6 = vcombine.low %v9672_v60, %v9761_v48 }
 0x1be   : > { %2052 = vrot.lane.b32.xlu0 %v6271_v7, %s7745_s14  ;;  %v2456_v45 = vsel %vm2418_vm13, %v2401_v36, %v1979_v50  ;;  %7149 = vmatprep.subr.bf16.mxu0 %v7662_v56  ;;  %v1303_v39 = vrot.slane %v1302_v25, 4  ;;  %v7664_v50 = vld [vmem:[%s11277_s4 + $0x170] sm:$0xff]   ;;  %v1313_v21 = vrot.slane %v1312_v22, 4  ;;  %v1317_v7 = vrot.slane %v1315_v38, 5 }
 0x1bf   : > { %v6652_v13 = vpack.c.bf16 %v3035_v58, %v3034_v35  ;;  %1682 = vrot.lane.b32.xlu1 %v9552_v10, %s7740_s9  ;;  %v4137_v62 = vrot.slane %v9843_v43, 5  ;;  %v1329_v48 = vsel %vm7800_vm2, %v1327_v5, %v1328_v14  ;;  %v1332_v3 = vsel %vm7800_vm2, %v1330_v1, %v1331_v9  ;;  %v7667_v1 = vld [vmem:[%s11277_s4 + $0x138] sm:$0xff]  }
 0x1c0   : > { %v2039_v33 = vpop.permute.xlu0 %2038  ;;  %v6266_v29 = vcombine.low %v9632_v27, %v9749_v44  ;;  %v1308_v47 = vsel %vm7891_vm5, %v1303_v39, %v9818_v20  ;;  %v1318_v58 = vsel %vm7891_vm5, %v1313_v21, %v1317_v7  ;;  %v6275_v36 = vcombine.low %v1329_v48, %v1332_v3  ;;  %v7666_v27 = vld [vmem:[%s11277_s4 + $0x178] sm:$0xff]  }
 0x1c1   : > { %6847 = vst [vmem:[#allocation2 + $0x20] sm:$0xff] %v6652_v13   ;;  %v2511_v10 = vsel %vm2473_vm14, %v2456_v45, %v2039_v33  ;;  %v1669_v4 = vpop.permute.xlu1 %1668  ;;  %v9846_v15 = vld [vmem:[#allocation2 + $0x18] sm:$0xf]  ;;  %7150 = vmatpush3.bf16.msra.mxu0 %v7663_v23 }
 0x1c2   : > { %v2566_v19 = vsel %vm2528_vm15, %v2511_v10, %v2099_v11  ;;  %1547 = vrot.lane.b32.xlu0 %v9572_v24, %s7743_s12  ;;  %v7665_v24 = vld [vmem:[%s11277_s4 + $0x130] sm:$0xff]   ;;  %v6364_v42 = vrot.slane %v9846_v15, 9  ;;  %7151 = vmatprep.subr.bf16.mxu0 %v7664_v50  ;;  %v3741_v59 = vshll.u32 %v9846_v15, 16  ;;  %v3747_v11 = vshll.u32 %v9843_v43, 16 }
 0x1c3   : > { %7466 = vmatmul.mubr.msk.bf16.gmra.mrb[72].mxu0 %vm2598_vm0, %v2566_v19  ;;  %1850 = vrot.lane.b32.xlu1 %v6239_v34, %s7744_s13  ;;  %v3751_v34 = vshrl.u32 %v9843_v43, 16  ;;  %v6272_v10 = vcombine.low %v1308_v47, %v1318_v58 }
 0x1c4   : > { %v1534_v60 = vpop.permute.xlu0 %1533  ;;  %7469 = vmatprep.mubr.msk.bf16.mxu0 %vm7747_vm7, %v11305_v61  ;;  %v9877_v26 = vsel %vm7800_vm2, %v6364_v42, %v4137_v62  ;;  %v3743_v19 = vrot.slane %v3741_v59, 5  ;;  %v3749_v39 = vrot.slane %v3747_v11, 5 }
 0x1c5   : > { %v2176_v63 = vsel %vm2116_vm8, %v8951_v12, %v1534_v60  ;;  %v1837_v30 = vpop.permute.xlu1 %1836  ;;  %7152 = vmatpush3.bf16.msra.mxu0 %v7665_v24  ;;  %v3738_v12 = vshrl.u32 %v9846_v15, 16  ;;  %v3753_v50 = vrot.slane %v3751_v34, 4 }
 0x1c6   : > { %v2731_v37 = vpop.f32.mrb[20].mxu0  ;;  %1766 = vrot.lane.b32.xlu0 %v6212_v53, %s7738_s30  ;;  %v2238_v25 = vsel %vm2198_vm9, %v2176_v63, %v1669_v4  ;;  %7153 = vmatprep.subr.bf16.mxu0 %v7666_v27 }
 0x1c7   : > { %v2922_v14 = vmul.f32 %v9325_v57, %v2731_v37  ;;  %v7415_v35 = vpop.f32.mrb[21].mxu0  ;;  %1994 = vrot.lane.b32.xlu1 %v6269_v6, %s7739_s8  ;;  %v3740_v4 = vrot.slane %v3738_v12, 4  ;;  %v3754_v63 = vor.u32 %v3753_v50, %v3749_v39 }
 0x1c8   : > { %v3380_v44 = vld [vmem:[#allocation2 + $0x24] sm:$0x1]  ;;  %v3434_v20 = vld [vmem:[#allocation2 + $0x20] sm:$0xf]  ;;  %v2734_v56 = vpop.f32.mrb[22].mxu0  ;;  %v1753_v13 = vpop.permute.xlu0 %1752 }
 0x1c9   : > { %v3381_v22 = vsel %vm9432_vm4, 0, %v3380_v44  ;;  %v3435_v38 = vsel %vm9541_vm3, 0, %v3434_v20  ;;  %v2982_v23 = vadd.f32 %v9345_v28, %v2922_v14  ;;  %v2923_v45 = vmul.f32 %v9325_v57, %v2734_v56  ;;  %v7416_v33 = vpop.f32.mrb[23].mxu0  ;;  %v1981_v5 = vpop.permute.xlu1 %1980  ;;  %7154 = vmatpush3.bf16.msra.mxu0 %v7667_v1 }
 0x1ca   : > { %3382 = vst [vmem:[#allocation2 + $0x24] sm:$0x1] %v3381_v22  ;;  %3436 = vst [vmem:[#allocation2 + $0x20] sm:$0xf] %v3435_v38  ;;  %v2293_v9 = vsel %vm2253_vm10, %v2238_v25, %v1753_v13  ;;  %1934 = vrot.lane.b32.xlu0 %v6266_v29, %s7742_s11  ;;  %v3744_v60 = vor.u32 %v3743_v19, %v3740_v4  ;;  %v4139_v14 = vrot.slane %v4137_v62, 4 }
 0x1cb   : > { %v2983_v53 = vadd.f32 %v9345_v28, %v2923_v45  ;;  %2114 = vrot.lane.b32.xlu1 %v6275_v36, %s7741_s10  ;;  %v2348_v57 = vsel %vm2308_vm11, %v2293_v9, %v1837_v30  ;;  %v3036_v21 = vmax.f32 %v2982_v23, 0.0  ;;  %v3755_v36 = vrot.slane %v3754_v63, 4  ;;  %v9937_v22 = vld [vmem:[%s11275_s2] ss:$0 sm:$0xff] }
 0x1cc   : > { %v1921_v6 = vpop.permute.xlu0 %1920  ;;  %v3745_v12 = vrot.slane %v3744_v60, 4 }
 0x1cd   : > { %v3037_v7 = vmax.f32 %v2983_v53, 0.0  ;;  %v2403_v24 = vsel %vm2363_vm12, %v2348_v57, %v1921_v6  ;;  %v2101_v42 = vpop.permute.xlu1 %2100  ;;  %v9954_v53 = vld [vmem:[%s11276_s3] ss:$0 sm:$0xff] }
 0x1ce   : > { %2054 = vrot.lane.b32.xlu0 %v6272_v10, %s7745_s14  ;;  %v2458_v3 = vsel %vm2418_vm13, %v2403_v24, %v1981_v5  ;;  %v3750_v62 = vsel %vm7891_vm5, %v3745_v12, %v3749_v39 }
 0x1cf   : > { %v6657_v48 = vpack.c.bf16 %v3037_v7, %v3036_v21 }
 0x1d0   : > { %v2041_v28 = vpop.permute.xlu0 %2040 }
 0x1d1   : > { %6848 = vst [vmem:[#allocation2 + $0x28] sm:$0xff] %v6657_v48   ;;  %v2513_v37 = vsel %vm2473_vm14, %v2458_v3, %v2041_v28  ;;  %v1671_v30 = vpop.permute.xlu1 %1670  ;;  %v3497_v29 = vld [vmem:[#allocation2 + $0x20] sm:$0xf]  ;;  %v9921_v27 = vld [vmem:[#allocation2 + $0x24] sm:$0xf] }
 0x1d2   : > { %v2568_v47 = vsel %vm2528_vm15, %v2513_v37, %v2101_v42  ;;  %v3757_v59 = vshll.u32 %v3497_v29, 16  ;;  %v4140_v35 = vrot.slane %v3497_v29, 5  ;;  %v3762_v45 = vshrl.u32 %v9921_v27, 16 }
 0x1d3   : > { %7470 = vmatmul.mubr.msk.bf16.gmra.mrb[76].mxu0 %vm2598_vm0, %v2568_v47  ;;  %v3765_v4 = vshll.u32 %v9921_v27, 16  ;;  %v6365_v42 = vrot.slane %v9921_v27, 9 }
 0x1d4   : > { %v1536_v58 = vpop.permute.xlu0 %1535  ;;  %v3759_v11 = vrot.slane %v3757_v59, 5  ;;  %7473 = vmatprep.mubr.msk.bf16.mxu0 %vm7747_vm7, %v11305_v61  ;;  %v4141_v25 = vsel %vm7800_vm2, %v4139_v14, %v4140_v35  ;;  %v3764_v24 = vrot.slane %v3762_v45, 4 }
 0x1d5   : > { %v2179_v44 = vsel %vm2116_vm8, %v9040_v46, %v1536_v58  ;;  %v1839_v20 = vpop.permute.xlu1 %1838  ;;  %v9932_v34 = vcombine.low %v9877_v26, %v4141_v25  ;;  %v9946_v26 = vcombine.low %v9846_v15, %v9843_v43  ;;  %v3767_v28 = vrot.slane %v3765_v4, 5 }
 0x1d6   : > { %v2739_v56 = vpop.f32.mrb[24].mxu0  ;;  %v3760_v13 = vsel %vm7891_vm5, %v3755_v36, %v3759_v11  ;;  %v2240_v5 = vsel %vm2198_vm9, %v2179_v44, %v1671_v30 }
 0x1d7   : > { %v2924_v46 = vmul.f32 %v9937_v22, %v2739_v56  ;;  %v7419_v38 = vpop.f32.mrb[25].mxu0  ;;  %v9940_v23 = vcombine.low %v3750_v62, %v3760_v13  ;;  %v3768_v36 = vor.u32 %v3767_v28, %v3764_v24 }
 0x1d8   : > { %v3437_v33 = vld [vmem:[#allocation2 + $0x2c] sm:$0xf]  ;;  %v2742_v1 = vpop.f32.mrb[26].mxu0  ;;  %v1755_v9 = vpop.permute.xlu0 %1754  ;;  %v3499_v10 = vld [vmem:[#allocation2 + $0x28] sm:$0xf] }
 0x1d9   : > { %v3438_v19 = vsel %vm9541_vm3, 0, %v3437_v33  ;;  %v2984_v57 = vadd.f32 %v9954_v53, %v2924_v46  ;;  %v2925_v6 = vmul.f32 %v9937_v22, %v2742_v1  ;;  %v2295_v39 = vsel %vm2253_vm10, %v2240_v5, %v1755_v9  ;;  %v7420_v50 = vpop.f32.mrb[27].mxu0  ;;  %4997 = vmatprep.mubr.bf16.mxu1 %v9940_v23  ;;  %v1983_v43 = vpop.permute.xlu1 %1982 }
 0x1da   : > { %3439 = vst [vmem:[#allocation2 + $0x2c] sm:$0xf] %v3438_v19  ;;  %4998 = vmatmul.mubr.bf16.gmra.mrb[8].mxu1 %v9946_v26  ;;  %v3771_v15 = vshll.u32 %v3499_v10, 16  ;;  %v3775_v21 = vshrl.u32 %v3499_v10, 16  ;;  %v4144_v60 = vrot.slane %v3499_v10, 5  ;;  %v2350_v48 = vsel %vm2308_vm11, %v2295_v39, %v1839_v20 }
 0x1db   : > { %v2985_v7 = vadd.f32 %v9954_v53, %v2925_v6  ;;  %v3038_v30 = vmax.f32 %v2984_v57, 0.0  ;;  %v3769_v45 = vrot.slane %v3768_v36, 4 }
 0x1dc   : > { %v1923_v3 = vpop.permute.xlu0 %1922  ;;  %v3773_v63 = vrot.slane %v3771_v15, 5  ;;  %v3777_v37 = vrot.slane %v3775_v21, 4  ;;  %v4145_v59 = vsel %vm7800_vm2, %v6365_v42, %v4144_v60  ;;  %v4146_v13 = vrot.slane %v4144_v60, 4 }
 0x1dd   : > { %v3039_v29 = vmax.f32 %v2985_v7, 0.0  ;;  %v2405_v47 = vsel %vm2363_vm12, %v2350_v48, %v1923_v3  ;;  %v2103_v12 = vpop.permute.xlu1 %2102  ;;  %v9988_v42 = vcombine.low %v9921_v27, %v3499_v10 }
 0x1de   : > { %v2460_v35 = vsel %vm2418_vm13, %v2405_v47, %v1983_v43  ;;  %v3778_v11 = vor.u32 %v3777_v37, %v3773_v63  ;;  %v3774_v6 = vsel %vm7891_vm5, %v3769_v45, %v3773_v63 }
 0x1df   : > { %v6662_v14 = vpack.c.bf16 %v3039_v29, %v3038_v30 }
 0x1e0   : > { %v2043_v58 = vpop.permute.xlu0 %2042  ;;  %v3779_v33 = vrot.slane %v3778_v11, 4 }
 0x1e1   : > { %6849 = vst [vmem:[#allocation2 + $0x30] sm:$0xff] %v6662_v14   ;;  %v2515_v44 = vsel %vm2473_vm14, %v2460_v35, %v2043_v58  ;;  %v1673_v20 = vpop.permute.xlu1 %1672  ;;  %v3500_v25 = vld [vmem:[#allocation2 + $0x2c] sm:$0xf] }
 0x1e2   : > { %v2570_v56 = vsel %vm2528_vm15, %v2515_v44, %v2103_v12  ;;  %v3781_v62 = vshll.u32 %v3500_v25, 16  ;;  %v4147_v46 = vrot.slane %v3500_v25, 5 }
 0x1e3   : > { %7474 = vmatmul.mubr.msk.bf16.gmra.mrb[80].mxu0 %vm2598_vm0, %v2570_v56 }
 0x1e4   : > { %v1538_v38 = vpop.permute.xlu0 %1537  ;;  %v3783_v5 = vrot.slane %v3781_v62, 5  ;;  %7477 = vmatprep.mubr.msk.bf16.mxu0 %vm7747_vm7, %v11305_v61  ;;  %v4148_v1 = vsel %vm7800_vm2, %v4146_v13, %v4147_v46 }
 0x1e5   : > { %v2182_v9 = vsel %vm2116_vm8, %v9112_v17, %v1538_v38  ;;  %v1841_v4 = vpop.permute.xlu1 %1840  ;;  %v9977_v19 = vcombine.low %v4145_v59, %v4148_v1 }
 0x1e6   : > { %v2747_v57 = vpop.f32.mrb[28].mxu0  ;;  %v3784_v39 = vsel %vm7891_vm5, %v3779_v33, %v3783_v5  ;;  %v2242_v7 = vsel %vm2198_vm9, %v2182_v9, %v1673_v20 }
 0x1e7   : > { %v2926_v50 = vmul.f32 %v9937_v22, %v2747_v57  ;;  %v7423_v43 = vpop.f32.mrb[29].mxu0  ;;  %v9984_v15 = vcombine.low %v3774_v6, %v3784_v39 }
 0x1e8   : > { %v3383_v21 = vld [vmem:[#allocation2 + $0x30] sm:$0x1]  ;;  %v2750_v24 = vpop.f32.mrb[30].mxu0  ;;  %v1757_v17 = vpop.permute.xlu0 %1756  ;;  %v10001_v36 = vld [vmem:[#allocation2 + $0x34] sm:$0xf] }
 0x1e9   : > { %v3384_v60 = vsel %vm9432_vm4, 0, %v3383_v21  ;;  %v2986_v48 = vadd.f32 %v9954_v53, %v2926_v50  ;;  %v2927_v3 = vmul.f32 %v9937_v22, %v2750_v24  ;;  %v2297_v28 = vsel %vm2253_vm10, %v2242_v7, %v1757_v17  ;;  %v7424_v63 = vpop.f32.mrb[31].mxu0  ;;  %5005 = vmatprep.mubr.bf16.mxu1 %v9984_v15  ;;  %v1985_v37 = vpop.permute.xlu1 %1984 }
 0x1ea   : > { %3385 = vst [vmem:[#allocation2 + $0x30] sm:$0x1] %v3384_v60  ;;  %5006 = vmatmul.mubr.bf16.gmra.mrb[12].mxu1 %v9988_v42  ;;  %v2352_v27 = vsel %vm2308_vm11, %v2297_v28, %v1841_v4  ;;  %v4151_v62 = vrot.slane %v10001_v36, 5  ;;  %v3795_v57 = vshll.u32 %v10001_v36, 16  ;;  %v3799_v21 = vshrl.u32 %v10001_v36, 16 }
 0x1eb   : > { %v2987_v30 = vadd.f32 %v9954_v53, %v2927_v3  ;;  %v3040_v29 = vmax.f32 %v2986_v48, 0.0 }
 0x1ec   : > { %v1925_v10 = vpop.permute.xlu0 %1924 }
 0x1ed   : > { %v3041_v47 = vmax.f32 %v2987_v30, 0.0  ;;  %v2407_v12 = vsel %vm2363_vm12, %v2352_v27, %v1925_v10  ;;  %v2105_v59 = vpop.permute.xlu1 %2104 }
 0x1ee   : > { %v2462_v35 = vsel %vm2418_vm13, %v2407_v12, %v1985_v37 }
 0x1ef   : > { %v6667_v14 = vpack.c.bf16 %v3041_v47, %v3040_v29  ;;  %v3797_v29 = vrot.slane %v3795_v57, 5  ;;  %v3801_v47 = vrot.slane %v3799_v21, 4 }
 0x1f0   : > { %v2045_v58 = vpop.permute.xlu0 %2044 }
 0x1f1   : > { %6850 = vst [vmem:[#allocation2 + $0x38] sm:$0xff] %v6667_v14   ;;  %v2517_v11 = vsel %vm2473_vm14, %v2462_v35, %v2045_v58  ;;  %v1675_v44 = vpop.permute.xlu1 %1674  ;;  %v10004_v20 = vld [vmem:[#allocation2 + $0x30] sm:$0xf] }
 0x1f2   : > { %v2572_v25 = vsel %vm2528_vm15, %v2517_v11, %v2105_v59  ;;  %v6366_v56 = vrot.slane %v10004_v20, 9  ;;  %v3786_v5 = vshrl.u32 %v10004_v20, 16  ;;  %v3789_v1 = vshll.u32 %v10004_v20, 16 }
 0x1f3   : > { %7478 = vmatmul.mubr.msk.bf16.gmra.mrb[84].mxu0 %vm2598_vm0, %v2572_v25 }
 0x1f4   : > { %v1540_v13 = vpop.permute.xlu0 %1539  ;;  %7481 = vmatprep.mubr.msk.bf16.mxu0 %vm7747_vm7, %v11305_v61  ;;  %v4152_v45 = vsel %vm7800_vm2, %v6366_v56, %v4151_v62  ;;  %v3788_v63 = vrot.slane %v3786_v5, 4  ;;  %v3791_v37 = vrot.slane %v3789_v1, 5  ;;  %v3802_v56 = vor.u32 %v3801_v47, %v3797_v29 }
 0x1f5   : > { %v2185_v46 = vsel %vm2116_vm8, %v9178_v2, %v1540_v13  ;;  %v1843_v38 = vpop.permute.xlu1 %1842 }
 0x1f6   : > { %v2755_v33 = vpop.f32.mrb[32].mxu0  ;;  %v2244_v50 = vsel %vm2198_vm9, %v2185_v46, %v1675_v44  ;;  %v3792_v58 = vor.u32 %v3791_v37, %v3788_v63 }
 0x1f7   : > { %v2928_v9 = vmul.f32 %v9937_v22, %v2755_v33  ;;  %v7427_v4 = vpop.f32.mrb[33].mxu0 }
 0x1f8   : > { %v3386_v6 = vld [vmem:[#allocation2 + $0x3c] sm:$0x1]  ;;  %v3440_v39 = vld [vmem:[#allocation2 + $0x38] sm:$0xf]  ;;  %v2758_v43 = vpop.f32.mrb[34].mxu0  ;;  %v1759_v2 = vpop.permute.xlu0 %1758  ;;  %v3793_v5 = vrot.slane %v3792_v58, 4 }
 0x1f9   : > { %v3387_v7 = vsel %vm9432_vm4, 0, %v3386_v6  ;;  %v3441_v24 = vsel %vm9541_vm3, 0, %v3440_v39  ;;  %v2988_v17 = vadd.f32 %v9954_v53, %v2928_v9  ;;  %v2929_v60 = vmul.f32 %v9937_v22, %v2758_v43  ;;  %v7428_v48 = vpop.f32.mrb[35].mxu0  ;;  %v1987_v3 = vpop.permute.xlu1 %1986 }
 0x1fa   : > { %3388 = vst [vmem:[#allocation2 + $0x3c] sm:$0x1] %v3387_v7  ;;  %3442 = vst [vmem:[#allocation2 + $0x38] sm:$0xf] %v3441_v24  ;;  %v2299_v28 = vsel %vm2253_vm10, %v2244_v50, %v1759_v2  ;;  %v4153_v9 = vrot.slane %v4151_v62, 4  ;;  %v3803_v6 = vrot.slane %v3802_v56, 4  ;;  %v3798_v62 = vsel %vm7891_vm5, %v3793_v5, %v3797_v29 }
 0x1fb   : > { %v2989_v30 = vadd.f32 %v9954_v53, %v2929_v60  ;;  %v2354_v27 = vsel %vm2308_vm11, %v2299_v28, %v1843_v38  ;;  %v3042_v12 = vmax.f32 %v2988_v17, 0.0 }
 0x1fc   : > { %v1927_v10 = vpop.permute.xlu0 %1926 }
 0x1fd   : > { %v3043_v59 = vmax.f32 %v2989_v30, 0.0  ;;  %v2409_v14 = vsel %vm2363_vm12, %v2354_v27, %v1927_v10  ;;  %v2107_v35 = vpop.permute.xlu1 %2106  ;;  %v10057_v27 = vcombine.low %v10004_v20, %v10001_v36 }
 0x1fe   : > { %v2464_v44 = vsel %vm2418_vm13, %v2409_v14, %v1987_v3 }
 0x1ff   : > { %v6672_v11 = vpack.c.bf16 %v3043_v59, %v3042_v12 }
 0x200   : > { %v2047_v25 = vpop.permute.xlu0 %2046 }
 0x201   : > { %6851 = vst [vmem:[#allocation2 + $0x40] sm:$0xff] %v6672_v11   ;;  %v2519_v13 = vsel %vm2473_vm14, %v2464_v44, %v2047_v25  ;;  %v1677_v46 = vpop.permute.xlu1 %1676  ;;  %v3503_v33 = vld [vmem:[#allocation2 + $0x38] sm:$0xf]  ;;  %v10038_v50 = vld [vmem:[#allocation2 + $0x3c] sm:$0xf] }
 0x202   : > { %v2574_v38 = vsel %vm2528_vm15, %v2519_v13, %v2107_v35  ;;  %v3805_v1 = vshll.u32 %v3503_v33, 16  ;;  %v4154_v4 = vrot.slane %v3503_v33, 5  ;;  %v6367_v44 = vrot.slane %v10038_v50, 9 }
 0x203   : > { %7482 = vmatmul.mubr.msk.bf16.gmra.mrb[88].mxu0 %vm2598_vm0, %v2574_v38 }
 0x204   : > { %v1542_v57 = vpop.permute.xlu0 %1541  ;;  %v3807_v39 = vrot.slane %v3805_v1, 5  ;;  %7485 = vmatprep.mubr.msk.bf16.mxu0 %vm7747_vm7, %v11305_v61  ;;  %v4155_v21 = vsel %vm7800_vm2, %v4153_v9, %v4154_v4 }
 0x205   : > { %v2188_v43 = vsel %vm2116_vm8, %v9243_v52, %v1542_v57  ;;  %v1845_v2 = vpop.permute.xlu1 %1844  ;;  %v10048_v17 = vcombine.low %v4152_v45, %v4155_v21  ;;  %v3810_v52 = vshrl.u32 %v10038_v50, 16  ;;  %v3813_v45 = vshll.u32 %v10038_v50, 16 }
 0x206   : > { %v2763_v7 = vpop.f32.mrb[36].mxu0  ;;  %v3808_v24 = vsel %vm7891_vm5, %v3803_v6, %v3807_v39  ;;  %v2246_v63 = vsel %vm2198_vm9, %v2188_v43, %v1677_v46 }
 0x207   : > { %v2930_v60 = vmul.f32 %v9937_v22, %v2763_v7  ;;  %v7431_v48 = vpop.f32.mrb[37].mxu0  ;;  %v10051_v3 = vcombine.low %v3798_v62, %v3808_v24  ;;  %v3812_v11 = vrot.slane %v3810_v52, 4  ;;  %v3815_v46 = vrot.slane %v3813_v45, 5 }
 0x208   : > { %v3443_v28 = vld [vmem:[#allocation2 + $0x44] sm:$0xf]  ;;  %v2766_v37 = vpop.f32.mrb[38].mxu0  ;;  %v1761_v30 = vpop.permute.xlu0 %1760  ;;  %v3505_v10 = vld [vmem:[#allocation2 + $0x40] sm:$0xf] }
 0x209   : > { %v3444_v29 = vsel %vm9541_vm3, 0, %v3443_v28  ;;  %v2990_v47 = vadd.f32 %v9954_v53, %v2930_v60  ;;  %v2931_v12 = vmul.f32 %v9937_v22, %v2766_v37  ;;  %v2301_v59 = vsel %vm2253_vm10, %v2246_v63, %v1761_v30  ;;  %v7432_v14 = vpop.f32.mrb[39].mxu0  ;;  %5013 = vmatprep.mubr.bf16.mxu1 %v10051_v3  ;;  %v1989_v35 = vpop.permute.xlu1 %1988 }
 0x20a   : > { %3445 = vst [vmem:[#allocation2 + $0x44] sm:$0xf] %v3444_v29  ;;  %5014 = vmatmul.mubr.bf16.gmra.mrb[16].mxu1 %v10057_v27  ;;  %v3819_v36 = vshll.u32 %v3505_v10, 16  ;;  %v3823_v20 = vshrl.u32 %v3505_v10, 16  ;;  %v4158_v25 = vrot.slane %v3505_v10, 5  ;;  %v2356_v56 = vsel %vm2308_vm11, %v2301_v59, %v1845_v2 }
 0x20b   : > { %v2991_v58 = vadd.f32 %v9954_v53, %v2931_v12  ;;  %v3044_v5 = vmax.f32 %v2990_v47, 0.0  ;;  %v3816_v21 = vor.u32 %v3815_v46, %v3812_v11 }
 0x20c   : > { %v1929_v13 = vpop.permute.xlu0 %1928  ;;  %v3821_v33 = vrot.slane %v3819_v36, 5  ;;  %v3825_v38 = vrot.slane %v3823_v20, 4  ;;  %v4159_v57 = vsel %vm7800_vm2, %v6367_v44, %v4158_v25  ;;  %v4160_v52 = vrot.slane %v4158_v25, 4 }
 0x20d   : > { %v3045_v1 = vmax.f32 %v2991_v58, 0.0  ;;  %v2411_v9 = vsel %vm2363_vm12, %v2356_v56, %v1929_v13  ;;  %v2109_v4 = vpop.permute.xlu1 %2108  ;;  %v3817_v37 = vrot.slane %v3816_v21, 4  ;;  %v10094_v13 = vcombine.low %v10038_v50, %v3505_v10  ;;  %v7671_v50 = vld [vmem:[%s11277_s4 + $0xc0] sm:$0xff]  }
 0x20e   : > { %v2466_v39 = vsel %vm2418_vm13, %v2411_v9, %v1989_v35  ;;  %v3826_v7 = vor.u32 %v3825_v38, %v3821_v33  ;;  %v7672_v10 = vld [vmem:[%s11277_s4 + $0x80] sm:$0xff]   ;;  %7027 = vmatprep.subr.bf16.mxu1 %v7671_v50 }
 0x20f   : > { %v6677_v6 = vpack.c.bf16 %v3045_v1, %v3044_v5  ;;  %v3822_v36 = vsel %vm7891_vm5, %v3817_v37, %v3821_v33  ;;  %7028 = vmatpush3.bf16.msra.mxu1 %v7672_v10  ;;  %v7674_v10 = vld [vmem:[%s11277_s4 + $0xc8] sm:$0xff]  }
 0x210   : > { %v2049_v43 = vpop.permute.xlu0 %2048  ;;  %v3827_v30 = vrot.slane %v3826_v7, 4  ;;  %7029 = vmatprep.subr.bf16.mxu1 %v7674_v10 }
 0x211   : > { %6852 = vst [vmem:[#allocation2 + $0x48] sm:$0xff] %v6677_v6   ;;  %v2521_v2 = vsel %vm2473_vm14, %v2466_v39, %v2049_v43  ;;  %v1679_v62 = vpop.permute.xlu1 %1678  ;;  %v3506_v24 = vld [vmem:[#allocation2 + $0x44] sm:$0xf] }
 0x212   : > { %v2576_v60 = vsel %vm2528_vm15, %v2521_v2, %v2109_v4  ;;  %v3829_v48 = vshll.u32 %v3506_v24, 16  ;;  %v4161_v28 = vrot.slane %v3506_v24, 5 }
 0x213   : > { %7486 = vmatmul.mubr.msk.bf16.gmra.mrb[92].mxu0 %vm2598_vm0, %v2576_v60 }
 0x214   : > { %v1544_v63 = vpop.permute.xlu0 %1543  ;;  %v3831_v45 = vrot.slane %v3829_v48, 5  ;;  %7489 = vmatprep.mubr.msk.bf16.mxu0 %vm7747_vm7, %v11305_v61  ;;  %v4162_v29 = vsel %vm7800_vm2, %v4160_v52, %v4161_v28 }
 0x215   : > { %v2191_v47 = vsel %vm2116_vm8, %v9315_v55, %v1544_v63  ;;  %v1847_v12 = vpop.permute.xlu1 %1846  ;;  %v10083_v59 = vcombine.low %v4159_v57, %v4162_v29 }
 0x216   : > { %v2248_v14 = vsel %vm2198_vm9, %v2191_v47, %v1679_v62  ;;  %v2771_v35 = vpop.f32.mrb[40].mxu0  ;;  %v3832_v20 = vsel %vm7891_vm5, %v3827_v30, %v3831_v45 }
 0x217   : > { %v2932_v58 = vmul.f32 %v9937_v22, %v2771_v35  ;;  %v7435_v11 = vpop.f32.mrb[41].mxu0  ;;  %v10091_v44 = vcombine.low %v3822_v36, %v3832_v20 }
 0x218   : > { %v3389_v25 = vld [vmem:[#allocation2 + $0x48] sm:$0x1]  ;;  %v2774_v56 = vpop.f32.mrb[42].mxu0  ;;  %v1763_v55 = vpop.permute.xlu0 %1762  ;;  %v10120_v37 = vld [vmem:[#allocation2 + $0x4c] sm:$0xf] }
 0x219   : > { %11307 = vst [vmem:[#allocation3_spill] sm:$0xff] %v10091_v44  ;;  %v3390_v46 = vsel %vm9432_vm4, 0, %v3389_v25  ;;  %v2992_v38 = vadd.f32 %v9954_v53, %v2932_v58  ;;  %v2933_v33 = vmul.f32 %v9937_v22, %v2774_v56  ;;  %v2303_v5 = vsel %vm2253_vm10, %v2248_v14, %v1763_v55  ;;  %v7436_v1 = vpop.f32.mrb[43].mxu0  ;;  %5021 = vmatprep.mubr.bf16.mxu1 %v10091_v44  ;;  %v1991_v9 = vpop.permute.xlu1 %1990 }
 0x21a   : > { %3391 = vst [vmem:[#allocation2 + $0x48] sm:$0x1] %v3390_v46  ;;  %v2358_v4 = vsel %vm2308_vm11, %v2303_v5, %v1847_v12  ;;  %5022 = vmatmul.mubr.bf16.gmra.mrb[20].mxu1 %v10094_v13  ;;  %v3843_v20 = vshll.u32 %v10120_v37, 16  ;;  %v3847_v55 = vshrl.u32 %v10120_v37, 16 }
 0x21b   : > { %v2993_v57 = vadd.f32 %v9954_v53, %v2933_v33  ;;  %v3046_v39 = vmax.f32 %v2992_v38, 0.0 }
 0x21c   : > { %v1931_v6 = vpop.permute.xlu0 %1930 }
 0x21d   : > { %v3047_v43 = vmax.f32 %v2993_v57, 0.0  ;;  %v2413_v21 = vsel %vm2363_vm12, %v2358_v4, %v1931_v6  ;;  %v2111_v7 = vpop.permute.xlu1 %2110  ;;  %v7675_v57 = vld [vmem:[%s11277_s4 + $0x88] sm:$0xff]  }
 0x21e   : > { %v2468_v2 = vsel %vm2418_vm13, %v2413_v21, %v1991_v9  ;;  %v3845_v21 = vrot.slane %v3843_v20, 5  ;;  %7030 = vmatpush3.bf16.msra.mxu1 %v7675_v57 }
 0x21f   : > { %v6682_v62 = vpack.c.bf16 %v3047_v43, %v3046_v39 }
 0x220   : > { %v2051_v24 = vpop.permute.xlu0 %2050 }
 0x221   : > { %6853 = vst [vmem:[#allocation2 + $0x50] sm:$0xff] %v6682_v62   ;;  %v2523_v60 = vsel %vm2473_vm14, %v2468_v2, %v2051_v24  ;;  %v1681_v48 = vpop.permute.xlu1 %1680  ;;  %v10116_v28 = vld [vmem:[#allocation2 + $0x48] sm:$0xf] }
 0x222   : > { %v2578_v52 = vsel %vm2528_vm15, %v2523_v60, %v2111_v7  ;;  %v3834_v47 = vshrl.u32 %v10116_v28, 16  ;;  %v3837_v12 = vshll.u32 %v10116_v28, 16  ;;  %v3849_v7 = vrot.slane %v3847_v55, 4 }
 0x223   : > { %7490 = vmatmul.mubr.msk.bf16.gmra.mrb[96].mxu0 %vm2598_vm0, %v2578_v52  ;;  %v10170_v10 = vcombine.low %v10116_v28, %v10120_v37 }
 0x224   : > { %v1546_v63 = vpop.permute.xlu0 %1545  ;;  %7493 = vmatprep.mubr.msk.bf16.mxu0 %vm7747_vm7, %v11305_v61  ;;  %v3836_v4 = vrot.slane %v3834_v47, 4  ;;  %v3839_v50 = vrot.slane %v3837_v12, 5 }
 0x225   : > { %v2194_v30 = vsel %vm2116_vm8, %v9407_v54, %v1546_v63  ;;  %v1849_v45 = vpop.permute.xlu1 %1848 }
 0x226   : > { %v2779_v29 = vpop.f32.mrb[44].mxu0  ;;  %v2250_v14 = vsel %vm2198_vm9, %v2194_v30, %v1681_v48  ;;  %v3840_v52 = vor.u32 %v3839_v50, %v3836_v4 }
 0x227   : > { %v2934_v35 = vmul.f32 %v9937_v22, %v2779_v29  ;;  %v7439_v36 = vpop.f32.mrb[45].mxu0  ;;  %v3850_v29 = vor.u32 %v3849_v7, %v3845_v21 }
 0x228   : > { %v3392_v58 = vld [vmem:[#allocation2 + $0x54] sm:$0x1]  ;;  %v3446_v11 = vld [vmem:[#allocation2 + $0x50] sm:$0xf]  ;;  %v2782_v25 = vpop.f32.mrb[46].mxu0  ;;  %v1765_v56 = vpop.permute.xlu0 %1764 }
 0x229   : > { %v3393_v54 = vsel %vm9432_vm4, 0, %v3392_v58  ;;  %v3447_v46 = vsel %vm9541_vm3, 0, %v3446_v11  ;;  %v2994_v38 = vadd.f32 %v9954_v53, %v2934_v35  ;;  %v2935_v33 = vmul.f32 %v9937_v22, %v2782_v25  ;;  %v7440_v5 = vpop.f32.mrb[47].mxu0  ;;  %v1993_v1 = vpop.permute.xlu1 %1992 }
 0x22a   : > { %3394 = vst [vmem:[#allocation2 + $0x54] sm:$0x1] %v3393_v54  ;;  %3448 = vst [vmem:[#allocation2 + $0x50] sm:$0xf] %v3447_v46  ;;  %v2305_v9 = vsel %vm2253_vm10, %v2250_v14, %v1765_v56  ;;  %v3841_v35 = vrot.slane %v3840_v52, 4  ;;  %v3851_v58 = vrot.slane %v3850_v29, 4 }
 0x22b   : > { %v2995_v6 = vadd.f32 %v9954_v53, %v2935_v33  ;;  %v2360_v39 = vsel %vm2308_vm11, %v2305_v9, %v1849_v45  ;;  %v3048_v2 = vmax.f32 %v2994_v38, 0.0  ;;  %v7677_v52 = vld [vmem:[%s11277_s4 + $0xd0] sm:$0xff]  }
 0x22c   : > { %v1933_v43 = vpop.permute.xlu0 %1932  ;;  %v3846_v38 = vsel %vm7891_vm5, %v3841_v35, %v3845_v21  ;;  %7031 = vmatprep.subr.bf16.mxu1 %v7677_v52 }
 0x22d   : > { %v3049_v62 = vmax.f32 %v2995_v6, 0.0  ;;  %v2415_v24 = vsel %vm2363_vm12, %v2360_v39, %v1933_v43  ;;  %v2113_v60 = vpop.permute.xlu1 %2112 }
 0x22e   : > { %v2470_v48 = vsel %vm2418_vm13, %v2415_v24, %v1993_v1 }
 0x22f   : > { %v6687_v63 = vpack.c.bf16 %v3049_v62, %v3048_v2 }
 0x230   : > { %v2053_v30 = vpop.permute.xlu0 %2052 }
 0x231   : > { %6854 = vst [vmem:[#allocation2 + $0x58] sm:$0xff] %v6687_v63   ;;  %v2525_v47 = vsel %vm2473_vm14, %v2470_v48, %v2053_v30  ;;  %v1683_v45 = vpop.permute.xlu1 %1682  ;;  %v10148_v12 = vld [vmem:[#allocation2 + $0x50] sm:$0xf]  ;;  %v10155_v25 = vld [vmem:[#allocation2 + $0x54] sm:$0xf] }
 0x232   : > { %v2580_v14 = vsel %vm2528_vm15, %v2525_v47, %v2113_v60  ;;  %v3853_v36 = vshll.u32 %v10148_v12, 16  ;;  %v3861_v6 = vshll.u32 %v10155_v25, 16  ;;  %v7678_v63 = vld [vmem:[%s11277_s4 + $0x90] sm:$0xff]  }
 0x233   : > { %7494 = vmatmul.mubr.msk.bf16.gmra.mrb[100].mxu0 %vm2598_vm0, %v2580_v14  ;;  %7032 = vmatpush3.bf16.msra.mxu1 %v7678_v63 }
 0x234   : > { %v1548_v20 = vpop.permute.xlu0 %1547  ;;  %v3855_v11 = vrot.slane %v3853_v36, 5  ;;  %7497 = vmatprep.mubr.msk.bf16.mxu0 %vm7747_vm7, %v11305_v61  ;;  %v3858_v61 = vshrl.u32 %v10155_v25, 16 }
 0x235   : > { %v2197_v56 = vsel %vm2116_vm8, %v9509_v40, %v1548_v20  ;;  %v1851_v55 = vpop.permute.xlu1 %1850 }
 0x236   : > { %v2252_v54 = vsel %vm2198_vm9, %v2197_v56, %v1683_v45  ;;  %v2787_v46 = vpop.f32.mrb[48].mxu0  ;;  %v3856_v33 = vsel %vm7891_vm5, %v3851_v58, %v3855_v11  ;;  %v3860_v47 = vrot.slane %v3858_v61, 4  ;;  %v3863_v45 = vrot.slane %v3861_v6, 5 }
 0x237   : > { %v2936_v5 = vmul.f32 %v9937_v22, %v2787_v46  ;;  %v7443_v1 = vpop.f32.mrb[49].mxu0  ;;  %v10165_v9 = vcombine.low %v3846_v38, %v3856_v33 }
 0x238   : > { %v3449_v4 = vld [vmem:[#allocation2 + $0x5c] sm:$0xf]  ;;  %v2790_v50 = vpop.f32.mrb[50].mxu0  ;;  %v1767_v40 = vpop.permute.xlu0 %1766  ;;  %v10172_v57 = vld [vmem:[#allocation2 + $0x58] sm:$0xf]  ;;  %v3864_v46 = vor.u32 %v3863_v45, %v3860_v47 }
 0x239   : > { %11308 = vst [vmem:[#allocation4_spill] sm:$0xff] %v10165_v9  ;;  %v3450_v39 = vsel %vm9541_vm3, 0, %v3449_v4  ;;  %v2996_v43 = vadd.f32 %v9954_v53, %v2936_v5  ;;  %v2937_v21 = vmul.f32 %v9937_v22, %v2790_v50  ;;  %v2307_v7 = vsel %vm2253_vm10, %v2252_v54, %v1767_v40  ;;  %v7444_v2 = vpop.f32.mrb[51].mxu0  ;;  %5029 = vmatprep.mubr.bf16.mxu1 %v10165_v9  ;;  %v1995_v62 = vpop.permute.xlu1 %1994  ;;  %v7680_v47 = vld [vmem:[%s11277_s4 + $0x98] sm:$0xff]  }
 0x23a   : > { %3451 = vst [vmem:[#allocation2 + $0x5c] sm:$0xf] %v3450_v39  ;;  %v2362_v24 = vsel %vm2308_vm11, %v2307_v7, %v1851_v55  ;;  %5030 = vmatmul.mubr.bf16.gmra.mrb[24].mxu1 %v10170_v10  ;;  %v3867_v60 = vshll.u32 %v10172_v57, 16  ;;  %v3871_v48 = vshrl.u32 %v10172_v57, 16  ;;  %v3865_v4 = vrot.slane %v3864_v46, 4 }
 0x23b   : > { %v2997_v30 = vadd.f32 %v9954_v53, %v2937_v21  ;;  %v3050_v36 = vmax.f32 %v2996_v43, 0.0 }
 0x23c   : > { %v1935_v29 = vpop.permute.xlu0 %1934  ;;  %v3869_v14 = vrot.slane %v3867_v60, 5  ;;  %v3873_v35 = vrot.slane %v3871_v48, 4  ;;  %v10210_v60 = vcombine.low %v10155_v25, %v10172_v57 }
 0x23d   : > { %v3051_v20 = vmax.f32 %v2997_v30, 0.0  ;;  %v2417_v58 = vsel %vm2363_vm12, %v2362_v24, %v1935_v29  ;;  %v2115_v55 = vpop.permute.xlu1 %2114  ;;  %v7679_v29 = vld [vmem:[%s11277_s4 + $0xd8] sm:$0xff]  }
 0x23e   : > { %v2472_v11 = vsel %vm2418_vm13, %v2417_v58, %v1995_v62  ;;  %v3874_v38 = vor.u32 %v3873_v35, %v3869_v14  ;;  %v3870_v39 = vsel %vm7891_vm5, %v3865_v4, %v3869_v14  ;;  %7033 = vmatprep.subr.bf16.mxu1 %v7679_v29 }
 0x23f   : > { %v6692_v56 = vpack.c.bf16 %v3051_v20, %v3050_v36  ;;  %7034 = vmatpush3.bf16.msra.mxu1 %v7680_v47 }
 0x240   : > { %v2055_v54 = vpop.permute.xlu0 %2054  ;;  %v3875_v50 = vrot.slane %v3874_v38, 4 }
 0x241   : > { %6855 = vst [vmem:[#allocation2 + $0x60] sm:$0xff] %v6692_v56   ;;  %v2527_v33 = vsel %vm2473_vm14, %v2472_v11, %v2055_v54  ;;  %v10195_v5 = vld [vmem:[#allocation2 + $0x5c] sm:$0xf] }
 0x242   : > { %v2582_v1 = vsel %vm2528_vm15, %v2527_v33, %v2115_v55  ;;  %v3877_v61 = vshll.u32 %v10195_v5, 16 }
 0x243   : > { %7498 = vmatmul.mubr.msk.bf16.gmra.mrb[104].mxu0 %vm2598_vm0, %v2582_v1 }
 0x244   : > { %5303 = vmatprep.mubr.bf16.mxu0 %v9774_v49  ;;  %v3879_v40 = vrot.slane %v3877_v61, 5 }
 0x246   : > { %v2795_v6 = vpop.f32.mrb[52].mxu0  ;;  %v3880_v43 = vsel %vm7891_vm5, %v3875_v50, %v3879_v40 }
 0x247   : > { %v2938_v21 = vmul.f32 %v9937_v22, %v2795_v6  ;;  %v7447_v7 = vpop.f32.mrb[53].mxu0  ;;  %v10206_v2 = vcombine.low %v3870_v39, %v3880_v43 }
 0x248   : > { %v3395_v62 = vld [vmem:[#allocation2 + $0x60] sm:$0x1]  ;;  %v2798_v24 = vpop.f32.mrb[54].mxu0  ;;  %v10231_v58 = vld [vmem:[#allocation2 + $0x64] sm:$0xf] }
 0x249   : > { %11309 = vst [vmem:[#allocation5_spill] sm:$0xff] %v10206_v2  ;;  %v3396_v48 = vsel %vm9432_vm4, 0, %v3395_v62  ;;  %v2998_v52 = vadd.f32 %v9954_v53, %v2938_v21  ;;  %v2939_v63 = vmul.f32 %v9937_v22, %v2798_v24  ;;  %v7448_v30 = vpop.f32.mrb[55].mxu0  ;;  %5037 = vmatprep.mubr.bf16.mxu1 %v10206_v2  ;;  %v3891_v46 = vshll.u32 %v10231_v58, 16  ;;  %v7682_v7 = vld [vmem:[%s11277_s4 + $0xe0] sm:$0xff]  }
 0x24a   : > { %3397 = vst [vmem:[#allocation2 + $0x60] sm:$0x1] %v3396_v48  ;;  %5038 = vmatmul.mubr.bf16.gmra.mrb[28].mxu1 %v10210_v60  ;;  %v3895_v61 = vshrl.u32 %v10231_v58, 16  ;;  %v7683_v62 = vld [vmem:[%s11277_s4 + $0xa0] sm:$0xff]   ;;  %7035 = vmatprep.subr.bf16.mxu1 %v7682_v7 }
 0x24b   : > { %v2999_v45 = vadd.f32 %v9954_v53, %v2939_v63  ;;  %5304 = vmatmul.mubr.bf16.vlgmr.msra.gmra.mrb[108].mxu0 %v9788_v16  ;;  %v3052_v14 = vmax.f32 %v2998_v52, 0.0  ;;  %v3893_v48 = vrot.slane %v3891_v46, 5  ;;  %7036 = vmatpush3.bf16.msra.mxu1 %v7683_v62 }
 0x24c   : > { %5311 = vmatprep.mubr.bf16.mxu0 %v9932_v34  ;;  %v3897_v52 = vrot.slane %v3895_v61, 4 }
 0x24d   : > { %v3053_v35 = vmax.f32 %v2999_v45, 0.0 }
 0x24e   : > { %v3898_v45 = vor.u32 %v3897_v52, %v3893_v48 }
 0x24f   : > { %v6697_v36 = vpack.c.bf16 %v3053_v35, %v3052_v14  ;;  %v4165_v14 = vrot.slane %v10120_v37, 5 }
 0x251   : > { %6856 = vst [vmem:[#allocation2 + $0x68] sm:$0xff] %v6697_v36   ;;  %v10228_v20 = vld [vmem:[#allocation2 + $0x60] sm:$0xf]  ;;  %v4167_v46 = vrot.slane %v4165_v14, 4 }
 0x252   : > { %v3882_v56 = vshrl.u32 %v10228_v20, 16  ;;  %v3885_v16 = vshll.u32 %v10228_v20, 16 }
 0x253   : > { %5312 = vmatmul.mubr.bf16.gmra.mrb[112].mxu0 %v9940_v23 }
 0x254   : > { %5319 = vmatprep.mubr.bf16.mxu0 %v9977_v19  ;;  %v3884_v43 = vrot.slane %v3882_v56, 4  ;;  %v3887_v21 = vrot.slane %v3885_v16, 5  ;;  %v4168_v56 = vrot.slane %v10148_v12, 5  ;;  %v3899_v16 = vrot.slane %v3898_v45, 4 }
 0x256   : > { %v2803_v11 = vpop.f32.mrb[56].mxu0  ;;  %v3888_v29 = vor.u32 %v3887_v21, %v3884_v43  ;;  %v4169_v12 = vsel %vm7800_vm2, %v4167_v46, %v4168_v56  ;;  %v10276_v43 = vcombine.low %v10228_v20, %v10231_v58 }
 0x257   : > { %v2940_v55 = vmul.f32 %v9937_v22, %v2803_v11  ;;  %v7451_v54 = vpop.f32.mrb[57].mxu0 }
 0x258   : > { %v3398_v38 = vld [vmem:[#allocation2 + $0x6c] sm:$0x1]  ;;  %v3452_v33 = vld [vmem:[#allocation2 + $0x68] sm:$0xf]  ;;  %v2806_v1 = vpop.f32.mrb[58].mxu0  ;;  %v3889_v36 = vrot.slane %v3888_v29, 4 }
 0x259   : > { %v3399_v4 = vsel %vm9432_vm4, 0, %v3398_v38  ;;  %v3453_v50 = vsel %vm9541_vm3, 0, %v3452_v33  ;;  %v3000_v40 = vadd.f32 %v9954_v53, %v2940_v55  ;;  %v2941_v6 = vmul.f32 %v9937_v22, %v2806_v1  ;;  %v7452_v39 = vpop.f32.mrb[59].mxu0 }
 0x25a   : > { %3400 = vst [vmem:[#allocation2 + $0x6c] sm:$0x1] %v3399_v4  ;;  %3454 = vst [vmem:[#allocation2 + $0x68] sm:$0xf] %v3453_v50  ;;  %v6368_v54 = vrot.slane %v10116_v28, 9  ;;  %v3894_v33 = vsel %vm7891_vm5, %v3889_v36, %v3893_v48  ;;  %v4172_v28 = vrot.slane %v10172_v57, 5 }
 0x25b   : > { %v3001_v24 = vadd.f32 %v9954_v53, %v2941_v6  ;;  %5320 = vmatmul.mubr.bf16.gmra.mrb[116].mxu0 %v9984_v15  ;;  %v3054_v63 = vmax.f32 %v3000_v40, 0.0 }
 0x25c   : > { %5327 = vmatprep.mubr.bf16.mxu0 %v10048_v17  ;;  %v4166_v21 = vsel %vm7800_vm2, %v6368_v54, %v4165_v14  ;;  %v4175_v14 = vrot.slane %v10195_v5, 5  ;;  %v4174_v46 = vrot.slane %v4172_v28, 4 }
 0x25d   : > { %v3055_v30 = vmax.f32 %v3001_v24, 0.0 }
 0x25f   : > { %v6702_v47 = vpack.c.bf16 %v3055_v30, %v3054_v63  ;;  %v10290_v30 = vcombine.low %v4166_v21, %v4169_v12 }
 0x261   : > { %6857 = vst [vmem:[#allocation2 + $0x70] sm:$0xff] %v6702_v47   ;;  %v10254_v35 = vld [vmem:[#allocation2 + $0x68] sm:$0xf]  ;;  %v10261_v38 = vld [vmem:[#allocation2 + $0x6c] sm:$0xf] }
 0x262   : > { %v3901_v11 = vshll.u32 %v10254_v35, 16  ;;  %v3906_v40 = vshrl.u32 %v10261_v38, 16  ;;  %v3909_v62 = vshll.u32 %v10261_v38, 16  ;;  %v7685_v47 = vld [vmem:[%s11277_s4 + $0xe8] sm:$0xff]  }
 0x263   : > { %5328 = vmatmul.mubr.bf16.gmra.mrb[120].mxu0 %v10051_v3  ;;  %7037 = vmatprep.subr.bf16.mxu1 %v7685_v47 }
 0x264   : > { %5335 = vmatprep.mubr.bf16.mxu0 %v10083_v59  ;;  %v3903_v55 = vrot.slane %v3901_v11, 5  ;;  %v3908_v36 = vrot.slane %v3906_v40, 4  ;;  %v3911_v11 = vrot.slane %v3909_v62, 5 }
 0x266   : > { %v2811_v37 = vpop.f32.mrb[60].mxu0  ;;  %v3904_v1 = vsel %vm7891_vm5, %v3899_v16, %v3903_v55 }
 0x267   : > { %v2942_v61 = vmul.f32 %v9937_v22, %v2811_v37  ;;  %v7455_v4 = vpop.f32.mrb[61].mxu0  ;;  %v10270_v50 = vcombine.low %v3894_v33, %v3904_v1  ;;  %v6369_v33 = vrot.slane %v10155_v25, 9  ;;  %v3912_v1 = vor.u32 %v3911_v11, %v3908_v36  ;;  %v10340_v11 = vld [vmem:[%s11276_s3] ss:$0 sm:$0xff] }
 0x268   : > { %v3455_v6 = vld [vmem:[#allocation2 + $0x74] sm:$0xf]  ;;  %v2814_v39 = vpop.f32.mrb[62].mxu0  ;;  %v10280_v7 = vld [vmem:[#allocation2 + $0x70] sm:$0xf]  ;;  %v4179_v4 = vrot.slane %v10231_v58, 5 }
 0x269   : > { %11310 = vst [vmem:[#allocation6_spill] sm:$0xff] %v10270_v50  ;;  %v3456_v24 = vsel %vm9541_vm3, 0, %v3455_v6  ;;  %v3002_v57 = vadd.f32 %v9954_v53, %v2942_v61  ;;  %v2943_v48 = vmul.f32 %v9937_v22, %v2814_v39  ;;  %v7456_v52 = vpop.f32.mrb[63].mxu0  ;;  %5045 = vmatprep.mubr.bf16.mxu1 %v10270_v50  ;;  %v3915_v63 = vshll.u32 %v10280_v7, 16  ;;  %v7686_v22 = vld [vmem:[%s11277_s4 + $0xa8] sm:$0xff]  }
 0x26a   : > { %3457 = vst [vmem:[#allocation2 + $0x74] sm:$0xf] %v3456_v24  ;;  %5046 = vmatmul.mubr.bf16.gmra.mrb[32].mxu1 %v10276_v43  ;;  %v3919_v29 = vshrl.u32 %v10280_v7, 16  ;;  %v4173_v5 = vsel %vm7800_vm2, %v6369_v33, %v4172_v28  ;;  %v4182_v39 = vrot.slane %v10254_v35, 5  ;;  %v3913_v25 = vrot.slane %v3912_v1, 4  ;;  %v7688_v33 = vld [vmem:[%s11277_s4 + $0xb0] sm:$0xff]  }
 0x26b   : > { %v3003_v45 = vadd.f32 %v9954_v53, %v2943_v48  ;;  %5336 = vmatmul.mubr.bf16.gmra.mrb[124].mxu0 %v10091_v44  ;;  %v3917_v56 = vrot.slane %v3915_v63, 5  ;;  %v3056_v55 = vmax.f32 %v3002_v57, 0.0  ;;  %7038 = vmatpush3.bf16.msra.mxu1 %v7686_v22  ;;  %v4176_v53 = vsel %vm7800_vm2, %v4174_v46, %v4175_v14  ;;  %v10322_v52 = vld [vmem:[%s11275_s2] ss:$0 sm:$0xff] }
 0x26c   : > { %5343 = vmatprep.mubr.bf16.mxu0 %v10290_v30  ;;  %v3921_v16 = vrot.slane %v3919_v29, 4  ;;  %v10309_v40 = vcombine.low %v4173_v5, %v4176_v53  ;;  %v6370_v24 = vrot.slane %v10228_v20, 9  ;;  %v4181_v57 = vrot.slane %v4179_v4, 4  ;;  %v7690_v53 = vld [vmem:[%s11277_s4 + $0xf8] sm:$0xff]  }
 0x26d   : > { %v3057_v54 = vmax.f32 %v3003_v45, 0.0  ;;  %v3918_v28 = vsel %vm7891_vm5, %v3913_v25, %v3917_v56  ;;  %v10331_v45 = vcombine.low %v10261_v38, %v10280_v7 }
 0x26e   : > { %v3922_v12 = vor.u32 %v3921_v16, %v3917_v56  ;;  %v4183_v20 = vsel %vm7800_vm2, %v4181_v57, %v4182_v39  ;;  %v4180_v14 = vsel %vm7800_vm2, %v6370_v24, %v4179_v4 }
 0x26f   : > { %v6707_v37 = vpack.c.bf16 %v3057_v54, %v3056_v55  ;;  %v4186_v54 = vrot.slane %v10280_v7, 5  ;;  %v10347_v46 = vcombine.low %v4180_v14, %v4183_v20 }
 0x270   : > { %v3923_v21 = vrot.slane %v3922_v12, 4 }
 0x271   : > { %6858 = vst [vmem:[#allocation2 + $0x78] sm:$0xff] %v6707_v37   ;;  %v3518_v61 = vld [vmem:[#allocation2 + $0x74] sm:$0xf]  ;;  %v4188_v4 = vrot.slane %v4186_v54, 4 }
 0x272   : > { %v3925_v6 = vshll.u32 %v3518_v61, 16  ;;  %v7687_v37 = vld [vmem:[%s11277_s4 + $0xf0] sm:$0xff]   ;;  %v4189_v7 = vrot.slane %v3518_v61, 5 }
 0x273   : > { %5344 = vmatmul.mubr.bf16.gmra.mrb[128].mxu0 %v10165_v9  ;;  %7039 = vmatprep.subr.bf16.mxu1 %v7687_v37 }
 0x274   : > { %5351 = vmatprep.mubr.bf16.mxu0 %v10309_v40  ;;  %v3927_v62 = vrot.slane %v3925_v6, 5  ;;  %7040 = vmatpush3.bf16.msra.mxu1 %v7688_v33  ;;  %v7691_v6 = vld [vmem:[%s11277_s4 + $0xb8] sm:$0xff]  }
 0x275   : > { %7041 = vmatprep.subr.bf16.mxu1 %v7690_v53 }
 0x276   : > { %v2819_v48 = vpop.f32.mrb[64].mxu0  ;;  %v3928_v58 = vsel %vm7891_vm5, %v3923_v21, %v3927_v62  ;;  %v6371_v21 = vrot.slane %v10261_v38, 9  ;;  %v4190_v62 = vsel %vm7800_vm2, %v4188_v4, %v4189_v7 }
 0x277   : > { %v2944_v35 = vmul.f32 %v10322_v52, %v2819_v48  ;;  %v7459_v63 = vpop.f32.mrb[65].mxu0  ;;  %v10325_v29 = vcombine.low %v3918_v28, %v3928_v58 }
 0x278   : > { %v3401_v47 = vld [vmem:[#allocation2 + $0x78] sm:$0x1]  ;;  %v2822_v22 = vpop.f32.mrb[66].mxu0  ;;  %v4187_v48 = vsel %vm7800_vm2, %v6371_v21, %v4186_v54  ;;  %7042 = vmatpush3.bf16.msra.mxu1 %v7691_v6  ;;  %v10379_v63 = vld [vmem:[#allocation2 + $0x7c] sm:$0xf] }
 0x279   : > { %11311 = vst [vmem:[#allocation7_spill] sm:$0xff] %v10325_v29  ;;  %v3402_v36 = vsel %vm9432_vm4, 0, %v3401_v47  ;;  %v3004_v56 = vadd.f32 %v10340_v11, %v2944_v35  ;;  %v2945_v16 = vmul.f32 %v10322_v52, %v2822_v22  ;;  %v7460_v55 = vpop.f32.mrb[67].mxu0  ;;  %5053 = vmatprep.mubr.bf16.mxu1 %v10325_v29  ;;  %v10371_v58 = vcombine.low %v4187_v48, %v4190_v62  ;;  %v7729_v21 = vld [vmem:[#allocation2] sm:$0xf] }
 0x27a   : > { %3403 = vst [vmem:[#allocation2 + $0x78] sm:$0x1] %v3402_v36  ;;  %5054 = vmatmul.mubr.bf16.gmra.mrb[36].mxu1 %v10331_v45  ;;  %v3943_v37 = vshrl.u32 %v10379_v63, 16  ;;  %v6362_v62 = vrot.slane %v7729_v21, 9 }
 0x27b   : > { %v3005_v1 = vadd.f32 %v10340_v11, %v2945_v16  ;;  %5352 = vmatmul.mubr.bf16.gmra.mrb[132].mxu0 %v10206_v2  ;;  %v3058_v12 = vmax.f32 %v3004_v56, 0.0  ;;  %v3939_v56 = vshll.u32 %v10379_v63, 16 }
 0x27c   : > { %5359 = vmatprep.mubr.bf16.mxu0 %v10347_v46 }
 0x27d   : > { %v3059_v5 = vmax.f32 %v3005_v1, 0.0 }
 0x27e   : > { %v6931_v39 = vpop.f32.mrb[0].mxu1 }
 0x27f   : > { %v6712_v25 = vpack.c.bf16 %v3059_v5, %v3058_v12  ;;  %v6932_v61 = vpop.f32.mrb[1].mxu1 }
 0x280   : > { %v10367_v24 = vadd.f32 %v6932_v61, %v6931_v39  ;;  %v6934_v57 = vpop.f32.mrb[2].mxu1  ;;  %v3941_v39 = vrot.slane %v3939_v56, 5 }
 0x281   : > { %6859 = vst [vmem:[#allocation2 + $0x80] sm:$0xff] %v6712_v25   ;;  %v6935_v28 = vpop.f32.mrb[3].mxu1  ;;  %v10376_v38 = vld [vmem:[#allocation2 + $0x78] sm:$0xf]  ;;  %v3945_v25 = vrot.slane %v3943_v37, 4 }
 0x282   : > { %11312 = vst [vmem:[#allocation8_spill] sm:$0xff] %v10367_v24  ;;  %v10373_v35 = vadd.f32 %v6935_v28, %v6934_v57  ;;  %v3930_v47 = vshrl.u32 %v10376_v38, 16  ;;  %v3933_v22 = vshll.u32 %v10376_v38, 16 }
 0x283   : > { %5360 = vmatmul.mubr.bf16.gmra.mrb[136].mxu0 %v10270_v50 }
 0x284   : > { %11313 = vst [vmem:[#allocation9_spill] sm:$0xff] %v10373_v35  ;;  %5367 = vmatprep.mubr.bf16.mxu0 %v10371_v58  ;;  %v3932_v5 = vrot.slane %v3930_v47, 4  ;;  %v3935_v4 = vrot.slane %v3933_v22, 5 }
 0x286   : > { %v2827_v20 = vpop.f32.mrb[68].mxu0 }
 0x287   : > { %v2946_v14 = vmul.f32 %v10322_v52, %v2827_v20  ;;  %v7463_v36 = vpop.f32.mrb[69].mxu0  ;;  %v4193_v20 = vrot.slane %v10379_v63, 5 }
 0x288   : > { %v3404_v16 = vld [vmem:[#allocation2 + $0x84] sm:$0x1]  ;;  %v3458_v55 = vld [vmem:[#allocation2 + $0x80] sm:$0xf]  ;;  %v2830_v54 = vpop.f32.mrb[70].mxu0 }
 0x289   : > { %v3405_v33 = vsel %vm9432_vm4, 0, %v3404_v16  ;;  %v3459_v53 = vsel %vm9541_vm3, 0, %v3458_v55  ;;  %v3006_v1 = vadd.f32 %v10340_v11, %v2946_v14  ;;  %v2947_v7 = vmul.f32 %v10322_v52, %v2830_v54  ;;  %v7464_v12 = vpop.f32.mrb[71].mxu0 }
 0x28a   : > { %3406 = vst [vmem:[#allocation2 + $0x84] sm:$0x1] %v3405_v33  ;;  %3460 = vst [vmem:[#allocation2 + $0x80] sm:$0xf] %v3459_v53  ;;  %v3936_v14 = vor.u32 %v3935_v4, %v3932_v5  ;;  %v6372_v55 = vrot.slane %v10376_v38, 9  ;;  %v3946_v54 = vor.u32 %v3945_v25, %v3941_v39  ;;  %v7694_v33 = vld [vmem:[%s11277_s4 + $0x200] sm:$0xff]  }
 0x28b   : > { %v3007_v6 = vadd.f32 %v10340_v11, %v2947_v7  ;;  %5368 = vmatmul.mubr.bf16.gmra.mrb[140].mxu0 %v10325_v29  ;;  %v3060_v61 = vmax.f32 %v3006_v1, 0.0  ;;  %v11316_v53 = vrot.slane %v9527_v41, 5  ;;  %v4195_v7 = vrot.slane %v4193_v20, 4  ;;  %7501 = vmatprep.subr.bf16.mxu0 %v7694_v33 }
 0x28c   : > { %v3937_v5 = vrot.slane %v3936_v14, 4  ;;  %v4194_v25 = vsel %vm7800_vm2, %v6372_v55, %v4193_v20  ;;  %7502 = vmatpush3.bf16.msra.mxu0 %v7694_v33 }
 0x28d   : > { %v3061_v57 = vmax.f32 %v3007_v6, 0.0  ;;  %v6937_v48 = vpop.f32.mrb[4].mxu1  ;;  %v10407_v1 = vsel %vm7800_vm2, %v6362_v62, %v11316_v53 }
 0x28e   : > { %v6938_v28 = vpop.f32.mrb[5].mxu1  ;;  %v3942_v14 = vsel %vm7891_vm5, %v3937_v5, %v3941_v39  ;;  %v10434_v39 = vcombine.low %v10376_v38, %v10379_v63 }
 0x28f   : > { %v6717_v36 = vpack.c.bf16 %v3061_v57, %v3060_v61  ;;  %v10395_v16 = vadd.f32 %v6938_v28, %v6937_v48  ;;  %v6940_v47 = vpop.f32.mrb[6].mxu1  ;;  %v3947_v61 = vrot.slane %v3946_v54, 4  ;;  %v7696_v48 = vld [vmem:[%s11277_s4 + $0x208] sm:$0xff]  }
 0x290   : > { %v6941_v22 = vpop.f32.mrb[7].mxu1  ;;  %7503 = vmatprep.subr.bf16.mxu0 %v7696_v48 }
 0x291   : > { %11314 = vst [vmem:[#allocation10_spill] sm:$0xff] %v10395_v16  ;;  %6860 = vst [vmem:[#allocation2 + $0x88] sm:$0xff] %v6717_v36   ;;  %v10398_v56 = vadd.f32 %v6941_v22, %v6940_v47  ;;  %v3521_v37 = vld [vmem:[#allocation2 + $0x80] sm:$0xf]  ;;  %v10415_v57 = vld [vmem:[#allocation2 + $0x84] sm:$0xf]  ;;  %7504 = vmatpush3.bf16.msra.mxu0 %v7696_v48 }
 0x292   : > { %v4196_v12 = vrot.slane %v3521_v37, 5  ;;  %v3949_v4 = vshll.u32 %v3521_v37, 16  ;;  %v3954_v55 = vshrl.u32 %v10415_v57, 16  ;;  %v3957_v54 = vshll.u32 %v10415_v57, 16  ;;  %v7693_v48 = vld [vmem:[%s11277_s4 + $0x1c0] sm:$0xff]  }
 0x293   : > { %11315 = vst [vmem:[#allocation11_spill] sm:$0xff] %v10398_v56  ;;  %7251 = vmatprep.subr.bf16.mxu1 %v7693_v48 }
 0x294   : > { %v4197_v21 = vsel %vm7800_vm2, %v4195_v7, %v4196_v12  ;;  %v3951_v41 = vrot.slane %v3949_v4, 5 }
 0x295   : > { %v10417_v62 = vcombine.low %v4194_v25, %v4197_v21  ;;  %v7697_v25 = vld [vmem:[%s11277_s4 + $0x210] sm:$0xff]  }
 0x296   : > { %v2835_v28 = vpop.f32.mrb[72].mxu0  ;;  %v3952_v20 = vsel %vm7891_vm5, %v3947_v61, %v3951_v41  ;;  %v3956_v61 = vrot.slane %v3954_v55, 4  ;;  %v3959_v41 = vrot.slane %v3957_v54, 5  ;;  %7505 = vmatprep.subr.bf16.mxu0 %v7697_v25 }
 0x297   : > { %v2948_v36 = vmul.f32 %v10322_v52, %v2835_v28  ;;  %v7467_v47 = vpop.f32.mrb[73].mxu0  ;;  %5375 = vmatprep.mubr.bf16.mxu0 %v10417_v62  ;;  %v10428_v22 = vcombine.low %v3942_v14, %v3952_v20  ;;  %7506 = vmatpush3.bf16.msra.mxu0 %v7697_v25 }
 0x298   : > { %v3461_v37 = vld [vmem:[#allocation2 + $0x8c] sm:$0xf]  ;;  %v2838_v33 = vpop.f32.mrb[74].mxu0  ;;  %v3523_v53 = vld [vmem:[#allocation2 + $0x88] sm:$0xf]  ;;  %v7698_v47 = vld [vmem:[%s11277_s4 + $0x218] sm:$0xff]  }
 0x299   : > { %11317 = vst [vmem:[#allocation12_spill] sm:$0xff] %v10428_v22  ;;  %v3462_v7 = vsel %vm9541_vm3, 0, %v3461_v37  ;;  %v3008_v12 = vadd.f32 %v10340_v11, %v2948_v36  ;;  %v2949_v5 = vmul.f32 %v10322_v52, %v2838_v33  ;;  %v7468_v4 = vpop.f32.mrb[75].mxu0  ;;  %5061 = vmatprep.mubr.bf16.mxu1 %v10428_v22  ;;  %5376 = vmatmul.mubr.bf16.gmra.mrb[144].mxu0 %v10428_v22  ;;  %v3963_v38 = vshll.u32 %v3523_v53, 16 }
 0x29a   : > { %3463 = vst [vmem:[#allocation2 + $0x8c] sm:$0xf] %v3462_v7  ;;  %5062 = vmatmul.mubr.bf16.gmra.mrb[40].mxu1 %v10434_v39  ;;  %v3967_v63 = vshrl.u32 %v3523_v53, 16  ;;  %v4200_v37 = vrot.slane %v3523_v53, 5  ;;  %v3960_v7 = vor.u32 %v3959_v41, %v3956_v61  ;;  %7507 = vmatprep.subr.bf16.mxu0 %v7698_v47 }
 0x29b   : > { %v3009_v21 = vadd.f32 %v10340_v11, %v2949_v5  ;;  %v3965_v28 = vrot.slane %v3963_v38, 5  ;;  %v3062_v20 = vmax.f32 %v3008_v12, 0.0  ;;  %7508 = vmatpush3.bf16.msra.mxu0 %v7698_v47  ;;  %v7700_v5 = vld [vmem:[%s11277_s4 + $0x220] sm:$0xff]   ;;  %v6373_v12 = vrot.slane %v10415_v57, 9 }
 0x29c   : > { %v3969_v14 = vrot.slane %v3967_v63, 4  ;;  %v4202_v4 = vrot.slane %v4200_v37, 4  ;;  %v3961_v63 = vrot.slane %v3960_v7, 4  ;;  %7509 = vmatprep.subr.bf16.mxu0 %v7700_v5 }
 0x29d   : > { %v3063_v36 = vmax.f32 %v3009_v21, 0.0  ;;  %v4201_v21 = vsel %vm7800_vm2, %v6373_v12, %v4200_v37  ;;  %v10475_v12 = vcombine.low %v10415_v57, %v3523_v53  ;;  %v7704_v53 = vld [vmem:[%s11277_s4 + $0x238] sm:$0xff]  }
 0x29e   : > { %v3970_v55 = vor.u32 %v3969_v14, %v3965_v28  ;;  %v3966_v47 = vsel %vm7891_vm5, %v3961_v63, %v3965_v28  ;;  %v7703_v63 = vld [vmem:[%s11277_s4 + $0x230] sm:$0xff]  }
 0x29f   : > { %v6722_v33 = vpack.c.bf16 %v3063_v36, %v3062_v20  ;;  %7510 = vmatpush3.bf16.msra.mxu0 %v7700_v5  ;;  %v7702_v20 = vld [vmem:[%s11277_s4 + $0x228] sm:$0xff]  }
 0x2a0   : > { %v3971_v41 = vrot.slane %v3970_v55, 4  ;;  %7511 = vmatprep.subr.bf16.mxu0 %v7702_v20 }
 0x2a1   : > { %6861 = vst [vmem:[#allocation2 + $0x90] sm:$0xff] %v6722_v33   ;;  %v3524_v54 = vld [vmem:[#allocation2 + $0x8c] sm:$0xf] }
 0x2a2   : > { %v4203_v25 = vrot.slane %v3524_v54, 5  ;;  %v3973_v38 = vshll.u32 %v3524_v54, 16 }
 0x2a3   : > { %7512 = vmatpush3.bf16.msra.mxu0 %v7702_v20 }
 0x2a4   : > { %v4204_v61 = vsel %vm7800_vm2, %v4202_v4, %v4203_v25  ;;  %v3975_v48 = vrot.slane %v3973_v38, 5  ;;  %7513 = vmatprep.subr.bf16.mxu0 %v7703_v63 }
 0x2a5   : > { %v10461_v14 = vcombine.low %v4201_v21, %v4204_v61 }
 0x2a6   : > { %v2843_v36 = vpop.f32.mrb[76].mxu0  ;;  %v3976_v33 = vsel %vm7891_vm5, %v3971_v41, %v3975_v48 }
 0x2a7   : > { %v2950_v37 = vmul.f32 %v10322_v52, %v2843_v36  ;;  %v7471_v7 = vpop.f32.mrb[77].mxu0  ;;  %5383 = vmatprep.mubr.bf16.mxu0 %v10461_v14  ;;  %v10472_v55 = vcombine.low %v3966_v47, %v3976_v33  ;;  %7514 = vmatpush3.bf16.msra.mxu0 %v7703_v63 }
 0x2a8   : > { %v3407_v54 = vld [vmem:[#allocation2 + $0x90] sm:$0x1]  ;;  %v2846_v5 = vpop.f32.mrb[78].mxu0  ;;  %7515 = vmatprep.subr.bf16.mxu0 %v7704_v53 }
 0x2a9   : > { %11318 = vst [vmem:[#allocation13_spill] sm:$0xff] %v10472_v55  ;;  %v3408_v28 = vsel %vm9432_vm4, 0, %v3407_v54  ;;  %v3010_v4 = vadd.f32 %v10340_v11, %v2950_v37  ;;  %v2951_v25 = vmul.f32 %v10322_v52, %v2846_v5  ;;  %v7472_v38 = vpop.f32.mrb[79].mxu0  ;;  %5069 = vmatprep.mubr.bf16.mxu1 %v10472_v55  ;;  %5384 = vmatmul.mubr.bf16.gmra.mrb[148].mxu0 %v10472_v55  ;;  %v3526_v54 = vld [vmem:[#allocation2 + $0x94] sm:$0xf] }
 0x2aa   : > { %3409 = vst [vmem:[#allocation2 + $0x90] sm:$0x1] %v3408_v28  ;;  %5070 = vmatmul.mubr.bf16.gmra.mrb[44].mxu1 %v10475_v12  ;;  %v3987_v63 = vshll.u32 %v3526_v54, 16  ;;  %v4207_v24 = vrot.slane %v3526_v54, 5 }
 0x2ab   : > { %v3011_v57 = vadd.f32 %v10340_v11, %v2951_v25  ;;  %v3064_v21 = vmax.f32 %v3010_v4, 0.0  ;;  %7516 = vmatpush3.bf16.msra.mxu0 %v7704_v53 }
 0x2ad   : > { %v3065_v61 = vmax.f32 %v3011_v57, 0.0  ;;  %v6943_v41 = vpop.f32.mrb[8].mxu1 }
 0x2ae   : > { %v6944_v48 = vpop.f32.mrb[9].mxu1 }
 0x2af   : > { %v6727_v20 = vpack.c.bf16 %v3065_v61, %v3064_v21  ;;  %v10491_v36 = vadd.f32 %v6944_v48, %v6943_v41  ;;  %v6946_v47 = vpop.f32.mrb[10].mxu1  ;;  %v3991_v61 = vshrl.u32 %v3526_v54, 16 }
 0x2b0   : > { %v6947_v33 = vpop.f32.mrb[11].mxu1 }
 0x2b1   : > { %11319 = vst [vmem:[#allocation14_spill] sm:$0xff] %v10491_v36  ;;  %6862 = vst [vmem:[#allocation2 + $0x98] sm:$0xff] %v6727_v20   ;;  %v10493_v37 = vadd.f32 %v6947_v33, %v6946_v47  ;;  %v3525_v7 = vld [vmem:[#allocation2 + $0x90] sm:$0xf]  ;;  %v3993_v36 = vrot.slane %v3991_v61, 4 }
 0x2b2   : > { %v3978_v28 = vshrl.u32 %v3525_v7, 16  ;;  %v3981_v25 = vshll.u32 %v3525_v7, 16 }
 0x2b3   : > { %11320 = vst [vmem:[#allocation15_spill] sm:$0xff] %v10493_v37  ;;  %v3989_v37 = vrot.slane %v3987_v63, 5 }
 0x2b4   : > { %v3980_v33 = vrot.slane %v3978_v28, 4 }
 0x2b6   : > { %v2851_v5 = vpop.f32.mrb[80].mxu0 }
 0x2b7   : > { %v2952_v4 = vmul.f32 %v10322_v52, %v2851_v5  ;;  %v7475_v38 = vpop.f32.mrb[81].mxu0  ;;  %v3983_v5 = vrot.slane %v3981_v25, 5 }
 0x2b8   : > { %v3410_v57 = vld [vmem:[#allocation2 + $0x9c] sm:$0x1]  ;;  %v3464_v6 = vld [vmem:[#allocation2 + $0x98] sm:$0xf]  ;;  %v2854_v21 = vpop.f32.mrb[82].mxu0 }
 0x2b9   : > { %v3411_v41 = vsel %vm9432_vm4, 0, %v3410_v57  ;;  %v3465_v53 = vsel %vm9541_vm3, 0, %v3464_v6  ;;  %v3012_v48 = vadd.f32 %v10340_v11, %v2952_v4  ;;  %v2953_v20 = vmul.f32 %v10322_v52, %v2854_v21  ;;  %v7476_v47 = vpop.f32.mrb[83].mxu0 }
 0x2ba   : > { %3412 = vst [vmem:[#allocation2 + $0x9c] sm:$0x1] %v3411_v41  ;;  %3466 = vst [vmem:[#allocation2 + $0x98] sm:$0xf] %v3465_v53  ;;  %v3984_v55 = vor.u32 %v3983_v5, %v3980_v33  ;;  %v6374_v47 = vrot.slane %v3525_v7, 9  ;;  %v3994_v41 = vor.u32 %v3993_v36, %v3989_v37  ;;  %v4209_v53 = vrot.slane %v4207_v24, 4 }
 0x2bb   : > { %v3013_v38 = vadd.f32 %v10340_v11, %v2953_v20  ;;  %v3066_v56 = vmax.f32 %v3012_v48, 0.0 }
 0x2bc   : > { %v3985_v61 = vrot.slane %v3984_v55, 4  ;;  %v4208_v20 = vsel %vm7800_vm2, %v6374_v47, %v4207_v24 }
 0x2bd   : > { %v3067_v16 = vmax.f32 %v3013_v38, 0.0  ;;  %v6949_v35 = vpop.f32.mrb[12].mxu1 }
 0x2be   : > { %v6950_v57 = vpop.f32.mrb[13].mxu1  ;;  %v3990_v38 = vsel %vm7891_vm5, %v3985_v61, %v3989_v37 }
 0x2bf   : > { %v6732_v6 = vpack.c.bf16 %v3067_v16, %v3066_v56  ;;  %v10503_v22 = vadd.f32 %v6950_v57, %v6949_v35  ;;  %v6952_v4 = vpop.f32.mrb[14].mxu1  ;;  %v3995_v35 = vrot.slane %v3994_v41, 4 }
 0x2c0   : > { %v6953_v21 = vpop.f32.mrb[15].mxu1 }
 0x2c1   : > { %11321 = vst [vmem:[#allocation16_spill] sm:$0xff] %v10503_v22  ;;  %6863 = vst [vmem:[#allocation2 + $0xa0] sm:$0xff] %v6732_v6   ;;  %v10505_v28 = vadd.f32 %v6953_v21, %v6952_v4  ;;  %v3527_v25 = vld [vmem:[#allocation2 + $0x98] sm:$0xf]  ;;  %v3528_v33 = vld [vmem:[#allocation2 + $0x9c] sm:$0xf] }
 0x2c2   : > { %v4210_v63 = vrot.slane %v3527_v25, 5  ;;  %v3997_v48 = vshll.u32 %v3527_v25, 16  ;;  %v4002_v4 = vshrl.u32 %v3528_v33, 16  ;;  %v4005_v21 = vshll.u32 %v3528_v33, 16 }
 0x2c3   : > { %11322 = vst [vmem:[#allocation17_spill] sm:$0xff] %v10505_v28  ;;  %v10521_v25 = vcombine.low %v3525_v7, %v3526_v54  ;;  %v6375_v28 = vrot.slane %v3528_v33, 9 }
 0x2c4   : > { %v4211_v16 = vsel %vm7800_vm2, %v4209_v53, %v4210_v63  ;;  %v3999_v56 = vrot.slane %v3997_v48, 5  ;;  %v4004_v54 = vrot.slane %v4002_v4, 4 }
 0x2c5   : > { %v10511_v5 = vcombine.low %v4208_v20, %v4211_v16 }
 0x2c6   : > { %v2859_v36 = vpop.f32.mrb[84].mxu0  ;;  %v4000_v57 = vsel %vm7891_vm5, %v3995_v35, %v3999_v56  ;;  %v4007_v35 = vrot.slane %v4005_v21, 5 }
 0x2c7   : > { %v2954_v55 = vmul.f32 %v10322_v52, %v2859_v36  ;;  %v7479_v6 = vpop.f32.mrb[85].mxu0  ;;  %5391 = vmatprep.mubr.bf16.mxu0 %v10511_v5  ;;  %v10519_v24 = vcombine.low %v3990_v38, %v4000_v57 }
 0x2c8   : > { %v3467_v47 = vld [vmem:[#allocation2 + $0xa4] sm:$0xf]  ;;  %v2862_v41 = vpop.f32.mrb[86].mxu0  ;;  %v3529_v53 = vld [vmem:[#allocation2 + $0xa0] sm:$0xf] }
 0x2c9   : > { %11323 = vst [vmem:[#allocation18_spill] sm:$0xff] %v10519_v24  ;;  %v3468_v37 = vsel %vm9541_vm3, 0, %v3467_v47  ;;  %v3014_v63 = vadd.f32 %v10340_v11, %v2954_v55  ;;  %v2955_v61 = vmul.f32 %v10322_v52, %v2862_v41  ;;  %v7480_v48 = vpop.f32.mrb[87].mxu0  ;;  %5077 = vmatprep.mubr.bf16.mxu1 %v10519_v24  ;;  %5392 = vmatmul.mubr.bf16.gmra.mrb[152].mxu0 %v10519_v24  ;;  %v4011_v20 = vshll.u32 %v3529_v53, 16 }
 0x2ca   : > { %3469 = vst [vmem:[#allocation2 + $0xa4] sm:$0xf] %v3468_v37  ;;  %5078 = vmatmul.mubr.bf16.gmra.mrb[48].mxu1 %v10521_v25  ;;  %v4015_v16 = vshrl.u32 %v3529_v53, 16  ;;  %v4214_v55 = vrot.slane %v3529_v53, 5  ;;  %v4008_v47 = vor.u32 %v4007_v35, %v4004_v54 }
 0x2cb   : > { %v3015_v7 = vadd.f32 %v10340_v11, %v2955_v61  ;;  %v4013_v56 = vrot.slane %v4011_v20, 5  ;;  %v3068_v38 = vmax.f32 %v3014_v63, 0.0 }
 0x2cc   : > { %v4017_v36 = vrot.slane %v4015_v16, 4  ;;  %v4216_v37 = vrot.slane %v4214_v55, 4  ;;  %v4009_v29 = vrot.slane %v4008_v47, 4  ;;  %v4215_v61 = vsel %vm7800_vm2, %v6375_v28, %v4214_v55 }
 0x2cd   : > { %v3069_v57 = vmax.f32 %v3015_v7, 0.0 }
 0x2ce   : > { %v4018_v41 = vor.u32 %v4017_v36, %v4013_v56  ;;  %v4014_v7 = vsel %vm7891_vm5, %v4009_v29, %v4013_v56 }
 0x2cf   : > { %v6737_v6 = vpack.c.bf16 %v3069_v57, %v3068_v38  ;;  %v10545_v57 = vcombine.low %v3528_v33, %v3529_v53 }
 0x2d0   : > { %v4019_v21 = vrot.slane %v4018_v41, 4 }
 0x2d1   : > { %6864 = vst [vmem:[#allocation2 + $0xa8] sm:$0xff] %v6737_v6   ;;  %v3530_v48 = vld [vmem:[#allocation2 + $0xa4] sm:$0xf] }
 0x2d2   : > { %v4217_v22 = vrot.slane %v3530_v48, 5  ;;  %v4021_v24 = vshll.u32 %v3530_v48, 16 }
 0x2d4   : > { %v4218_v4 = vsel %vm7800_vm2, %v4216_v37, %v4217_v22  ;;  %v4023_v63 = vrot.slane %v4021_v24, 5 }
 0x2d5   : > { %v10535_v20 = vcombine.low %v4215_v61, %v4218_v4 }
 0x2d6   : > { %v2867_v16 = vpop.f32.mrb[88].mxu0  ;;  %v4024_v54 = vsel %vm7891_vm5, %v4019_v21, %v4023_v63 }
 0x2d7   : > { %v2956_v35 = vmul.f32 %v10322_v52, %v2867_v16  ;;  %v7483_v36 = vpop.f32.mrb[89].mxu0  ;;  %5399 = vmatprep.mubr.bf16.mxu0 %v10535_v20  ;;  %v10543_v28 = vcombine.low %v4014_v7, %v4024_v54 }
 0x2d8   : > { %v3413_v38 = vld [vmem:[#allocation2 + $0xa8] sm:$0x1]  ;;  %v2870_v22 = vpop.f32.mrb[90].mxu0  ;;  %v3532_v16 = vld [vmem:[#allocation2 + $0xac] sm:$0xf] }
 0x2d9   : > { %11324 = vst [vmem:[#allocation19_spill] sm:$0xff] %v10543_v28  ;;  %v3414_v24 = vsel %vm9432_vm4, 0, %v3413_v38  ;;  %v3016_v55 = vadd.f32 %v10340_v11, %v2956_v35  ;;  %v2957_v29 = vmul.f32 %v10322_v52, %v2870_v22  ;;  %v7484_v56 = vpop.f32.mrb[91].mxu0  ;;  %5085 = vmatprep.mubr.bf16.mxu1 %v10543_v28  ;;  %5400 = vmatmul.mubr.bf16.gmra.mrb[156].mxu0 %v10543_v28  ;;  %v4035_v22 = vshll.u32 %v3532_v16, 16 }
 0x2da   : > { %3415 = vst [vmem:[#allocation2 + $0xa8] sm:$0x1] %v3414_v24  ;;  %5086 = vmatmul.mubr.bf16.gmra.mrb[52].mxu1 %v10545_v57  ;;  %v4039_v56 = vshrl.u32 %v3532_v16, 16  ;;  %v4221_v50 = vrot.slane %v3532_v16, 5 }
 0x2db   : > { %v3017_v6 = vadd.f32 %v10340_v11, %v2957_v29  ;;  %v3070_v47 = vmax.f32 %v3016_v55, 0.0 }
 0x2dd   : > { %v3071_v33 = vmax.f32 %v3017_v6, 0.0  ;;  %v6955_v53 = vpop.f32.mrb[16].mxu1 }
 0x2de   : > { %v6956_v41 = vpop.f32.mrb[17].mxu1 }
 0x2df   : > { %v6742_v48 = vpack.c.bf16 %v3071_v33, %v3070_v47  ;;  %v10555_v37 = vadd.f32 %v6956_v41, %v6955_v53  ;;  %v6958_v61 = vpop.f32.mrb[18].mxu1 }
 0x2e0   : > { %v6959_v4 = vpop.f32.mrb[19].mxu1 }
 0x2e1   : > { %11325 = vst [vmem:[#allocation20_spill] sm:$0xff] %v10555_v37  ;;  %6865 = vst [vmem:[#allocation2 + $0xb0] sm:$0xff] %v6742_v48   ;;  %v10557_v21 = vadd.f32 %v6959_v4, %v6958_v61  ;;  %v3531_v63 = vld [vmem:[#allocation2 + $0xa8] sm:$0xf] }
 0x2e2   : > { %v4026_v54 = vshrl.u32 %v3531_v63, 16  ;;  %v4029_v35 = vshll.u32 %v3531_v63, 16 }
 0x2e3   : > { %11326 = vst [vmem:[#allocation21_spill] sm:$0xff] %v10557_v21 }
 0x2e4   : > { %v4028_v48 = vrot.slane %v4026_v54, 4  ;;  %v4031_v61 = vrot.slane %v4029_v35, 5 }
 0x2e6   : > { %v2875_v7 = vpop.f32.mrb[92].mxu0  ;;  %v4032_v2 = vor.u32 %v4031_v61, %v4028_v48 }
 0x2e7   : > { %v2958_v36 = vmul.f32 %v10322_v52, %v2875_v7  ;;  %v7487_v38 = vpop.f32.mrb[93].mxu0  ;;  %v4037_v7 = vrot.slane %v4035_v22, 5 }
 0x2e8   : > { %v3416_v24 = vld [vmem:[#allocation2 + $0xb4] sm:$0x1]  ;;  %v3470_v55 = vld [vmem:[#allocation2 + $0xb0] sm:$0xf]  ;;  %v2878_v29 = vpop.f32.mrb[94].mxu0  ;;  %v4041_v38 = vrot.slane %v4039_v56, 4 }
 0x2e9   : > { %v3417_v6 = vsel %vm9432_vm4, 0, %v3416_v24  ;;  %v3471_v47 = vsel %vm9541_vm3, 0, %v3470_v55  ;;  %v3018_v33 = vadd.f32 %v10340_v11, %v2958_v36  ;;  %v2959_v53 = vmul.f32 %v10322_v52, %v2878_v29  ;;  %v7488_v41 = vpop.f32.mrb[95].mxu0 }
 0x2ea   : > { %3418 = vst [vmem:[#allocation2 + $0xb4] sm:$0x1] %v3417_v6  ;;  %3472 = vst [vmem:[#allocation2 + $0xb0] sm:$0xf] %v3471_v47  ;;  %v6376_v41 = vrot.slane %v3531_v63, 9  ;;  %v4042_v6 = vor.u32 %v4041_v38, %v4037_v7  ;;  %v4223_v47 = vrot.slane %v4221_v50, 4 }
 0x2eb   : > { %v3019_v4 = vadd.f32 %v10340_v11, %v2959_v53  ;;  %v3072_v21 = vmax.f32 %v3018_v33, 0.0  ;;  %v4033_v56 = vrot.slane %v4032_v2, 4 }
 0x2ec   : > { %v4222_v53 = vsel %vm7800_vm2, %v6376_v41, %v4221_v50 }
 0x2ed   : > { %v3073_v37 = vmax.f32 %v3019_v4, 0.0  ;;  %v6961_v28 = vpop.f32.mrb[20].mxu1  ;;  %v4038_v4 = vsel %vm7891_vm5, %v4033_v56, %v4037_v7 }
 0x2ee   : > { %v6962_v24 = vpop.f32.mrb[21].mxu1 }
 0x2ef   : > { %v6747_v55 = vpack.c.bf16 %v3073_v37, %v3072_v21  ;;  %v10567_v9 = vadd.f32 %v6962_v24, %v6961_v28  ;;  %v6964_v36 = vpop.f32.mrb[22].mxu1  ;;  %v4043_v28 = vrot.slane %v4042_v6, 4  ;;  %v10585_v6 = vcombine.low %v3531_v63, %v3532_v16 }
 0x2f0   : > { %v6965_v29 = vpop.f32.mrb[23].mxu1 }
 0x2f1   : > { %11327 = vst [vmem:[#allocation22_spill] sm:$0xff] %v10567_v9  ;;  %6866 = vst [vmem:[#allocation2 + $0xb8] sm:$0xff] %v6747_v55   ;;  %v10569_v54 = vadd.f32 %v6965_v29, %v6964_v36  ;;  %v3533_v35 = vld [vmem:[#allocation2 + $0xb0] sm:$0xf]  ;;  %v3534_v48 = vld [vmem:[#allocation2 + $0xb4] sm:$0xf] }
 0x2f2   : > { %v4224_v22 = vrot.slane %v3533_v35, 5  ;;  %v4045_v33 = vshll.u32 %v3533_v35, 16  ;;  %v4050_v36 = vshrl.u32 %v3534_v48, 16  ;;  %v4053_v29 = vshll.u32 %v3534_v48, 16 }
 0x2f3   : > { %11328 = vst [vmem:[#allocation23_spill] sm:$0xff] %v10569_v54 }
 0x2f4   : > { %v4225_v37 = vsel %vm7800_vm2, %v4223_v47, %v4224_v22  ;;  %v4047_v21 = vrot.slane %v4045_v33, 5 }
 0x2f5   : > { %v10575_v61 = vcombine.low %v4222_v53, %v4225_v37 }
 0x2f6   : > { %v4048_v38 = vsel %vm7891_vm5, %v4043_v28, %v4047_v21  ;;  %v2883_v24 = vpop.f32.mrb[96].mxu0  ;;  %v4052_v28 = vrot.slane %v4050_v36, 4  ;;  %v4055_v21 = vrot.slane %v4053_v29, 5 }
 0x2f7   : > { %5407 = vmatprep.mubr.bf16.mxu0 %v10575_v61  ;;  %v10582_v2 = vcombine.low %v4038_v4, %v4048_v38  ;;  %v2960_v50 = vmul.f32 %v10322_v52, %v2883_v24  ;;  %v7491_v55 = vpop.f32.mrb[97].mxu0 }
 0x2f8   : > { %v3473_v41 = vld [vmem:[#allocation2 + $0xbc] sm:$0xf]  ;;  %v2886_v35 = vpop.f32.mrb[98].mxu0  ;;  %v3535_v47 = vld [vmem:[#allocation2 + $0xb8] sm:$0xf]  ;;  %v4056_v54 = vor.u32 %v4055_v21, %v4052_v28 }
 0x2f9   : > { %11329 = vst [vmem:[#allocation24_spill] sm:$0xff] %v10582_v2  ;;  %v3474_v7 = vsel %vm9541_vm3, 0, %v3473_v41  ;;  %5093 = vmatprep.mubr.bf16.mxu1 %v10582_v2  ;;  %5408 = vmatmul.mubr.bf16.gmra.mrb[160].mxu0 %v10582_v2  ;;  %v3020_v22 = vadd.f32 %v10340_v11, %v2960_v50  ;;  %v2961_v56 = vmul.f32 %v10322_v52, %v2886_v35  ;;  %v7492_v33 = vpop.f32.mrb[99].mxu0  ;;  %v4059_v53 = vshll.u32 %v3535_v47, 16 }
 0x2fa   : > { %3475 = vst [vmem:[#allocation2 + $0xbc] sm:$0xf] %v3474_v7  ;;  %5094 = vmatmul.mubr.bf16.gmra.mrb[56].mxu1 %v10585_v6  ;;  %v4063_v63 = vshrl.u32 %v3535_v47, 16  ;;  %v4228_v55 = vrot.slane %v3535_v47, 5  ;;  %v6377_v33 = vrot.slane %v3534_v48, 9  ;;  %v4057_v44 = vrot.slane %v4056_v54, 4 }
 0x2fb   : > { %v3074_v16 = vmax.f32 %v3020_v22, 0.0  ;;  %v3021_v37 = vadd.f32 %v10340_v11, %v2961_v56  ;;  %v4061_v4 = vrot.slane %v4059_v53, 5 }
 0x2fc   : > { %v4065_v38 = vrot.slane %v4063_v63, 4  ;;  %v4230_v7 = vrot.slane %v4228_v55, 4  ;;  %v4229_v22 = vsel %vm7800_vm2, %v6377_v33, %v4228_v55 }
 0x2fd   : > { %v3075_v24 = vmax.f32 %v3021_v37, 0.0 }
 0x2fe   : > { %v4066_v50 = vor.u32 %v4065_v38, %v4061_v4 }
 0x2ff   : > { %v6752_v41 = vpack.c.bf16 %v3075_v24, %v3074_v16  ;;  %v4062_v16 = vsel %vm7891_vm5, %v4057_v44, %v4061_v4  ;;  %v10609_v24 = vcombine.low %v3534_v48, %v3535_v47 }
 0x300   : > { %v4067_v29 = vrot.slane %v4066_v50, 4 }
 0x301   : > { %6867 = vst [vmem:[#allocation2 + $0xc0] sm:$0xff] %v6752_v41   ;;  %v3536_v35 = vld [vmem:[#allocation2 + $0xbc] sm:$0xf] }
 0x302   : > { %v4231_v9 = vrot.slane %v3536_v35, 5  ;;  %v4069_v2 = vshll.u32 %v3536_v35, 16 }
 0x304   : > { %v4232_v36 = vsel %vm7800_vm2, %v4230_v7, %v4231_v9  ;;  %v4071_v56 = vrot.slane %v4069_v2, 5 }
 0x305   : > { %v10599_v53 = vcombine.low %v4229_v22, %v4232_v36  ;;  %v7695_v36 = vld [vmem:[%s11277_s4 + $0x180] sm:$0xff]  }
 0x306   : > { %v2891_v63 = vpop.f32.mrb[100].mxu0  ;;  %v4072_v37 = vsel %vm7891_vm5, %v4067_v29, %v4071_v56  ;;  %v7699_v56 = vld [vmem:[%s11277_s4 + $0x1c8] sm:$0xff]  }
 0x307   : > { %v2962_v28 = vmul.f32 %v10322_v52, %v2891_v63  ;;  %v7495_v54 = vpop.f32.mrb[101].mxu0  ;;  %5415 = vmatprep.mubr.bf16.mxu0 %v10599_v53  ;;  %v10607_v21 = vcombine.low %v4062_v16, %v4072_v37  ;;  %v11330_v37 = vcombine.low %v10407_v1, %v9654_v31  ;;  %v7705_v1 = vld [vmem:[%s11277_s4 + $0x1d0] sm:$0xff]  }
 0x308   : > { %v3419_v38 = vld [vmem:[#allocation2 + $0xc0] sm:$0x1]  ;;  %v2894_v9 = vpop.f32.mrb[102].mxu0  ;;  %v10628_v63 = vld [vmem:[#allocation2 + $0xc4] sm:$0xf]  ;;  %v7701_v54 = vld [vmem:[%s11277_s4 + $0x188] sm:$0xff]  }
 0x309   : > { %v3420_v2 = vsel %vm9432_vm4, 0, %v3419_v38  ;;  %v3022_v55 = vadd.f32 %v10340_v11, %v2962_v28  ;;  %v2963_v44 = vmul.f32 %v10322_v52, %v2894_v9  ;;  %5101 = vmatprep.mubr.bf16.mxu1 %v10607_v21  ;;  %5416 = vmatmul.mubr.bf16.gmra.mrb[164].mxu0 %v10607_v21  ;;  %v7496_v4 = vpop.f32.mrb[103].mxu0  ;;  %v4243_v9 = vshll.u32 %v10628_v63, 16 }
 0x30a   : > { %3421 = vst [vmem:[#allocation2 + $0xc0] sm:$0x1] %v3420_v2  ;;  %5102 = vmatmul.mubr.bf16.gmra.mrb[60].mxu1 %v10609_v24  ;;  %v4247_v2 = vshrl.u32 %v10628_v63, 16 }
 0x30b   : > { %v3076_v41 = vmax.f32 %v3022_v55, 0.0  ;;  %v3023_v50 = vadd.f32 %v10340_v11, %v2963_v44  ;;  %5142 = vmatprep.mubr.bf16.mxu1 %v9799_v8 }
 0x30d   : > { %v3077_v48 = vmax.f32 %v3023_v50, 0.0  ;;  %v6967_v47 = vpop.f32.mrb[24].mxu1  ;;  %v10653_v50 = vrot.slane %v4243_v9, 5 }
 0x30e   : > { %v6968_v35 = vpop.f32.mrb[25].mxu1 }
 0x30f   : > { %v6757_v33 = vpack.c.bf16 %v3077_v48, %v3076_v41  ;;  %v10620_v7 = vadd.f32 %v6968_v35, %v6967_v47  ;;  %v6970_v22 = vpop.f32.mrb[26].mxu1  ;;  %v4249_v48 = vrot.slane %v4247_v2, 4  ;;  %v7706_v47 = vld [vmem:[%s11277_s4 + $0x190] sm:$0xff]   ;;  %v7707_v35 = vld [vmem:[%s11277_s4 + $0x1d8] sm:$0xff]   ;;  %v11331_v2 = vmov 0  }
 0x310   : > { %v6971_v29 = vpop.f32.mrb[27].mxu1 }
 0x311   : > { %6868 = vst [vmem:[#allocation2 + $0xc8] sm:$0xff] %v6757_v33   ;;  %v10630_v8 = vadd.f32 %v6971_v29, %v6970_v22  ;;  %v10632_v16 = vld [vmem:[#allocation2 + $0xc0] sm:$0xf] }
 0x312   : > { %5143 = vmatmul.mubr.bf16.vlgmr.msra.gmra.mrb[64].mxu1 %v11330_v37  ;;  %v10639_v28 = vcombine.low %v10632_v16, %v10628_v63  ;;  %v4234_v38 = vshrl.u32 %v10632_v16, 16  ;;  %v4237_v31 = vshll.u32 %v10632_v16, 16 }
 0x313   : > { %7252 = vmatpush3.bf16.msra.mxu1 %v7695_v36  ;;  %5150 = vmatprep.mubr.bf16.mxu1 %v9946_v26 }
 0x314   : > { %7253 = vmatprep.subr.bf16.mxu1 %v7699_v56  ;;  %v4236_v41 = vrot.slane %v4234_v38, 4  ;;  %v4239_v29 = vrot.slane %v4237_v31, 5  ;;  %v7708_v31 = vld [vmem:[%s11277_s4 + $0x198] sm:$0xff]  }
 0x316   : > { %v2899_v55 = vpop.f32.mrb[104].mxu0 }
 0x317   : > { %v2964_v44 = vmul.f32 %v10322_v52, %v2899_v55  ;;  %v7499_v4 = vpop.f32.mrb[105].mxu0  ;;  %7254 = vmatpush3.bf16.msra.mxu1 %v7701_v54 }
 0x318   : > { %v3422_v33 = vld [vmem:[#allocation2 + $0xcc] sm:$0x1]  ;;  %v3476_v22 = vld [vmem:[#allocation2 + $0xc8] sm:$0xf]  ;;  %v2902_v36 = vpop.f32.mrb[106].mxu0  ;;  %7255 = vmatprep.subr.bf16.mxu1 %v7705_v1  ;;  %v4262_v1 = vrot.slane %v10628_v63, 5 }
 0x319   : > { %v3423_v56 = vsel %vm9432_vm4, 0, %v3422_v33  ;;  %v3477_v37 = vsel %vm9541_vm3, 0, %v3476_v22  ;;  %v3024_v54 = vadd.f32 %v10340_v11, %v2964_v44  ;;  %v2965_v38 = vmul.f32 %v10322_v52, %v2902_v36  ;;  %v7500_v9 = vpop.f32.mrb[107].mxu0  ;;  %v7710_v63 = vld [vmem:[%s11277_s4 + $0x1a0] sm:$0xff]  }
 0x31a   : > { %3424 = vst [vmem:[#allocation2 + $0xcc] sm:$0x1] %v3423_v56  ;;  %3478 = vst [vmem:[#allocation2 + $0xc8] sm:$0xf] %v3477_v37  ;;  %5151 = vmatmul.mubr.bf16.gmra.mrb[68].mxu1 %v9774_v49  ;;  %v4240_v52 = vor.u32 %v4239_v29, %v4236_v41  ;;  %v7709_v49 = vld [vmem:[%s11277_s4 + $0x1e0] sm:$0xff]   ;;  %v4250_v33 = vor.u32 %v4249_v48, %v10653_v50 }
 0x31b   : > { %3486 = vst [vmem:[#allocation2 + $0xcc] sm:$0xf] %v11331_v2  ;;  %v3078_v55 = vmax.f32 %v3024_v54, 0.0  ;;  %5158 = vmatprep.mubr.bf16.mxu1 %v9988_v42  ;;  %v3025_v18 = vadd.f32 %v10340_v11, %v2965_v38  ;;  %7256 = vmatpush3.bf16.msra.mxu1 %v7706_v47  ;;  %v6378_v11 = vrot.slane %v10632_v16, 9  ;;  %v4264_v38 = vrot.slane %v4262_v1, 4  ;;  %v7711_v16 = vld [vmem:[%s11277_s4 + $0x1e8] sm:$0xff]  }
 0x31c   : > { %7257 = vmatprep.subr.bf16.mxu1 %v7707_v35  ;;  %v4241_v48 = vrot.slane %v4240_v52, 4 }
 0x31d   : > { %v3079_v44 = vmax.f32 %v3025_v18, 0.0  ;;  %v6973_v4 = vpop.f32.mrb[28].mxu1  ;;  %v4263_v52 = vsel %vm7800_vm2, %v6378_v11, %v4262_v1  ;;  %v7713_v1 = vld [vmem:[%s11277_s4 + $0x1f0] sm:$0xff]  }
 0x31e   : > { %v6974_v22 = vpop.f32.mrb[29].mxu1  ;;  %v7155_v36 = vpop.f32.mrb[108].mxu0 }
 0x31f   : > { %v6762_v47 = vpack.c.bf16 %v3079_v44, %v3078_v55  ;;  %v10680_v56 = vadd.f32 %v6974_v22, %v6973_v4  ;;  %v6976_v37 = vpop.f32.mrb[30].mxu1  ;;  %v7156_v54 = vpop.f32.mrb[109].mxu0  ;;  %7258 = vmatpush3.bf16.msra.mxu1 %v7708_v31  ;;  %v4251_v31 = vrot.slane %v4250_v33, 4  ;;  %v7712_v22 = vld [vmem:[%s11277_s4 + $0x1a8] sm:$0xff]  }
 0x320   : > { %v10685_v41 = vadd.f32 %v7156_v54, %v7155_v36  ;;  %v6977_v35 = vpop.f32.mrb[31].mxu1  ;;  %v7158_v29 = vpop.f32.mrb[110].mxu0  ;;  %7259 = vmatprep.subr.bf16.mxu1 %v7709_v49  ;;  %v4246_v36 = vsel %vm7891_vm5, %v4241_v48, %v10653_v50  ;;  %v7714_v50 = vld [vmem:[%s11277_s4 + $0x1b0] sm:$0xff]  }
 0x321   : > { %6869 = vst [vmem:[#allocation2 + $0xd0] sm:$0xff] %v6762_v47   ;;  %v10690_v9 = vadd.f32 %v6977_v35, %v6976_v37  ;;  %v7159_v55 = vpop.f32.mrb[111].mxu0  ;;  %v3539_v18 = vld [vmem:[#allocation2 + $0xc8] sm:$0xf] }
 0x322   : > { %3487 = vst [vmem:[#allocation2 + $0xd0] sm:$0xf] %v11331_v2  ;;  %v10693_v44 = vadd.f32 %v7159_v55, %v7158_v29  ;;  %5159 = vmatmul.mubr.bf16.gmra.mrb[72].mxu1 %v9932_v34  ;;  %v4265_v49 = vrot.slane %v3539_v18, 5  ;;  %v4253_v4 = vshll.u32 %v3539_v18, 16 }
 0x323   : > { %5166 = vmatprep.mubr.bf16.mxu1 %v10057_v27  ;;  %7260 = vmatpush3.bf16.msra.mxu1 %v7710_v63 }
 0x324   : > { %v4266_v33 = vsel %vm7800_vm2, %v4264_v38, %v4265_v49  ;;  %v4255_v47 = vrot.slane %v4253_v4, 5  ;;  %7261 = vmatprep.subr.bf16.mxu1 %v7711_v16  ;;  %v7715_v16 = vld [vmem:[%s11277_s4 + $0x1f8] sm:$0xff]  }
 0x325   : > { %v10710_v11 = vcombine.low %v4263_v52, %v4266_v33 }
 0x326   : > { %v7161_v37 = vpop.f32.mrb[112].mxu0  ;;  %v4256_v54 = vsel %vm7891_vm5, %v4251_v31, %v4255_v47 }
 0x327   : > { %v7162_v63 = vpop.f32.mrb[113].mxu0  ;;  %5423 = vmatprep.mubr.bf16.mxu0 %v10710_v11  ;;  %v10715_v35 = vcombine.low %v4246_v36, %v4256_v54  ;;  %7262 = vmatpush3.bf16.msra.mxu1 %v7712_v22 }
 0x328   : > { %v3479_v29 = vld [vmem:[#allocation2 + $0xd4] sm:$0xf]  ;;  %v10720_v38 = vadd.f32 %v7162_v63, %v7161_v37  ;;  %v7164_v48 = vpop.f32.mrb[114].mxu0  ;;  %7263 = vmatprep.subr.bf16.mxu1 %v7713_v1 }
 0x329   : > { %v3480_v55 = vsel %vm9541_vm3, 0, %v3479_v29  ;;  %v7165_v18 = vpop.f32.mrb[115].mxu0  ;;  %5424 = vmatmul.mubr.bf16.gmra.mrb[168].mxu0 %v10715_v35 }
 0x32a   : > { %3481 = vst [vmem:[#allocation2 + $0xd4] sm:$0xf] %v3480_v55  ;;  %v10728_v31 = vadd.f32 %v7165_v18, %v7164_v48  ;;  %5167 = vmatmul.mubr.bf16.gmra.mrb[76].mxu1 %v9977_v19  ;;  %7517 = vmatprep.mubr.bf16.mxu0 %v9932_v34 }
 0x32b   : > { %3488 = vst [vmem:[#allocation2 + $0xd4] sm:$0xf] %v11331_v2  ;;  %5174 = vmatprep.mubr.bf16.mxu1 %v10094_v13  ;;  %7264 = vmatpush3.bf16.msra.mxu1 %v7714_v50 }
 0x32c   : > { %7265 = vmatprep.subr.bf16.mxu1 %v7715_v16 }
 0x32e   : > { %v7167_v52 = vpop.f32.mrb[116].mxu0 }
 0x32f   : > { %v7168_v49 = vpop.f32.mrb[117].mxu0  ;;  %7266 = vmatpush3.bf16.msra.mxu1 %v7716_v32 }
 0x330   : > { %v10737_v4 = vadd.f32 %v7168_v49, %v7167_v52  ;;  %v7170_v22 = vpop.f32.mrb[118].mxu0 }
 0x331   : > { %v7171_v33 = vpop.f32.mrb[119].mxu0  ;;  %7518 = vmatmul.mubr.bf16.vlgmr.msra.gmra.mrb[172].mxu0 %v9977_v19 }
 0x332   : > { %v10740_v34 = vadd.f32 %v7171_v33, %v7170_v22  ;;  %5175 = vmatmul.mubr.bf16.gmra.mrb[80].mxu1 %v10048_v17  ;;  %7521 = vmatprep.mubr.bf16.mxu0 %v10048_v17 }
 0x333   : > { %5182 = vmatprep.mubr.bf16.mxu1 %v10170_v10 }
 0x336   : > { %v7173_v2 = vpop.f32.mrb[120].mxu0 }
 0x337   : > { %v7174_v36 = vpop.f32.mrb[121].mxu0 }
 0x338   : > { %v10745_v47 = vadd.f32 %v7174_v36, %v7173_v2  ;;  %v7176_v1 = vpop.f32.mrb[122].mxu0 }
 0x339   : > { %v7177_v37 = vpop.f32.mrb[123].mxu0  ;;  %7522 = vmatmul.mubr.bf16.gmra.mrb[176].mxu0 %v10083_v59 }
 0x33a   : > { %v10748_v54 = vadd.f32 %v7177_v37, %v7176_v1  ;;  %5183 = vmatmul.mubr.bf16.gmra.mrb[84].mxu1 %v10083_v59  ;;  %7525 = vmatprep.mubr.bf16.mxu0 %v10290_v30 }
 0x33b   : > { %5190 = vmatprep.mubr.bf16.mxu1 %v10210_v60 }
 0x33d   : > { %v6979_v19 = vpop.f32.mrb[32].mxu1 }
 0x33e   : > { %v6980_v17 = vpop.f32.mrb[33].mxu1  ;;  %v7179_v63 = vpop.f32.mrb[124].mxu0 }
 0x33f   : > { %v10753_v50 = vadd.f32 %v6980_v17, %v6979_v19  ;;  %v6982_v29 = vpop.f32.mrb[34].mxu1  ;;  %v7180_v48 = vpop.f32.mrb[125].mxu0 }
 0x340   : > { %v10755_v16 = vadd.f32 %v7180_v48, %v7179_v63  ;;  %v6983_v55 = vpop.f32.mrb[35].mxu1  ;;  %v7182_v18 = vpop.f32.mrb[126].mxu0 }
 0x341   : > { %11332 = vst [vmem:[#allocation25_spill] sm:$0xff] %v10753_v50  ;;  %v10757_v32 = vadd.f32 %v6983_v55, %v6982_v29  ;;  %v7183_v52 = vpop.f32.mrb[127].mxu0  ;;  %7526 = vmatmul.mubr.bf16.gmra.mrb[180].mxu0 %v10309_v40 }
 0x342   : > { %v10760_v59 = vadd.f32 %v7183_v52, %v7182_v18  ;;  %5191 = vmatmul.mubr.bf16.gmra.mrb[88].mxu1 %v10290_v30  ;;  %7529 = vmatprep.mubr.bf16.mxu0 %v10347_v46 }
 0x343   : > { %11333 = vst [vmem:[#allocation26_spill] sm:$0xff] %v10757_v32  ;;  %5198 = vmatprep.mubr.bf16.mxu1 %v10276_v43 }
 0x346   : > { %v7185_v49 = vpop.f32.mrb[128].mxu0 }
 0x347   : > { %v7186_v22 = vpop.f32.mrb[129].mxu0 }
 0x348   : > { %v10765_v33 = vadd.f32 %v7186_v22, %v7185_v49  ;;  %v7188_v2 = vpop.f32.mrb[130].mxu0 }
 0x349   : > { %v7189_v36 = vpop.f32.mrb[131].mxu0  ;;  %7530 = vmatmul.mubr.bf16.gmra.mrb[184].mxu0 %v10371_v58 }
 0x34a   : > { %v10768_v1 = vadd.f32 %v7189_v36, %v7188_v2  ;;  %5199 = vmatmul.mubr.bf16.gmra.mrb[92].mxu1 %v10309_v40  ;;  %7533 = vmatprep.mubr.bf16.mxu0 %v10417_v62 }
 0x34b   : > { %5206 = vmatprep.mubr.bf16.mxu1 %v10331_v45 }
 0x34d   : > { %v6985_v30 = vpop.f32.mrb[36].mxu1 }
 0x34e   : > { %v6986_v37 = vpop.f32.mrb[37].mxu1  ;;  %v7191_v19 = vpop.f32.mrb[132].mxu0 }
 0x34f   : > { %v10773_v17 = vadd.f32 %v6986_v37, %v6985_v30  ;;  %v6988_v63 = vpop.f32.mrb[38].mxu1  ;;  %v7192_v29 = vpop.f32.mrb[133].mxu0 }
 0x350   : > { %v10775_v48 = vadd.f32 %v7192_v29, %v7191_v19  ;;  %v6989_v55 = vpop.f32.mrb[39].mxu1  ;;  %v7194_v18 = vpop.f32.mrb[134].mxu0 }
 0x351   : > { %11334 = vst [vmem:[#allocation27_spill] sm:$0xff] %v10773_v17  ;;  %v10777_v52 = vadd.f32 %v6989_v55, %v6988_v63  ;;  %v7195_v49 = vpop.f32.mrb[135].mxu0  ;;  %7534 = vmatmul.mubr.bf16.gmra.mrb[188].mxu0 %v10461_v14 }
 0x352   : > { %v10780_v40 = vadd.f32 %v7195_v49, %v7194_v18  ;;  %5207 = vmatmul.mubr.bf16.gmra.mrb[96].mxu1 %v10347_v46  ;;  %7537 = vmatprep.mubr.bf16.mxu0 %v10511_v5 }
 0x353   : > { %11335 = vst [vmem:[#allocation28_spill] sm:$0xff] %v10777_v52  ;;  %5214 = vmatprep.mubr.bf16.mxu1 %v10434_v39 }
 0x356   : > { %v7197_v22 = vpop.f32.mrb[136].mxu0 }
 0x357   : > { %v7198_v2 = vpop.f32.mrb[137].mxu0 }
 0x358   : > { %v10785_v36 = vadd.f32 %v7198_v2, %v7197_v22  ;;  %v7200_v30 = vpop.f32.mrb[138].mxu0 }
 0x359   : > { %v7201_v37 = vpop.f32.mrb[139].mxu0  ;;  %7538 = vmatmul.mubr.bf16.gmra.mrb[192].mxu0 %v10535_v20 }
 0x35a   : > { %v10788_v19 = vadd.f32 %v7201_v37, %v7200_v30  ;;  %5215 = vmatmul.mubr.bf16.gmra.mrb[100].mxu1 %v10371_v58  ;;  %7541 = vmatprep.mubr.bf16.mxu0 %v10575_v61 }
 0x35b   : > { %5222 = vmatprep.mubr.bf16.mxu1 %v10475_v12 }
 0x35c   : > { %11336 = vst [vmem:[#allocation29_spill] sm:$0xff] %v10788_v19 }
 0x35e   : > { %v7203_v46 = vpop.f32.mrb[140].mxu0 }
 0x35f   : > { %v7204_v63 = vpop.f32.mrb[141].mxu0 }
 0x360   : > { %v10793_v29 = vadd.f32 %v7204_v63, %v7203_v46  ;;  %v7206_v55 = vpop.f32.mrb[142].mxu0 }
 0x361   : > { %v7207_v18 = vpop.f32.mrb[143].mxu0  ;;  %7542 = vmatmul.mubr.bf16.gmra.mrb[196].mxu0 %v10599_v53 }
 0x362   : > { %11337 = vst [vmem:[#allocation30_spill] sm:$0xff] %v10793_v29  ;;  %v10796_v49 = vadd.f32 %v7207_v18, %v7206_v55  ;;  %5223 = vmatmul.mubr.bf16.gmra.mrb[104].mxu1 %v10417_v62  ;;  %7545 = vmatprep.mubr.bf16.mxu0 %v10710_v11 }
 0x363   : > { %5230 = vmatprep.mubr.bf16.mxu1 %v10521_v25 }
 0x364   : > { %11338 = vst [vmem:[#allocation31_spill] sm:$0xff] %v10796_v49 }
 0x36a   : > { %5231 = vmatmul.mubr.bf16.gmra.mrb[108].mxu1 %v10461_v14 }
 0x36b   : > { %5238 = vmatprep.mubr.bf16.mxu1 %v10545_v57 }
 0x36c   : > { %v7209_v58 = vpop.f32.mrb[144].mxu0 }
 0x36d   : > { %v6991_v22 = vpop.f32.mrb[40].mxu1  ;;  %v7210_v2 = vpop.f32.mrb[145].mxu0 }
 0x36e   : > { %v10803_v30 = vadd.f32 %v7210_v2, %v7209_v58  ;;  %v6992_v37 = vpop.f32.mrb[41].mxu1  ;;  %v7212_v46 = vpop.f32.mrb[146].mxu0 }
 0x36f   : > { %v10805_v63 = vadd.f32 %v6992_v37, %v6991_v22  ;;  %v6994_v55 = vpop.f32.mrb[42].mxu1  ;;  %v7213_v18 = vpop.f32.mrb[147].mxu0 }
 0x370   : > { %11339 = vst [vmem:[#allocation32_spill] sm:$0xff] %v10803_v30  ;;  %v10807_v62 = vadd.f32 %v7213_v18, %v7212_v46  ;;  %v6995_v11 = vpop.f32.mrb[43].mxu1 }
 0x371   : > { %11340 = vst [vmem:[#allocation33_spill] sm:$0xff] %v10805_v63  ;;  %v10809_v52 = vadd.f32 %v6995_v11, %v6994_v55  ;;  %v10819_v11 = vld [vmem:[#allocation2 + $0xcc] sm:$0xf] }
 0x372   : > { %11341 = vst [vmem:[#allocation34_spill] sm:$0xff] %v10807_v62  ;;  %5239 = vmatmul.mubr.bf16.gmra.mrb[112].mxu1 %v10511_v5  ;;  %v10821_v5 = vld [vmem:[#allocation2 + $0xd0] sm:$0xf]  ;;  %v4268_v62 = vshrl.u32 %v10819_v11, 16  ;;  %v4271_v30 = vshll.u32 %v10819_v11, 16 }
 0x373   : > { %11342 = vst [vmem:[#allocation35_spill] sm:$0xff] %v10809_v52  ;;  %5246 = vmatprep.mubr.bf16.mxu1 %v10585_v6  ;;  %v6431_v0 = vcombine.low %v10819_v11, %v10821_v5 }
 0x374   : > { %v4273_v17 = vrot.slane %v4271_v30, 5 }
 0x37a   : > { %5247 = vmatmul.mubr.bf16.gmra.mrb[116].mxu1 %v10535_v20 }
 0x37b   : > { %5254 = vmatprep.mubr.bf16.mxu1 %v10609_v24 }
 0x37c   : > { %v7215_v14 = vpop.f32.mrb[148].mxu0 }
 0x37d   : > { %v6997_v58 = vpop.f32.mrb[44].mxu1  ;;  %v7216_v2 = vpop.f32.mrb[149].mxu0 }
 0x37e   : > { %v10815_v22 = vadd.f32 %v7216_v2, %v7215_v14  ;;  %v6998_v37 = vpop.f32.mrb[45].mxu1  ;;  %v7218_v63 = vpop.f32.mrb[150].mxu0  ;;  %v4277_v14 = vshll.u32 %v10821_v5, 16 }
 0x37f   : > { %v10817_v46 = vadd.f32 %v6998_v37, %v6997_v58  ;;  %v7000_v18 = vpop.f32.mrb[46].mxu1  ;;  %v7219_v55 = vpop.f32.mrb[151].mxu0  ;;  %v4296_v58 = vrot.slane %v10821_v5, 5  ;;  %v4281_v37 = vshrl.u32 %v10821_v5, 16 }
 0x380   : > { %11343 = vst [vmem:[#allocation36_spill] sm:$0xff] %v10815_v22  ;;  %v10823_v52 = vadd.f32 %v7219_v55, %v7218_v63  ;;  %v7001_v20 = vpop.f32.mrb[47].mxu1  ;;  %v4270_v22 = vrot.slane %v4268_v62, 4  ;;  %v4279_v63 = vrot.slane %v4277_v14, 5  ;;  %v6379_v55 = vrot.slane %v10819_v11, 9 }
 0x381   : > { %11344 = vst [vmem:[#allocation37_spill] sm:$0xff] %v10817_v46  ;;  %v10828_v2 = vadd.f32 %v7001_v20, %v7000_v18  ;;  %v3542_v46 = vld [vmem:[#allocation2 + $0xd4] sm:$0xf]  ;;  %v4283_v29 = vrot.slane %v4281_v37, 4 }
 0x382   : > { %11345 = vst [vmem:[#allocation38_spill] sm:$0xff] %v10823_v52  ;;  %5255 = vmatmul.mubr.bf16.gmra.mrb[120].mxu1 %v10575_v61  ;;  %v4298_v52 = vrot.slane %v4296_v58, 4  ;;  %v4299_v49 = vrot.slane %v3542_v46, 5  ;;  %v4274_v32 = vor.u32 %v4273_v17, %v4270_v22  ;;  %v4287_v18 = vshll.u32 %v3542_v46, 16 }
 0x383   : > { %11346 = vst [vmem:[#allocation39_spill] sm:$0xff] %v10828_v2  ;;  %5262 = vmatprep.mubr.bf16.mxu1 %v10639_v28  ;;  %v4297_v20 = vsel %vm7800_vm2, %v6379_v55, %v4296_v58  ;;  %v4284_v61 = vor.u32 %v4283_v29, %v4279_v63 }
 0x384   : > { %v4300_v2 = vsel %vm7800_vm2, %v4298_v52, %v4299_v49  ;;  %v4275_v62 = vrot.slane %v4274_v32, 4  ;;  %v4289_v30 = vrot.slane %v4287_v18, 5 }
 0x385   : > { %v6433_v50 = vcombine.low %v4297_v20, %v4300_v2  ;;  %v4285_v14 = vrot.slane %v4284_v61, 4 }
 0x386   : > { %v4280_v19 = vsel %vm7891_vm5, %v4275_v62, %v4279_v63 }
 0x387   : > { %7546 = vmatmul.mubr.bf16.gmra.mrb[200].mxu0 %v6433_v50  ;;  %v4290_v37 = vsel %vm7891_vm5, %v4285_v14, %v4289_v30 }
 0x388   : > { %v10844_v17 = vcombine.low %v4280_v19, %v4290_v37  ;;  %v11350_v37 = vld [vmem:[#allocation6_spill] sm:$0xff] }
 0x38a   : > { %5263 = vmatmul.mubr.bf16.gmra.mrb[124].mxu1 %v10599_v53 }
 0x38b   : > { %5464 = vmatprep.mubr.bf16.mxu1 %v9940_v23 }
 0x392   : > { %5465 = vmatmul.mubr.bf16.vlgmr.msra.gmra.mrb[128].mxu1 %v9946_v26 }
 0x393   : > { %5472 = vmatprep.mubr.bf16.mxu1 %v9984_v15  ;;  %v11347_v15 = vld [vmem:[#allocation3_spill] sm:$0xff] }
 0x39a   : > { %5473 = vmatmul.mubr.bf16.gmra.mrb[132].mxu1 %v9988_v42  ;;  %v11348_v42 = vld [vmem:[#allocation4_spill] sm:$0xff] }
 0x39b   : > { %5480 = vmatprep.mubr.bf16.mxu1 %v10051_v3 }
 0x39c   : > { %v7221_v50 = vpop.f32.mrb[152].mxu0 }
 0x39d   : > { %v7003_v51 = vpop.f32.mrb[48].mxu1  ;;  %v7222_v32 = vpop.f32.mrb[153].mxu0 }
 0x39e   : > { %v10853_v52 = vadd.f32 %v7222_v32, %v7221_v50  ;;  %v7004_v53 = vpop.f32.mrb[49].mxu1  ;;  %v7224_v19 = vpop.f32.mrb[154].mxu0  ;;  %v11351_v50 = vld [vmem:[#allocation7_spill] sm:$0xff] }
 0x39f   : > { %v10855_v29 = vadd.f32 %v7004_v53, %v7003_v51  ;;  %v7006_v49 = vpop.f32.mrb[50].mxu1  ;;  %v7225_v22 = vpop.f32.mrb[155].mxu0  ;;  %v11352_v51 = vld [vmem:[#allocation12_spill] sm:$0xff] }
 0x3a0   : > { %v10857_v23 = vadd.f32 %v7225_v22, %v7224_v19  ;;  %v7007_v26 = vpop.f32.mrb[51].mxu1 }
 0x3a1   : > { %v10859_v46 = vadd.f32 %v7007_v26, %v7006_v49 }
 0x3a2   : > { %5481 = vmatmul.mubr.bf16.gmra.mrb[136].mxu1 %v10057_v27 }
 0x3a3   : > { %5488 = vmatprep.mubr.bf16.mxu1 %v11347_v15 }
 0x3aa   : > { %5489 = vmatmul.mubr.bf16.gmra.mrb[140].mxu1 %v10094_v13  ;;  %v11349_v13 = vld [vmem:[#allocation5_spill] sm:$0xff] }
 0x3ab   : > { %5496 = vmatprep.mubr.bf16.mxu1 %v11348_v42 }
 0x3ac   : > { %v7227_v3 = vpop.f32.mrb[156].mxu0 }
 0x3ad   : > { %v7009_v2 = vpop.f32.mrb[52].mxu1  ;;  %v7228_v58 = vpop.f32.mrb[157].mxu0 }
 0x3ae   : > { %v10865_v63 = vadd.f32 %v7228_v58, %v7227_v3  ;;  %v7010_v55 = vpop.f32.mrb[53].mxu1  ;;  %v7230_v18 = vpop.f32.mrb[158].mxu0 }
 0x3af   : > { %v10867_v20 = vadd.f32 %v7010_v55, %v7009_v2  ;;  %v7012_v61 = vpop.f32.mrb[54].mxu1  ;;  %v7231_v62 = vpop.f32.mrb[159].mxu0  ;;  %v11354_v2 = vld [vmem:[#allocation18_spill] sm:$0xff] }
 0x3b0   : > { %v10869_v30 = vadd.f32 %v7231_v62, %v7230_v18  ;;  %v7013_v27 = vpop.f32.mrb[55].mxu1 }
 0x3b1   : > { %v10871_v14 = vadd.f32 %v7013_v27, %v7012_v61 }
 0x3b2   : > { %5497 = vmatmul.mubr.bf16.gmra.mrb[144].mxu1 %v10170_v10 }
 0x3b3   : > { %5504 = vmatprep.mubr.bf16.mxu1 %v11349_v13 }
 0x3ba   : > { %5505 = vmatmul.mubr.bf16.gmra.mrb[148].mxu1 %v10210_v60 }
 0x3bb   : > { %5512 = vmatprep.mubr.bf16.mxu1 %v11350_v37 }
 0x3c2   : > { %5513 = vmatmul.mubr.bf16.gmra.mrb[152].mxu1 %v10276_v43 }
 0x3c3   : > { %5520 = vmatprep.mubr.bf16.mxu1 %v11351_v50 }
 0x3ca   : > { %5521 = vmatmul.mubr.bf16.gmra.mrb[156].mxu1 %v10331_v45  ;;  %v11353_v45 = vld [vmem:[#allocation13_spill] sm:$0xff] }
 0x3cb   : > { %5528 = vmatprep.mubr.bf16.mxu1 %v11352_v51 }
 0x3cc   : > { %v7233_v32 = vpop.f32.mrb[160].mxu0 }
 0x3cd   : > { %v7015_v53 = vpop.f32.mrb[56].mxu1  ;;  %v7234_v19 = vpop.f32.mrb[161].mxu0 }
 0x3ce   : > { %v10881_v49 = vadd.f32 %v7234_v19, %v7233_v32  ;;  %v7016_v10 = vpop.f32.mrb[57].mxu1  ;;  %v7236_v22 = vpop.f32.mrb[162].mxu0 }
 0x3cf   : > { %v10883_v26 = vadd.f32 %v7016_v10, %v7015_v53  ;;  %v7018_v60 = vpop.f32.mrb[58].mxu1  ;;  %v7237_v15 = vpop.f32.mrb[163].mxu0 }
 0x3d0   : > { %v10885_v42 = vadd.f32 %v7237_v15, %v7236_v22  ;;  %v7019_v43 = vpop.f32.mrb[59].mxu1  ;;  %v11356_v15 = vld [vmem:[#allocation8_spill] sm:$0xff] }
 0x3d1   : > { %v10887_v3 = vadd.f32 %v7019_v43, %v7018_v60 }
 0x3d2   : > { %5529 = vmatmul.mubr.bf16.gmra.mrb[160].mxu1 %v10434_v39 }
 0x3d3   : > { %5536 = vmatprep.mubr.bf16.mxu1 %v11353_v45 }
 0x3da   : > { %5537 = vmatmul.mubr.bf16.gmra.mrb[164].mxu1 %v10475_v12  ;;  %v11355_v12 = vld [vmem:[#allocation19_spill] sm:$0xff] }
 0x3db   : > { %5544 = vmatprep.mubr.bf16.mxu1 %v11354_v2  ;;  %v11357_v2 = vld [vmem:[#allocation9_spill] sm:$0xff] }
 0x3dc   : > { %v7239_v58 = vpop.f32.mrb[164].mxu0 }
 0x3dd   : > { %v7021_v55 = vpop.f32.mrb[60].mxu1  ;;  %v7240_v18 = vpop.f32.mrb[165].mxu0 }
 0x3de   : > { %v10893_v61 = vadd.f32 %v7240_v18, %v7239_v58  ;;  %v7022_v62 = vpop.f32.mrb[61].mxu1  ;;  %v7242_v27 = vpop.f32.mrb[166].mxu0 }
 0x3df   : > { %v10895_v13 = vadd.f32 %v7022_v62, %v7021_v55  ;;  %v7024_v37 = vpop.f32.mrb[62].mxu1  ;;  %v7243_v50 = vpop.f32.mrb[167].mxu0  ;;  %v11358_v55 = vld [vmem:[#allocation24_spill] sm:$0xff] }
 0x3e0   : > { %v10897_v51 = vadd.f32 %v7243_v50, %v7242_v27  ;;  %v7025_v39 = vpop.f32.mrb[63].mxu1 }
 0x3e1   : > { %v10899_v32 = vadd.f32 %v7025_v39, %v7024_v37 }
 0x3e2   : > { %5545 = vmatmul.mubr.bf16.gmra.mrb[168].mxu1 %v10521_v25 }
 0x3e3   : > { %5552 = vmatprep.mubr.bf16.mxu1 %v11355_v12  ;;  %v11359_v12 = vld [vmem:[#allocation10_spill] sm:$0xff] }
 0x3e5   : > { %v7043_v53 = vpop.f32.mrb[64].mxu1 }
 0x3e6   : > { %v7044_v19 = vpop.f32.mrb[65].mxu1 }
 0x3e7   : > { %v7045_v10 = vadd.f32 %v7044_v19, %v7043_v53  ;;  %v7046_v22 = vpop.f32.mrb[66].mxu1 }
 0x3e8   : > { %v7047_v60 = vpop.f32.mrb[67].mxu1 }
 0x3e9   : > { %v5145_v43 = vadd.f32 %v7045_v10, %v11356_v15  ;;  %v7048_v45 = vadd.f32 %v7047_v60, %v7046_v22 }
 0x3ea   : > { %5553 = vmatmul.mubr.bf16.gmra.mrb[172].mxu1 %v10545_v57  ;;  %v11360_v57 = vld [vmem:[#allocation11_spill] sm:$0xff] }
 0x3eb   : > { %v5148_v58 = vadd.f32 %v7048_v45, %v11357_v2  ;;  %5560 = vmatprep.mubr.bf16.mxu1 %v11358_v55  ;;  %v10908_v18 = vadd.f32 %v10685_v41, %v5145_v43  ;;  %v11361_v2 = vld [vmem:[#allocation14_spill] sm:$0xff] }
 0x3ed   : > { %v7049_v25 = vpop.f32.mrb[68].mxu1  ;;  %v10911_v62 = vadd.f32 %v10693_v44, %v5148_v58 }
 0x3ee   : > { %v7050_v27 = vpop.f32.mrb[69].mxu1 }
 0x3ef   : > { %v7051_v37 = vadd.f32 %v7050_v27, %v7049_v25  ;;  %v7052_v50 = vpop.f32.mrb[70].mxu1 }
 0x3f0   : > { %v7053_v39 = vpop.f32.mrb[71].mxu1 }
 0x3f1   : > { %v5153_v53 = vadd.f32 %v7051_v37, %v11359_v12  ;;  %v7054_v19 = vadd.f32 %v7053_v39, %v7052_v50 }
 0x3f2   : > { %5561 = vmatmul.mubr.bf16.gmra.mrb[176].mxu1 %v10585_v6  ;;  %v11362_v6 = vld [vmem:[#allocation15_spill] sm:$0xff] }
 0x3f3   : > { %v5156_v10 = vadd.f32 %v7054_v19, %v11360_v57  ;;  %5568 = vmatprep.mubr.bf16.mxu1 %v10607_v21  ;;  %v10918_v41 = vadd.f32 %v10720_v38, %v5153_v53 }
 0x3f5   : > { %v7055_v22 = vpop.f32.mrb[72].mxu1  ;;  %v10921_v44 = vadd.f32 %v10728_v31, %v5156_v10 }
 0x3f6   : > { %v7056_v60 = vpop.f32.mrb[73].mxu1 }
 0x3f7   : > { %v7057_v15 = vadd.f32 %v7056_v60, %v7055_v22  ;;  %v7058_v43 = vpop.f32.mrb[74].mxu1  ;;  %v11364_v60 = vld [vmem:[#allocation17_spill] sm:$0xff] }
 0x3f8   : > { %v7059_v45 = vpop.f32.mrb[75].mxu1 }
 0x3f9   : > { %v5161_v58 = vadd.f32 %v7057_v15, %v11361_v2  ;;  %v7060_v55 = vadd.f32 %v7059_v45, %v7058_v43 }
 0x3fa   : > { %5569 = vmatmul.mubr.bf16.gmra.mrb[180].mxu1 %v10609_v24 }
 0x3fb   : > { %v5164_v25 = vadd.f32 %v7060_v55, %v11362_v6  ;;  %5576 = vmatprep.mubr.bf16.mxu1 %v10715_v35  ;;  %v10928_v21 = vadd.f32 %v10737_v4, %v5161_v58  ;;  %v11363_v35 = vld [vmem:[#allocation16_spill] sm:$0xff] }
 0x3fc   : > { %v7245_v38 = vpop.f32.mrb[168].mxu0 }
 0x3fd   : > { %v7061_v27 = vpop.f32.mrb[76].mxu1  ;;  %v7246_v31 = vpop.f32.mrb[169].mxu0  ;;  %v10931_v37 = vadd.f32 %v10740_v34, %v5164_v25 }
 0x3fe   : > { %v7062_v50 = vpop.f32.mrb[77].mxu1  ;;  %v10933_v39 = vadd.f32 %v7246_v31, %v7245_v38  ;;  %v7248_v12 = vpop.f32.mrb[170].mxu0 }
 0x3ff   : > { %v7063_v53 = vadd.f32 %v7062_v50, %v7061_v27  ;;  %v7064_v19 = vpop.f32.mrb[78].mxu1  ;;  %v7249_v24 = vpop.f32.mrb[171].mxu0  ;;  %v11366_v50 = vld [vmem:[#allocation21_spill] sm:$0xff] }
 0x400   : > { %v7065_v57 = vpop.f32.mrb[79].mxu1  ;;  %v10935_v10 = vadd.f32 %v7249_v24, %v7248_v12 }
 0x401   : > { %v5169_v22 = vadd.f32 %v7063_v53, %v11363_v35  ;;  %v7066_v4 = vadd.f32 %v7065_v57, %v7064_v19 }
 0x402   : > { %5577 = vmatmul.mubr.bf16.gmra.mrb[184].mxu1 %v10639_v28 }
 0x403   : > { %v5172_v15 = vadd.f32 %v7066_v4, %v11364_v60  ;;  %5584 = vmatprep.mubr.bf16.mxu1 %v10844_v17  ;;  %v10942_v34 = vadd.f32 %v10745_v47, %v5169_v22  ;;  %v11365_v17 = vld [vmem:[#allocation20_spill] sm:$0xff] }
 0x404   : > { %v10944_v43 = vpop.f32.mrb[172].mxu0 }
 0x405   : > { %v7067_v45 = vpop.f32.mrb[80].mxu1  ;;  %v10946_v2 = vpop.f32.mrb[173].mxu0  ;;  %v10949_v58 = vadd.f32 %v10748_v54, %v5172_v15 }
 0x406   : > { %v7068_v55 = vpop.f32.mrb[81].mxu1  ;;  %v10951_v6 = vpop.f32.mrb[174].mxu0 }
 0x407   : > { %v7069_v25 = vadd.f32 %v7068_v55, %v7067_v45  ;;  %v7070_v28 = vpop.f32.mrb[82].mxu1  ;;  %v10953_v38 = vpop.f32.mrb[175].mxu0  ;;  %v11368_v45 = vld [vmem:[#allocation23_spill] sm:$0xff] }
 0x408   : > { %v7071_v27 = vpop.f32.mrb[83].mxu1 }
 0x409   : > { %v5177_v31 = vadd.f32 %v7069_v25, %v11365_v17  ;;  %v7072_v47 = vadd.f32 %v7071_v27, %v7070_v28 }
 0x40a   : > { %5585 = vmatmul.mubr.bf16.gmra.mrb[188].mxu1 %v6431_v0  ;;  %v11367_v0 = vld [vmem:[#allocation22_spill] sm:$0xff] }
 0x40b   : > { %v5180_v12 = vadd.f32 %v7072_v47, %v11366_v50  ;;  %v10961_v54 = vadd.f32 %v10755_v16, %v5177_v31 }
 0x40c   : > { %v10963_v53 = vpop.f32.mrb[176].mxu0 }
 0x40d   : > { %v7073_v19 = vpop.f32.mrb[84].mxu1  ;;  %v10965_v24 = vpop.f32.mrb[177].mxu0  ;;  %v10968_v57 = vadd.f32 %v10760_v59, %v5180_v12 }
 0x40e   : > { %v7074_v35 = vpop.f32.mrb[85].mxu1  ;;  %v10970_v22 = vpop.f32.mrb[178].mxu0 }
 0x40f   : > { %v7075_v4 = vadd.f32 %v7074_v35, %v7073_v19  ;;  %v7076_v60 = vpop.f32.mrb[86].mxu1  ;;  %v10972_v11 = vpop.f32.mrb[179].mxu0 }
 0x410   : > { %v7077_v5 = vpop.f32.mrb[87].mxu1 }
 0x411   : > { %v5185_v15 = vadd.f32 %v7075_v4, %v11367_v0  ;;  %v7078_v16 = vadd.f32 %v7077_v5, %v7076_v60 }
 0x413   : > { %v5188_v55 = vadd.f32 %v7078_v16, %v11368_v45  ;;  %v10977_v25 = vadd.f32 %v10765_v33, %v5185_v15 }
 0x414   : > { %v10979_v28 = vpop.f32.mrb[180].mxu0 }
 0x415   : > { %v7079_v59 = vpop.f32.mrb[88].mxu1  ;;  %v10981_v27 = vpop.f32.mrb[181].mxu0  ;;  %v10984_v17 = vadd.f32 %v10768_v1, %v5188_v55 }
 0x416   : > { %v7080_v31 = vpop.f32.mrb[89].mxu1  ;;  %v10986_v47 = vpop.f32.mrb[182].mxu0 }
 0x417   : > { %v7081_v50 = vadd.f32 %v7080_v31, %v7079_v59  ;;  %v7082_v12 = vpop.f32.mrb[90].mxu1  ;;  %v10988_v19 = vpop.f32.mrb[183].mxu0 }
 0x418   : > { %v7083_v35 = vpop.f32.mrb[91].mxu1 }
 0x419   : > { %v5193_v4 = vadd.f32 %v7081_v50, %v10620_v7  ;;  %v7084_v33 = vadd.f32 %v7083_v35, %v7082_v12 }
 0x41b   : > { %v5196_v60 = vadd.f32 %v7084_v33, %v10630_v8  ;;  %v10993_v5 = vadd.f32 %v10775_v48, %v5193_v4 }
 0x41c   : > { %v10995_v0 = vpop.f32.mrb[184].mxu0 }
 0x41d   : > { %11369 = vst [vmem:[#allocation3_spill] sm:$0xff] %v10993_v5  ;;  %11370 = vst [vmem:[#allocation4_spill] sm:$0xff] %v10995_v0  ;;  %v7085_v1 = vpop.f32.mrb[92].mxu1  ;;  %v10997_v15 = vpop.f32.mrb[185].mxu0  ;;  %v11000_v16 = vadd.f32 %v10780_v40, %v5196_v60  ;;  %v11378_v60 = vld [vmem:[#allocation29_spill] sm:$0xff] }
 0x41e   : > { %11371 = vst [vmem:[#allocation5_spill] sm:$0xff] %v10997_v15  ;;  %v7086_v45 = vpop.f32.mrb[93].mxu1  ;;  %v11002_v55 = vpop.f32.mrb[186].mxu0  ;;  %v11407_v15 = vld [vmem:[#allocation39_spill] sm:$0xff] }
 0x41f   : > { %11372 = vst [vmem:[#allocation6_spill] sm:$0xff] %v11000_v16  ;;  %11373 = vst [vmem:[#allocation7_spill] sm:$0xff] %v11002_v55  ;;  %v7087_v59 = vadd.f32 %v7086_v45, %v7085_v1  ;;  %v7088_v31 = vpop.f32.mrb[94].mxu1  ;;  %v11004_v7 = vpop.f32.mrb[187].mxu0 }
 0x420   : > { %11374 = vst [vmem:[#allocation12_spill] sm:$0xff] %v11004_v7  ;;  %v7089_v50 = vpop.f32.mrb[95].mxu1 }
 0x421   : > { %v5201_v8 = vadd.f32 %v7087_v59, %v10680_v56  ;;  %v7090_v48 = vadd.f32 %v7089_v50, %v7088_v31  ;;  %v11383_v50 = vld [vmem:[#allocation26_spill] sm:$0xff] }
 0x423   : > { %v5204_v12 = vadd.f32 %v7090_v48, %v10690_v9  ;;  %v11009_v35 = vadd.f32 %v10785_v36, %v5201_v8  ;;  %v11382_v9 = vld [vmem:[#allocation25_spill] sm:$0xff]  ;;  %v11384_v48 = vld [vmem:[#allocation30_spill] sm:$0xff] }
 0x424   : > { %v11011_v4 = vpop.f32.mrb[188].mxu0 }
 0x425   : > { %11375 = vst [vmem:[#allocation13_spill] sm:$0xff] %v11009_v35  ;;  %11376 = vst [vmem:[#allocation18_spill] sm:$0xff] %v11011_v4  ;;  %v7091_v40 = vpop.f32.mrb[96].mxu1  ;;  %v11013_v33 = vpop.f32.mrb[189].mxu0  ;;  %v11016_v55 = vadd.f32 %v11378_v60, %v5204_v12 }
 0x426   : > { %11377 = vst [vmem:[#allocation19_spill] sm:$0xff] %v11013_v33  ;;  %v7092_v1 = vpop.f32.mrb[97].mxu1  ;;  %v11018_v45 = vpop.f32.mrb[190].mxu0 }
 0x427   : > { %11379 = vst [vmem:[#allocation8_spill] sm:$0xff] %v11016_v55  ;;  %11380 = vst [vmem:[#allocation9_spill] sm:$0xff] %v11018_v45  ;;  %v7093_v0 = vadd.f32 %v7092_v1, %v7091_v40  ;;  %v7094_v7 = vpop.f32.mrb[98].mxu1  ;;  %v11020_v56 = vpop.f32.mrb[191].mxu0  ;;  %v11388_v55 = vld [vmem:[#allocation31_spill] sm:$0xff] }
 0x428   : > { %11381 = vst [vmem:[#allocation24_spill] sm:$0xff] %v11020_v56  ;;  %v7095_v59 = vpop.f32.mrb[99].mxu1 }
 0x429   : > { %v5209_v31 = vadd.f32 %v7093_v0, %v11382_v9  ;;  %v7096_v36 = vadd.f32 %v7095_v59, %v7094_v7  ;;  %v11392_v59 = vld [vmem:[#allocation27_spill] sm:$0xff] }
 0x42b   : > { %v5212_v8 = vadd.f32 %v7096_v36, %v11383_v50  ;;  %v11025_v4 = vadd.f32 %v11384_v48, %v5209_v31  ;;  %v11393_v36 = vld [vmem:[#allocation28_spill] sm:$0xff] }
 0x42c   : > { %v11027_v33 = vpop.f32.mrb[192].mxu0  ;;  %v11394_v48 = vld [vmem:[#allocation32_spill] sm:$0xff] }
 0x42d   : > { %11385 = vst [vmem:[#allocation10_spill] sm:$0xff] %v11025_v4  ;;  %11386 = vst [vmem:[#allocation11_spill] sm:$0xff] %v11027_v33  ;;  %v7097_v12 = vpop.f32.mrb[100].mxu1  ;;  %v11029_v60 = vpop.f32.mrb[193].mxu0  ;;  %v11032_v45 = vadd.f32 %v11388_v55, %v5212_v8 }
 0x42e   : > { %11387 = vst [vmem:[#allocation14_spill] sm:$0xff] %v11029_v60  ;;  %v7098_v40 = vpop.f32.mrb[101].mxu1  ;;  %v11034_v1 = vpop.f32.mrb[194].mxu0 }
 0x42f   : > { %11389 = vst [vmem:[#allocation15_spill] sm:$0xff] %v11032_v45  ;;  %11390 = vst [vmem:[#allocation16_spill] sm:$0xff] %v11034_v1  ;;  %v7099_v56 = vadd.f32 %v7098_v40, %v7097_v12  ;;  %v7100_v35 = vpop.f32.mrb[102].mxu1  ;;  %v11036_v0 = vpop.f32.mrb[195].mxu0  ;;  %v11398_v45 = vld [vmem:[#allocation34_spill] sm:$0xff] }
 0x430   : > { %11391 = vst [vmem:[#allocation17_spill] sm:$0xff] %v11036_v0  ;;  %v7101_v7 = vpop.f32.mrb[103].mxu1 }
 0x431   : > { %v5217_v9 = vadd.f32 %v7099_v56, %v11392_v59  ;;  %v7102_v31 = vadd.f32 %v7101_v7, %v7100_v35  ;;  %v11402_v7 = vld [vmem:[#allocation33_spill] sm:$0xff] }
 0x433   : > { %v5220_v50 = vadd.f32 %v7102_v31, %v11393_v36  ;;  %v11041_v33 = vadd.f32 %v11394_v48, %v5217_v9  ;;  %v11403_v31 = vld [vmem:[#allocation35_spill] sm:$0xff]  ;;  %v11404_v48 = vld [vmem:[#allocation36_spill] sm:$0xff] }
 0x434   : > { %v11043_v60 = vpop.f32.mrb[196].mxu0 }
 0x435   : > { %11395 = vst [vmem:[#allocation20_spill] sm:$0xff] %v11041_v33  ;;  %11396 = vst [vmem:[#allocation21_spill] sm:$0xff] %v11043_v60  ;;  %v7103_v55 = vpop.f32.mrb[104].mxu1  ;;  %v11045_v8 = vpop.f32.mrb[197].mxu0  ;;  %v11048_v1 = vadd.f32 %v11398_v45, %v5220_v50  ;;  %v11405_v33 = vld [vmem:[#allocation38_spill] sm:$0xff] }
 0x436   : > { %11397 = vst [vmem:[#allocation22_spill] sm:$0xff] %v11045_v8  ;;  %v7104_v12 = vpop.f32.mrb[105].mxu1  ;;  %v11050_v40 = vpop.f32.mrb[198].mxu0 }
 0x437   : > { %11399 = vst [vmem:[#allocation23_spill] sm:$0xff] %v11048_v1  ;;  %11400 = vst [vmem:[#allocation29_spill] sm:$0xff] %v11050_v40  ;;  %v7105_v0 = vadd.f32 %v7104_v12, %v7103_v55  ;;  %v7106_v4 = vpop.f32.mrb[106].mxu1  ;;  %v11052_v56 = vpop.f32.mrb[199].mxu0  ;;  %v11406_v12 = vld [vmem:[#allocation37_spill] sm:$0xff] }
 0x438   : > { %11401 = vst [vmem:[#allocation25_spill] sm:$0xff] %v11052_v56  ;;  %v7107_v35 = vpop.f32.mrb[107].mxu1 }
 0x439   : > { %v5225_v59 = vadd.f32 %v7105_v0, %v11402_v7  ;;  %v7108_v9 = vadd.f32 %v7107_v35, %v7106_v4 }
 0x43b   : > { %v5228_v36 = vadd.f32 %v7108_v9, %v11403_v31  ;;  %v11057_v60 = vadd.f32 %v11404_v48, %v5225_v59 }
 0x43d   : > { %v7109_v8 = vpop.f32.mrb[108].mxu1  ;;  %v11060_v45 = vadd.f32 %v11405_v33, %v5228_v36 }
 0x43e   : > { %v7110_v50 = vpop.f32.mrb[109].mxu1 }
 0x43f   : > { %v7111_v1 = vadd.f32 %v7110_v50, %v7109_v8  ;;  %v7112_v40 = vpop.f32.mrb[110].mxu1 }
 0x440   : > { %v7113_v55 = vpop.f32.mrb[111].mxu1 }
 0x441   : > { %v5233_v16 = vadd.f32 %v7111_v1, %v11406_v12  ;;  %v7114_v56 = vadd.f32 %v7113_v55, %v7112_v40 }
 0x443   : > { %v5236_v5 = vadd.f32 %v7114_v56, %v11407_v15  ;;  %v11065_v4 = vadd.f32 %v10853_v52, %v5233_v16 }
 0x445   : > { %v7115_v0 = vpop.f32.mrb[112].mxu1  ;;  %v11068_v35 = vadd.f32 %v10857_v23, %v5236_v5 }
 0x446   : > { %v7116_v7 = vpop.f32.mrb[113].mxu1 }
 0x447   : > { %v7117_v59 = vadd.f32 %v7116_v7, %v7115_v0  ;;  %v7118_v33 = vpop.f32.mrb[114].mxu1 }
 0x448   : > { %v7119_v9 = vpop.f32.mrb[115].mxu1 }
 0x449   : > { %v5241_v8 = vadd.f32 %v7117_v59, %v10855_v29  ;;  %v7120_v31 = vadd.f32 %v7119_v9, %v7118_v33 }
 0x44b   : > { %v5244_v36 = vadd.f32 %v7120_v31, %v10859_v46  ;;  %v11073_v1 = vadd.f32 %v10865_v63, %v5241_v8 }
 0x44d   : > { %v7121_v15 = vpop.f32.mrb[116].mxu1  ;;  %v11076_v52 = vadd.f32 %v10869_v30, %v5244_v36 }
 0x44e   : > { %v7122_v16 = vpop.f32.mrb[117].mxu1 }
 0x44f   : > { %v7123_v40 = vadd.f32 %v7122_v16, %v7121_v15  ;;  %v7124_v23 = vpop.f32.mrb[118].mxu1 }
 0x450   : > { %v7125_v5 = vpop.f32.mrb[119].mxu1 }
 0x451   : > { %v5249_v56 = vadd.f32 %v7123_v40, %v10867_v20  ;;  %v7126_v48 = vadd.f32 %v7125_v5, %v7124_v23 }
 0x453   : > { %v5252_v50 = vadd.f32 %v7126_v48, %v10871_v14  ;;  %v11081_v29 = vadd.f32 %v10881_v49, %v5249_v56 }
 0x455   : > { %v7127_v46 = vpop.f32.mrb[120].mxu1  ;;  %v11084_v63 = vadd.f32 %v10885_v42, %v5252_v50 }
 0x456   : > { %v7128_v55 = vpop.f32.mrb[121].mxu1 }
 0x457   : > { %v7129_v12 = vadd.f32 %v7128_v55, %v7127_v46  ;;  %v7130_v30 = vpop.f32.mrb[122].mxu1 }
 0x458   : > { %v7131_v0 = vpop.f32.mrb[123].mxu1 }
 0x459   : > { %v5257_v7 = vadd.f32 %v7129_v12, %v10883_v26  ;;  %v7132_v59 = vadd.f32 %v7131_v0, %v7130_v30 }
 0x45a   : > { %v11088_v20 = vpop.f32.mrb[200].mxu0 }
 0x45b   : > { %v5260_v33 = vadd.f32 %v7132_v59, %v10887_v3  ;;  %v11091_v14 = vadd.f32 %v10893_v61, %v5257_v7  ;;  %v11093_v49 = vpop.f32.mrb[201].mxu0 }
 0x45c   : > { %v11095_v8 = vpop.f32.mrb[202].mxu0 }
 0x45d   : > { %v7133_v9 = vpop.f32.mrb[124].mxu1  ;;  %v11098_v42 = vadd.f32 %v10897_v51, %v5260_v33  ;;  %v11100_v36 = vpop.f32.mrb[203].mxu0 }
 0x45e   : > { %v7134_v31 = vpop.f32.mrb[125].mxu1 }
 0x45f   : > { %v7135_v26 = vadd.f32 %v7134_v31, %v7133_v9  ;;  %v7136_v15 = vpop.f32.mrb[126].mxu1 }
 0x460   : > { %v7137_v16 = vpop.f32.mrb[127].mxu1 }
 0x461   : > { %v5265_v3 = vadd.f32 %v7135_v26, %v10895_v13  ;;  %v7138_v40 = vadd.f32 %v7137_v16, %v7136_v15  ;;  %v11114_v13 = vld [vmem:[%s11278_s5] ss:$0 sm:$0xff] }
 0x463   : > { %v5268_v61 = vadd.f32 %v7138_v40, %v10899_v32  ;;  %v11105_v23 = vadd.f32 %v10933_v39, %v5265_v3 }
 0x465   : > { %v7267_v5 = vpop.f32.mrb[128].mxu1  ;;  %v11108_v56 = vadd.f32 %v10935_v10, %v5268_v61  ;;  %v11121_v10 = vld [vmem:[%s11279_s6] ss:$0 sm:$0xff] }
 0x466   : > { %v7268_v51 = vpop.f32.mrb[129].mxu1 }
 0x467   : > { %v7269_v48 = vadd.f32 %v7268_v51, %v7267_v5  ;;  %v7270_v50 = vpop.f32.mrb[130].mxu1 }
 0x468   : > { %v7271_v46 = vpop.f32.mrb[131].mxu1 }
 0x469   : > { %v5467_v55 = vadd.f32 %v7269_v48, %v10908_v18  ;;  %v7272_v12 = vadd.f32 %v7271_v46, %v7270_v50 }
 0x46b   : > { %v5628_v32 = vadd.f32 %v10946_v2, %v5467_v55  ;;  %v5470_v39 = vadd.f32 %v7272_v12, %v10911_v62 }
 0x46d   : > { %v5760_v30 = vmul.f32 %v11114_v13, %v5628_v32  ;;  %v5631_v0 = vadd.f32 %v10953_v38, %v5470_v39  ;;  %v7273_v18 = vpop.f32.mrb[132].mxu1 }
 0x46e   : > { %v7274_v7 = vpop.f32.mrb[133].mxu1 }
 0x46f   : > { %v5798_v59 = vadd.f32 %v11121_v10, %v5760_v30  ;;  %v5761_v33 = vmul.f32 %v11114_v13, %v5631_v0  ;;  %v7275_v9 = vadd.f32 %v7274_v7, %v7273_v18  ;;  %v7276_v31 = vpop.f32.mrb[134].mxu1 }
 0x470   : > { %v7277_v2 = vpop.f32.mrb[135].mxu1 }
 0x471   : > { %v5799_v62 = vadd.f32 %v11121_v10, %v5761_v33  ;;  %v5475_v26 = vadd.f32 %v7275_v9, %v10918_v41  ;;  %v7278_v15 = vadd.f32 %v7277_v2, %v7276_v31  ;;  %v5830_v16 = vmax.f32 %v5798_v59, 0.0 }
 0x473   : > { %v5831_v3 = vmax.f32 %v5799_v62, 0.0  ;;  %v5636_v40 = vadd.f32 %v10944_v43, %v5475_v26  ;;  %v5478_v38 = vadd.f32 %v7278_v15, %v10921_v44 }
 0x475   : > { %v6767_v61 = vpack.c.bf16 %v5831_v3, %v5830_v16  ;;  %v5762_v5 = vmul.f32 %v11114_v13, %v5636_v40  ;;  %v5639_v51 = vadd.f32 %v10951_v6, %v5478_v38  ;;  %v7279_v48 = vpop.f32.mrb[136].mxu1 }
 0x476   : > { %v7280_v41 = vpop.f32.mrb[137].mxu1 }
 0x477   : > { %6768 = vst [vmem:[%s11135_s29] sm:$0xff] %v6767_v61   ;;  %v5800_v50 = vadd.f32 %v11121_v10, %v5762_v5  ;;  %v5763_v43 = vmul.f32 %v11114_v13, %v5639_v51  ;;  %v7281_v44 = vadd.f32 %v7280_v41, %v7279_v48  ;;  %v7282_v46 = vpop.f32.mrb[138].mxu1 }
 0x478   : > { %v7283_v55 = vpop.f32.mrb[139].mxu1 }
 0x479   : > { %v5801_v12 = vadd.f32 %v11121_v10, %v5763_v43  ;;  %v5483_v32 = vadd.f32 %v7281_v44, %v10928_v21  ;;  %v7284_v39 = vadd.f32 %v7283_v55, %v7282_v46  ;;  %v5832_v30 = vmax.f32 %v5800_v50, 0.0 }
 0x47b   : > { %v5833_v0 = vmax.f32 %v5801_v12, 0.0  ;;  %v5644_v6 = vadd.f32 %v10965_v24, %v5483_v32  ;;  %v5486_v18 = vadd.f32 %v7284_v39, %v10931_v37 }
 0x47d   : > { %v6772_v7 = vpack.c.bf16 %v5833_v0, %v5832_v30  ;;  %v5764_v59 = vmul.f32 %v11114_v13, %v5644_v6  ;;  %v5647_v33 = vadd.f32 %v10972_v11, %v5486_v18  ;;  %v7285_v9 = vpop.f32.mrb[140].mxu1 }
 0x47e   : > { %v7286_v31 = vpop.f32.mrb[141].mxu1 }
 0x47f   : > { %6870 = vst [vmem:[%s11135_s29 + $0x8] sm:$0xff] %v6772_v7   ;;  %v5802_v2 = vadd.f32 %v11121_v10, %v5764_v59  ;;  %v5765_v62 = vmul.f32 %v11114_v13, %v5647_v33  ;;  %v7287_v21 = vadd.f32 %v7286_v31, %v7285_v9  ;;  %v7288_v26 = vpop.f32.mrb[142].mxu1 }
 0x480   : > { %v7289_v15 = vpop.f32.mrb[143].mxu1 }
 0x481   : > { %v5803_v24 = vadd.f32 %v11121_v10, %v5765_v62  ;;  %v5491_v37 = vadd.f32 %v7287_v21, %v10942_v34  ;;  %v7290_v16 = vadd.f32 %v7289_v15, %v7288_v26  ;;  %v5834_v3 = vmax.f32 %v5802_v2, 0.0 }
 0x483   : > { %v5835_v40 = vmax.f32 %v5803_v24, 0.0  ;;  %v5652_v11 = vadd.f32 %v10963_v53, %v5491_v37  ;;  %v5494_v38 = vadd.f32 %v7290_v16, %v10949_v58 }
 0x485   : > { %v6777_v61 = vpack.c.bf16 %v5835_v40, %v5834_v3  ;;  %v5766_v5 = vmul.f32 %v11114_v13, %v5652_v11  ;;  %v5655_v51 = vadd.f32 %v10970_v22, %v5494_v38  ;;  %v7291_v48 = vpop.f32.mrb[144].mxu1 }
 0x486   : > { %v7292_v41 = vpop.f32.mrb[145].mxu1 }
 0x487   : > { %6871 = vst [vmem:[%s11135_s29 + $0x10] sm:$0xff] %v6777_v61   ;;  %v5804_v50 = vadd.f32 %v11121_v10, %v5766_v5  ;;  %v5767_v43 = vmul.f32 %v11114_v13, %v5655_v51  ;;  %v7293_v34 = vadd.f32 %v7292_v41, %v7291_v48  ;;  %v7294_v44 = vpop.f32.mrb[146].mxu1  ;;  %v11408_v5 = vld [vmem:[#allocation3_spill] sm:$0xff] }
 0x488   : > { %v7295_v46 = vpop.f32.mrb[147].mxu1 }
 0x489   : > { %v5805_v53 = vadd.f32 %v11121_v10, %v5767_v43  ;;  %v5499_v58 = vadd.f32 %v7293_v34, %v10961_v54  ;;  %v7296_v55 = vadd.f32 %v7295_v46, %v7294_v44  ;;  %v5836_v12 = vmax.f32 %v5804_v50, 0.0  ;;  %v11409_v50 = vld [vmem:[#allocation5_spill] sm:$0xff]  ;;  %v11410_v43 = vld [vmem:[#allocation6_spill] sm:$0xff] }
 0x48b   : > { %v5837_v32 = vmax.f32 %v5805_v53, 0.0  ;;  %v5660_v22 = vadd.f32 %v10981_v27, %v5499_v58  ;;  %v5502_v39 = vadd.f32 %v7296_v55, %v10968_v57  ;;  %v11411_v53 = vld [vmem:[#allocation12_spill] sm:$0xff] }
 0x48d   : > { %v6782_v30 = vpack.c.bf16 %v5837_v32, %v5836_v12  ;;  %v5768_v0 = vmul.f32 %v11114_v13, %v5660_v22  ;;  %v5663_v6 = vadd.f32 %v10988_v19, %v5502_v39  ;;  %v7297_v18 = vpop.f32.mrb[148].mxu1 }
 0x48e   : > { %v7298_v7 = vpop.f32.mrb[149].mxu1 }
 0x48f   : > { %6872 = vst [vmem:[%s11135_s29 + $0x18] sm:$0xff] %v6782_v30   ;;  %v5806_v59 = vadd.f32 %v11121_v10, %v5768_v0  ;;  %v5769_v33 = vmul.f32 %v11114_v13, %v5663_v6  ;;  %v7299_v54 = vadd.f32 %v7298_v7, %v7297_v18  ;;  %v7300_v9 = vpop.f32.mrb[150].mxu1  ;;  %v11412_v18 = vld [vmem:[#allocation13_spill] sm:$0xff] }
 0x490   : > { %v7301_v31 = vpop.f32.mrb[151].mxu1 }
 0x491   : > { %v5807_v27 = vadd.f32 %v11121_v10, %v5769_v33  ;;  %v5507_v57 = vadd.f32 %v7299_v54, %v10977_v25  ;;  %v7302_v2 = vadd.f32 %v7301_v31, %v7300_v9  ;;  %v5838_v62 = vmax.f32 %v5806_v59, 0.0  ;;  %v11413_v9 = vld [vmem:[#allocation4_spill] sm:$0xff] }
 0x493   : > { %v5839_v21 = vmax.f32 %v5807_v27, 0.0  ;;  %v5668_v19 = vadd.f32 %v10979_v28, %v5507_v57  ;;  %v5510_v26 = vadd.f32 %v7302_v2, %v10984_v17  ;;  %v11414_v27 = vld [vmem:[#allocation8_spill] sm:$0xff] }
 0x495   : > { %v6787_v15 = vpack.c.bf16 %v5839_v21, %v5838_v62  ;;  %v5770_v24 = vmul.f32 %v11114_v13, %v5668_v19  ;;  %v5671_v37 = vadd.f32 %v10986_v47, %v5510_v26  ;;  %v7303_v16 = vpop.f32.mrb[152].mxu1  ;;  %v11415_v21 = vld [vmem:[#allocation7_spill] sm:$0xff] }
 0x496   : > { %v7304_v3 = vpop.f32.mrb[153].mxu1 }
 0x497   : > { %6873 = vst [vmem:[%s11135_s29 + $0x20] sm:$0xff] %v6787_v15   ;;  %v5808_v40 = vadd.f32 %v11121_v10, %v5770_v24  ;;  %v5771_v11 = vmul.f32 %v11114_v13, %v5671_v37  ;;  %v7305_v25 = vadd.f32 %v7304_v3, %v7303_v16  ;;  %v7306_v38 = vpop.f32.mrb[154].mxu1 }
 0x498   : > { %v7307_v61 = vpop.f32.mrb[155].mxu1 }
 0x499   : > { %v5809_v28 = vadd.f32 %v11121_v10, %v5771_v11  ;;  %v5515_v17 = vadd.f32 %v7305_v25, %v11408_v5  ;;  %v7308_v51 = vadd.f32 %v7307_v61, %v7306_v38  ;;  %v5840_v48 = vmax.f32 %v5808_v40, 0.0  ;;  %v11416_v25 = vld [vmem:[#allocation10_spill] sm:$0xff] }
 0x49b   : > { %v5841_v41 = vmax.f32 %v5809_v28, 0.0  ;;  %v5676_v47 = vadd.f32 %v11409_v50, %v5515_v17  ;;  %v5518_v34 = vadd.f32 %v7308_v51, %v11410_v43  ;;  %v11417_v17 = vld [vmem:[#allocation19_spill] sm:$0xff]  ;;  %v11419_v43 = vld [vmem:[#allocation24_spill] sm:$0xff] }
 0x49d   : > { %v6792_v44 = vpack.c.bf16 %v5841_v41, %v5840_v48  ;;  %v5772_v46 = vmul.f32 %v11114_v13, %v5676_v47  ;;  %v5679_v58 = vadd.f32 %v11411_v53, %v5518_v34  ;;  %v7309_v55 = vpop.f32.mrb[156].mxu1  ;;  %v11418_v48 = vld [vmem:[#allocation15_spill] sm:$0xff] }
 0x49e   : > { %v7310_v12 = vpop.f32.mrb[157].mxu1 }
 0x49f   : > { %6874 = vst [vmem:[%s11135_s29 + $0x28] sm:$0xff] %v6792_v44   ;;  %v5810_v32 = vadd.f32 %v11121_v10, %v5772_v46  ;;  %v5773_v22 = vmul.f32 %v11114_v13, %v5679_v58  ;;  %v7311_v39 = vadd.f32 %v7310_v12, %v7309_v55  ;;  %v7312_v30 = vpop.f32.mrb[158].mxu1 }
 0x4a0   : > { %v7313_v0 = vpop.f32.mrb[159].mxu1 }
 0x4a1   : > { %v5811_v6 = vadd.f32 %v11121_v10, %v5773_v22  ;;  %v5523_v7 = vadd.f32 %v7311_v39, %v11412_v18  ;;  %v7314_v59 = vadd.f32 %v7313_v0, %v7312_v30  ;;  %v5842_v33 = vmax.f32 %v5810_v32, 0.0  ;;  %v11420_v39 = vld [vmem:[#allocation20_spill] sm:$0xff] }
 0x4a3   : > { %v5843_v54 = vmax.f32 %v5811_v6, 0.0  ;;  %v5684_v31 = vadd.f32 %v11413_v9, %v5523_v7  ;;  %v5526_v57 = vadd.f32 %v7314_v59, %v11414_v27  ;;  %v11421_v7 = vld [vmem:[#allocation18_spill] sm:$0xff]  ;;  %v11423_v27 = vld [vmem:[#allocation9_spill] sm:$0xff] }
 0x4a5   : > { %v6797_v2 = vpack.c.bf16 %v5843_v54, %v5842_v33  ;;  %v5774_v62 = vmul.f32 %v11114_v13, %v5684_v31  ;;  %v5687_v19 = vadd.f32 %v11415_v21, %v5526_v57  ;;  %v7315_v26 = vpop.f32.mrb[160].mxu1  ;;  %v11422_v33 = vld [vmem:[#allocation23_spill] sm:$0xff] }
 0x4a6   : > { %v7316_v15 = vpop.f32.mrb[161].mxu1 }
 0x4a7   : > { %6875 = vst [vmem:[%s11135_s29 + $0x30] sm:$0xff] %v6797_v2   ;;  %v5812_v24 = vadd.f32 %v11121_v10, %v5774_v62  ;;  %v5775_v37 = vmul.f32 %v11114_v13, %v5687_v19  ;;  %v7317_v16 = vadd.f32 %v7316_v15, %v7315_v26  ;;  %v7318_v3 = vpop.f32.mrb[162].mxu1 }
 0x4a8   : > { %v7319_v40 = vpop.f32.mrb[163].mxu1 }
 0x4a9   : > { %v5813_v11 = vadd.f32 %v11121_v10, %v5775_v37  ;;  %v5531_v38 = vadd.f32 %v7317_v16, %v11416_v25  ;;  %v7320_v61 = vadd.f32 %v7319_v40, %v7318_v3  ;;  %v5844_v28 = vmax.f32 %v5812_v24, 0.0  ;;  %v11424_v25 = vld [vmem:[#allocation14_spill] sm:$0xff] }
 0x4ab   : > { %v5845_v5 = vmax.f32 %v5813_v11, 0.0  ;;  %v5692_v51 = vadd.f32 %v11417_v17, %v5531_v38  ;;  %v5534_v41 = vadd.f32 %v7320_v61, %v11418_v48  ;;  %v11425_v17 = vld [vmem:[#allocation17_spill] sm:$0xff] }
 0x4ad   : > { %v6802_v50 = vpack.c.bf16 %v5845_v5, %v5844_v28  ;;  %v5776_v47 = vmul.f32 %v11114_v13, %v5692_v51  ;;  %v5695_v34 = vadd.f32 %v11419_v43, %v5534_v41  ;;  %v7321_v44 = vpop.f32.mrb[164].mxu1 }
 0x4ae   : > { %v7322_v46 = vpop.f32.mrb[165].mxu1 }
 0x4af   : > { %6876 = vst [vmem:[%s11135_s29 + $0x38] sm:$0xff] %v6802_v50   ;;  %v5814_v53 = vadd.f32 %v11121_v10, %v5776_v47  ;;  %v5777_v58 = vmul.f32 %v11114_v13, %v5695_v34  ;;  %v7323_v55 = vadd.f32 %v7322_v46, %v7321_v44  ;;  %v7324_v12 = vpop.f32.mrb[166].mxu1 }
 0x4b0   : > { %v7325_v32 = vpop.f32.mrb[167].mxu1 }
 0x4b1   : > { %v5815_v22 = vadd.f32 %v11121_v10, %v5777_v58  ;;  %v5539_v30 = vadd.f32 %v7323_v55, %v11420_v39  ;;  %v7326_v0 = vadd.f32 %v7325_v32, %v7324_v12  ;;  %v5846_v6 = vmax.f32 %v5814_v53, 0.0  ;;  %v11426_v55 = vld [vmem:[#allocation11_spill] sm:$0xff] }
 0x4b3   : > { %v5847_v18 = vmax.f32 %v5815_v22, 0.0  ;;  %v5700_v59 = vadd.f32 %v11421_v7, %v5539_v30  ;;  %v5542_v54 = vadd.f32 %v7326_v0, %v11422_v33  ;;  %v11427_v30 = vld [vmem:[#allocation16_spill] sm:$0xff] }
 0x4b5   : > { %v6807_v9 = vpack.c.bf16 %v5847_v18, %v5846_v6  ;;  %v5778_v31 = vmul.f32 %v11114_v13, %v5700_v59  ;;  %v5703_v57 = vadd.f32 %v11423_v27, %v5542_v54  ;;  %v7327_v2 = vpop.f32.mrb[168].mxu1 }
 0x4b6   : > { %v7328_v62 = vpop.f32.mrb[169].mxu1 }
 0x4b7   : > { %6877 = vst [vmem:[%s11135_s29 + $0x40] sm:$0xff] %v6807_v9   ;;  %v5816_v21 = vadd.f32 %v11121_v10, %v5778_v31  ;;  %v5779_v19 = vmul.f32 %v11114_v13, %v5703_v57  ;;  %v7329_v26 = vadd.f32 %v7328_v62, %v7327_v2  ;;  %v7330_v15 = vpop.f32.mrb[170].mxu1  ;;  %v11428_v2 = vld [vmem:[#allocation22_spill] sm:$0xff] }
 0x4b8   : > { %v7331_v24 = vpop.f32.mrb[171].mxu1 }
 0x4b9   : > { %v5817_v37 = vadd.f32 %v11121_v10, %v5779_v19  ;;  %v5547_v16 = vadd.f32 %v7329_v26, %v11057_v60  ;;  %v7332_v3 = vadd.f32 %v7331_v24, %v7330_v15  ;;  %v5848_v40 = vmax.f32 %v5816_v21, 0.0  ;;  %v11429_v15 = vld [vmem:[#allocation25_spill] sm:$0xff] }
 0x4bb   : > { %v5849_v11 = vmax.f32 %v5817_v37, 0.0  ;;  %v5708_v38 = vadd.f32 %v11424_v25, %v5547_v16  ;;  %v5550_v61 = vadd.f32 %v7332_v3, %v11060_v45 }
 0x4bd   : > { %v6812_v28 = vpack.c.bf16 %v5849_v11, %v5848_v40  ;;  %v5780_v5 = vmul.f32 %v11114_v13, %v5708_v38  ;;  %v5711_v51 = vadd.f32 %v11425_v17, %v5550_v61  ;;  %v7333_v48 = vpop.f32.mrb[172].mxu1  ;;  %v11430_v17 = vld [vmem:[#allocation21_spill] sm:$0xff] }
 0x4be   : > { %v7334_v41 = vpop.f32.mrb[173].mxu1 }
 0x4bf   : > { %6878 = vst [vmem:[%s11135_s29 + $0x48] sm:$0xff] %v6812_v28   ;;  %v5818_v50 = vadd.f32 %v11121_v10, %v5780_v5  ;;  %v5781_v47 = vmul.f32 %v11114_v13, %v5711_v51  ;;  %v7335_v60 = vadd.f32 %v7334_v41, %v7333_v48  ;;  %v7336_v43 = vpop.f32.mrb[174].mxu1 }
 0x4c0   : > { %v7337_v34 = vpop.f32.mrb[175].mxu1 }
 0x4c1   : > { %v5819_v44 = vadd.f32 %v11121_v10, %v5781_v47  ;;  %v5555_v45 = vadd.f32 %v7335_v60, %v11065_v4  ;;  %v7338_v46 = vadd.f32 %v7337_v34, %v7336_v43  ;;  %v5850_v53 = vmax.f32 %v5818_v50, 0.0  ;;  %v11431_v47 = vld [vmem:[#allocation29_spill] sm:$0xff] }
 0x4c3   : > { %v5851_v58 = vmax.f32 %v5819_v44, 0.0  ;;  %v5716_v12 = vadd.f32 %v11426_v55, %v5555_v45  ;;  %v5558_v32 = vadd.f32 %v7338_v46, %v11068_v35 }
 0x4c5   : > { %v6817_v22 = vpack.c.bf16 %v5851_v58, %v5850_v53  ;;  %v5782_v39 = vmul.f32 %v11114_v13, %v5716_v12  ;;  %v5719_v0 = vadd.f32 %v11427_v30, %v5558_v32  ;;  %v7339_v6 = vpop.f32.mrb[176].mxu1 }
 0x4c6   : > { %v7340_v18 = vpop.f32.mrb[177].mxu1 }
 0x4c7   : > { %6879 = vst [vmem:[%s11135_s29 + $0x50] sm:$0xff] %v6817_v22   ;;  %v5820_v7 = vadd.f32 %v11121_v10, %v5782_v39  ;;  %v5783_v59 = vmul.f32 %v11114_v13, %v5719_v0  ;;  %v7341_v4 = vadd.f32 %v7340_v18, %v7339_v6  ;;  %v7342_v33 = vpop.f32.mrb[178].mxu1 }
 0x4c8   : > { %v7343_v54 = vpop.f32.mrb[179].mxu1 }
 0x4c9   : > { %v5821_v9 = vadd.f32 %v11121_v10, %v5783_v59  ;;  %v5563_v35 = vadd.f32 %v7341_v4, %v11073_v1  ;;  %v7344_v31 = vadd.f32 %v7343_v54, %v7342_v33  ;;  %v5852_v27 = vmax.f32 %v5820_v7, 0.0 }
 0x4cb   : > { %v5853_v57 = vmax.f32 %v5821_v9, 0.0  ;;  %v5724_v62 = vadd.f32 %v11428_v2, %v5563_v35  ;;  %v5566_v21 = vadd.f32 %v7344_v31, %v11076_v52 }
 0x4cd   : > { %v6822_v19 = vpack.c.bf16 %v5853_v57, %v5852_v27  ;;  %v5784_v26 = vmul.f32 %v11114_v13, %v5724_v62  ;;  %v5727_v24 = vadd.f32 %v11429_v15, %v5566_v21  ;;  %v7345_v37 = vpop.f32.mrb[180].mxu1 }
 0x4ce   : > { %v7346_v16 = vpop.f32.mrb[181].mxu1 }
 0x4cf   : > { %6880 = vst [vmem:[%s11135_s29 + $0x58] sm:$0xff] %v6822_v19   ;;  %v5822_v3 = vadd.f32 %v11121_v10, %v5784_v26  ;;  %v5785_v40 = vmul.f32 %v11114_v13, %v5727_v24  ;;  %v7347_v1 = vadd.f32 %v7346_v16, %v7345_v37  ;;  %v7348_v11 = vpop.f32.mrb[182].mxu1 }
 0x4d0   : > { %v7349_v25 = vpop.f32.mrb[183].mxu1 }
 0x4d1   : > { %v5823_v38 = vadd.f32 %v11121_v10, %v5785_v40  ;;  %v5571_v52 = vadd.f32 %v7347_v1, %v11081_v29  ;;  %v7350_v61 = vadd.f32 %v7349_v25, %v7348_v11  ;;  %v5854_v28 = vmax.f32 %v5822_v3, 0.0 }
 0x4d3   : > { %v5855_v5 = vmax.f32 %v5823_v38, 0.0  ;;  %v5732_v51 = vadd.f32 %v11430_v17, %v5571_v52  ;;  %v5574_v48 = vadd.f32 %v7350_v61, %v11084_v63 }
 0x4d5   : > { %v6827_v41 = vpack.c.bf16 %v5855_v5, %v5854_v28  ;;  %v5786_v50 = vmul.f32 %v11114_v13, %v5732_v51  ;;  %v5735_v60 = vadd.f32 %v11431_v47, %v5574_v48  ;;  %v7351_v43 = vpop.f32.mrb[184].mxu1 }
 0x4d6   : > { %v7352_v34 = vpop.f32.mrb[185].mxu1 }
 0x4d7   : > { %6881 = vst [vmem:[%s11135_s29 + $0x60] sm:$0xff] %v6827_v41   ;;  %v5824_v44 = vadd.f32 %v11121_v10, %v5786_v50  ;;  %v5787_v45 = vmul.f32 %v11114_v13, %v5735_v60  ;;  %v7353_v29 = vadd.f32 %v7352_v34, %v7351_v43  ;;  %v7354_v46 = vpop.f32.mrb[186].mxu1 }
 0x4d8   : > { %v7355_v53 = vpop.f32.mrb[187].mxu1 }
 0x4d9   : > { %v5825_v58 = vadd.f32 %v11121_v10, %v5787_v45  ;;  %v7356_v55 = vadd.f32 %v7355_v53, %v7354_v46  ;;  %v5579_v63 = vadd.f32 %v7353_v29, %v11091_v14  ;;  %v5856_v12 = vmax.f32 %v5824_v44, 0.0 }
 0x4db   : > { %v5857_v32 = vmax.f32 %v5825_v58, 0.0  ;;  %v5740_v22 = vadd.f32 %v11093_v49, %v5579_v63  ;;  %v5582_v39 = vadd.f32 %v7356_v55, %v11098_v42 }
 0x4dd   : > { %v6832_v30 = vpack.c.bf16 %v5857_v32, %v5856_v12  ;;  %v5788_v0 = vmul.f32 %v11114_v13, %v5740_v22  ;;  %v5743_v6 = vadd.f32 %v11100_v36, %v5582_v39  ;;  %v7357_v18 = vpop.f32.mrb[188].mxu1 }
 0x4de   : > { %v7358_v7 = vpop.f32.mrb[189].mxu1 }
 0x4df   : > { %6882 = vst [vmem:[%s11135_s29 + $0x68] sm:$0xff] %v6832_v30   ;;  %v5826_v59 = vadd.f32 %v11121_v10, %v5788_v0  ;;  %v5789_v4 = vmul.f32 %v11114_v13, %v5743_v6  ;;  %v7359_v14 = vadd.f32 %v7358_v7, %v7357_v18  ;;  %v7360_v33 = vpop.f32.mrb[190].mxu1 }
 0x4e0   : > { %v7361_v54 = vpop.f32.mrb[191].mxu1 }
 0x4e1   : > { %v5827_v49 = vadd.f32 %v11121_v10, %v5789_v4  ;;  %v5587_v42 = vadd.f32 %v7359_v14, %v11105_v23  ;;  %v7362_v9 = vadd.f32 %v7361_v54, %v7360_v33  ;;  %v5858_v35 = vmax.f32 %v5826_v59, 0.0 }
 0x4e3   : > { %v5859_v31 = vmax.f32 %v5827_v49, 0.0  ;;  %v5748_v36 = vadd.f32 %v11088_v20, %v5587_v42  ;;  %v5590_v27 = vadd.f32 %v7362_v9, %v11108_v56 }
 0x4e5   : > { %v6837_v57 = vpack.c.bf16 %v5859_v31, %v5858_v35  ;;  %v5790_v2 = vmul.f32 %v11114_v13, %v5748_v36  ;;  %v5751_v62 = vadd.f32 %v11095_v8, %v5590_v27 }
 0x4e7   : > { %6883 = vst [vmem:[%s11135_s29 + $0x70] sm:$0xff] %v6837_v57   ;;  %v5828_v21 = vadd.f32 %v11121_v10, %v5790_v2  ;;  %v5791_v19 = vmul.f32 %v11114_v13, %v5751_v62 }
 0x4e9   : > { %v5829_v23 = vadd.f32 %v11121_v10, %v5791_v19  ;;  %v5860_v26 = vmax.f32 %v5828_v21, 0.0 }
 0x4eb   : > { %v5861_v15 = vmax.f32 %v5829_v23, 0.0 }
 0x4ed   : > { %v6842_v24 = vpack.c.bf16 %v5861_v15, %v5860_v26 }
 0x4ef   : > { %6884 = vst [vmem:[%s11135_s29 + $0x78] sm:$0xff] %v6842_v24  }
 0x4f0 PF: > { %s17_s24 = sadd.s32 1, %s7736_s24  }
 0x4f1   : > { %p14_p4 = scmp.ge.s32.totalorder %s17_s24, 4  }
 0x4f3   :  { %16 = sbr.rel (!%p14_p4) target bundleno = 1 (0x1), region = 79 }

</bundles_post_ra>
